<compile_context>
chip_gen: v7x
topology: tpu7x:2x2x1
jax: 0.10.0
libtpu: 0.0.40
codegen_flags: <defaults>
</compile_context>

<pallas_src>
import math

import jax
import jax.numpy as jnp
from jax.experimental import pallas as pl
from jax.experimental.pallas import tpu as pltpu


# ----------------------------------------------------------------------------
# Fused multi-layer GRU kernel (one grid step == t_block timesteps, all layers)
# ----------------------------------------------------------------------------
def _make_encoder_gru_kernel(n_layers, hidden_dim, seq_len, t_block):
    H = hidden_dim
    G = 3 * H
    needs_mask = (seq_len % t_block) != 0

    def kernel(x_ref, wih0_ref, wihr_ref, whh_ref, bih_ref, bhn_ref,
               out_ref, hfin_ref, h_scr, xt_scr, gx_scr, act_scr):
        # x_ref    : (B, t_block, Dpad)  bf16   batch_first input block
        # wih0_ref : (Dpad, 3H)          bf16   layer-0 input weights (resident)
        # wihr_ref : (max(L-1,1), H, 3H) bf16   layers>=1 input weights
        # whh_ref  : (L, H, 3H)          bf16   recurrent weights
        # bih_ref  : (L, 1, 3H)          f32    b_ih with b_hr/b_hz folded in
        # bhn_ref  : (L, 1, H)           f32    b_hn (stays inside r*(...))
        # out_ref  : (B, t_block, H)     f32    last-layer outputs (batch_first)
        # hfin_ref : (L, B, H)           f32    final hidden states (resident)
        B = x_ref.shape[0]
        t = pl.program_id(0)
        t0 = t * t_block

        @pl.when(t == 0)
        def _init():
            h_scr[...] = jnp.zeros_like(h_scr)      # nn.GRU default h0 = zeros

        # Relayout this block's input to time-major *inside VMEM* (no HBM cost,
        # static indices -> plain window copies).
        for j in range(t_block):
            xt_scr[j] = x_ref[:, j, :]

        for l in range(n_layers):                   # layers fused in one kernel
            # ---- whole-block input-side projection: one MXU matmul ----------
            if l == 0:
                inp2d = xt_scr[...].reshape(t_block * B, xt_scr.shape[-1])
                wih = wih0_ref[...]
            else:
                inp2d = act_scr[...].astype(jnp.bfloat16).reshape(t_block * B, H)
                wih = wihr_ref[l - 1]
            gx2d = jnp.dot(inp2d, wih, preferred_element_type=jnp.float32)
            # b_ih (+ folded b_hr, b_hz) added once per block, off the serial
            # path; result parked in a time-major VMEM scratch.
            gx_scr[...] = (gx2d + bih_ref[l]).reshape(t_block, B, G)

            whh_l = whh_ref[l]                      # (H, 3H) bf16, hoisted
            bhn_l = bhn_ref[l]                      # (1, H)  f32, hoisted

            def step(i, h):
                gx = gx_scr[i]                      # (B, 3H) leading-axis load
                gh = jnp.dot(h.astype(jnp.bfloat16), whh_l,
                             preferred_element_type=jnp.float32)
                r = jax.nn.sigmoid(gx[:, :H] + gh[:, :H])
                z = jax.nn.sigmoid(gx[:, H:2 * H] + gh[:, H:2 * H])
                n = jnp.tanh(gx[:, 2 * H:] + r * (gh[:, 2 * H:] + bhn_l))
                h_new = (1.0 - z) * n + z * h
                if needs_mask:                      # padded tail keeps old h
                    h_new = jnp.where(t0 + i < seq_len, h_new, h)
                act_scr[i] = h_new
                return h_new

            h_scr[l] = jax.lax.fori_loop(0, t_block, step, h_scr[l],
                                         unroll=True)

        # Last layer's block activations -> batch_first output block (the HBM
        # writeback DMA is one dense (B, t_block, H) transfer per block).
        for j in range(t_block):
            out_ref[:, j, :] = act_scr[j].astype(out_ref.dtype)

        # Per-layer final hidden state (constant-index resident output block;
        # value is already sitting in h_scr -- no extra HBM read in wrapper).
        hfin_ref[...] = h_scr[...].astype(hfin_ref.dtype)

    return kernel


# ----------------------------------------------------------------------------
# Weight packing (stack layers, fold biases, bf16 cast, pad layer-0 rows)
# ----------------------------------------------------------------------------
def _pack_weights(layers, d_pad):
    n_layers = len(layers)
    H = layers[0]["w_hh"].shape[0]
    G = 3 * H

    w0 = layers[0]["w_ih"].astype(jnp.float32)
    if w0.shape[0] != d_pad:
        w0 = jnp.pad(w0, ((0, d_pad - w0.shape[0]), (0, 0)))
    wih0 = w0.astype(jnp.bfloat16)

    if n_layers > 1:
        wihr = jnp.stack([layers[l]["w_ih"] for l in range(1, n_layers)]
                         ).astype(jnp.bfloat16)
    else:
        wihr = jnp.zeros((1, H, G), jnp.bfloat16)          # dummy, never read

    whh = jnp.stack([lp["w_hh"] for lp in layers]).astype(jnp.bfloat16)

    # Fold b_hr, b_hz into the input-side bias; only b_hn stays per-step.
    bih = jnp.stack([
        jnp.concatenate([lp["b_ih"][:2 * H] + lp["b_hh"][:2 * H],
                         lp["b_ih"][2 * H:]])
        for lp in layers]).reshape(n_layers, 1, G).astype(jnp.float32)
    bhn = jnp.stack([lp["b_hh"][2 * H:] for lp in layers]
                    ).reshape(n_layers, 1, H).astype(jnp.float32)
    return wih0, wihr, whh, bih, bhn


# ----------------------------------------------------------------------------
# Encoder forward:  outputs, state = gru(embedded_inputs)   (single pallas_call)
# ----------------------------------------------------------------------------
def encoder_forward(params, embedded_inputs):
    """embedded_inputs: (B, T, embedding_dim), batch_first.
    Returns (outputs (B, T, H), state (n_layers, B, H))."""
    layers = params["layers"]
    n_layers = len(layers)
    H = layers[0]["w_hh"].shape[0]
    G = 3 * H
    B, T, d_in = embedded_inputs.shape

    # Lane-dense contraction dim for the layer-0 input projection.
    d_pad = ((d_in + 127) // 128) * 128
    x = embedded_inputs.astype(jnp.float32)
    if d_pad != d_in:
        x = jnp.pad(x, ((0, 0), (0, 0), (0, d_pad - d_in)))
    x = x.astype(jnp.bfloat16)            # bf16 MXU operand, f32 accumulation

    wih0, wihr, whh, bih, bhn = _pack_weights(layers, d_pad)

    t_block = T if T <= 32 else 32
    num_blocks = pl.cdiv(T, t_block)
    n_rest = max(n_layers - 1, 1)
    kernel = _make_encoder_gru_kernel(n_layers, H, T, t_block)

    outputs, state = pl.pallas_call(
        kernel,
        out_shape=(jax.ShapeDtypeStruct((B, T, H), jnp.float32),
                   jax.ShapeDtypeStruct((n_layers, B, H), jnp.float32)),
        grid_spec=pltpu.PrefetchScalarGridSpec(
            num_scalar_prefetch=0,
            grid=(num_blocks,),
            in_specs=[
                pl.BlockSpec((B, t_block, d_pad), lambda t: (0, t, 0)),
                pl.BlockSpec((d_pad, G), lambda t: (0, 0)),           # resident
                pl.BlockSpec((n_rest, H, G), lambda t: (0, 0, 0)),    # resident
                pl.BlockSpec((n_layers, H, G), lambda t: (0, 0, 0)),  # resident
                pl.BlockSpec((n_layers, 1, G), lambda t: (0, 0, 0)),
                pl.BlockSpec((n_layers, 1, H), lambda t: (0, 0, 0)),
            ],
            out_specs=[
                pl.BlockSpec((B, t_block, H), lambda t: (0, t, 0)),
                pl.BlockSpec((n_layers, B, H), lambda t: (0, 0, 0)),
            ],
            scratch_shapes=[
                pltpu.VMEM((n_layers, B, H), jnp.float32),     # hidden states
                pltpu.VMEM((t_block, B, d_pad), jnp.bfloat16), # time-major x
                pltpu.VMEM((t_block, B, G), jnp.float32),      # gate inputs gx
                pltpu.VMEM((t_block, B, H), jnp.float32),      # layer activations
            ],
        ),
        compiler_params=pltpu.CompilerParams(
            dimension_semantics=("arbitrary",),   # recurrence => sequential time
        ),
    )(x, wih0, wihr, whh, bih, bhn)
    return outputs, state


# ----------------------------------------------------------------------------
# Deterministic PyTorch-style init (U(-1/sqrt(H), 1/sqrt(H)) for all params)
# ----------------------------------------------------------------------------
def init_params(key, embedding_dim, hidden_dim, n_layers):
    bound = 1.0 / math.sqrt(hidden_dim)
    layer_params = []
    for l in range(n_layers):
        din = embedding_dim if l == 0 else hidden_dim
        key, k1, k2, k3, k4 = jax.random.split(key, 5)
        layer_params.append({
            "w_ih": jax.random.uniform(k1, (din, 3 * hidden_dim), jnp.float32,
                                       -bound, bound),
            "b_ih": jax.random.uniform(k2, (3 * hidden_dim,), jnp.float32,
                                       -bound, bound),
            "w_hh": jax.random.uniform(k3, (hidden_dim, 3 * hidden_dim),
                                       jnp.float32, -bound, bound),
            "b_hh": jax.random.uniform(k4, (3 * hidden_dim,), jnp.float32,
                                       -bound, bound),
        })
    return {"layers": layer_params}


# ----------------------------------------------------------------------------
# Pure-JAX reference (for correctness checks)
# ----------------------------------------------------------------------------
def encoder_reference(params, x, bf16_matmul=False):
    cast = (lambda a: a.astype(jnp.bfloat16)) if bf16_matmul else (lambda a: a)
    B, T, _ = x.shape
    layer_in = x.astype(jnp.float32)
    finals = []
    for lp in params["layers"]:
        H = lp["w_hh"].shape[0]
        w_ih, w_hh = cast(lp["w_ih"]), cast(lp["w_hh"])
        h = jnp.zeros((B, H), jnp.float32)
        outs = []
        for t in range(T):
            gx = jnp.dot(cast(layer_in[:, t]), w_ih,
                         preferred_element_type=jnp.float32) + lp["b_ih"]
            gh = jnp.dot(cast(h), w_hh,
                         preferred_element_type=jnp.float32) + lp["b_hh"]
            r = jax.nn.sigmoid(gx[:, :H] + gh[:, :H])
            z = jax.nn.sigmoid(gx[:, H:2 * H] + gh[:, H:2 * H])
            n = jnp.tanh(gx[:, 2 * H:] + r * gh[:, 2 * H:])
            h = (1.0 - z) * n + z * h
            outs.append(h)
        layer_in = jnp.stack(outs, axis=1)
        finals.append(h)
    return layer_in, jnp.stack(finals, axis=0)


# ----------------------------------------------------------------------------
if __name__ == "__main__":
    B, T = 2, 8
    EMB_DIM, HIDDEN_DIM, N_LAYERS = 64, 128, 2    # lane-dense hidden (128)

    key = jax.random.PRNGKey(0)
    k_param, k_x = jax.random.split(key)
    params = init_params(k_param, EMB_DIM, HIDDEN_DIM, N_LAYERS)
    embedded_inputs = jax.random.normal(k_x, (B, T, EMB_DIM), jnp.float32)

    fwd = jax.jit(encoder_forward)
    outputs, state = jax.block_until_ready(fwd(params, embedded_inputs))

    assert outputs.shape == (B, T, HIDDEN_DIM), outputs.shape
    assert state.shape == (N_LAYERS, B, HIDDEN_DIM), state.shape
    assert bool(jnp.all(jnp.isfinite(outputs))) and bool(jnp.all(jnp.isfinite(state)))

    # Tight check against a reference using the same bf16 matmul inputs.
    ref_out_bf, ref_st_bf = encoder_reference(params, embedded_inputs,
                                              bf16_matmul=True)
    assert bool(jnp.allclose(outputs, ref_out_bf, rtol=2e-3, atol=2e-3))
    assert bool(jnp.allclose(state, ref_st_bf, rtol=2e-3, atol=2e-3))

    # Looser check against the full-f32 GRU reference (bf16 MXU drift bound).
    ref_out, ref_st = encoder_reference(params, embedded_inputs,
                                        bf16_matmul=False)
    assert bool(jnp.allclose(outputs, ref_out, rtol=5e-2, atol=5e-2))
    assert bool(jnp.allclose(state, ref_st, rtol=5e-2, atol=5e-2))

    print("KERNEL_OK")
</pallas_src>

<mosaic_0001>
module attributes {stable_mosaic.version = 11 : i64} {
  func.func @kernel(%arg0: i32, %arg1: memref<2x8x128xbf16, #tpu.memory_space<vmem>>, %arg2: memref<128x384xbf16, #tpu.memory_space<vmem>>, %arg3: memref<1x128x384xbf16, #tpu.memory_space<vmem>>, %arg4: memref<2x128x384xbf16, #tpu.memory_space<vmem>>, %arg5: memref<2x1x384xf32, #tpu.memory_space<vmem>>, %arg6: memref<2x1x128xf32, #tpu.memory_space<vmem>>, %arg7: memref<2x8x128xf32, #tpu.memory_space<vmem>>, %arg8: memref<2x2x128xf32, #tpu.memory_space<vmem>>, %arg9: memref<2x2x128xf32, #tpu.memory_space<vmem>>, %arg10: memref<8x2x128xbf16, #tpu.memory_space<vmem>>, %arg11: memref<8x2x384xf32, #tpu.memory_space<vmem>>, %arg12: memref<8x2x128xf32, #tpu.memory_space<vmem>>) attributes {dimension_semantics = [#tpu.dimension_semantics<arbitrary>], iteration_bounds = array<i64: 1>, scalar_prefetch = 0 : i64, scratch_operands = 4 : i64, tpu.core_type = #tpu.core_type<tc>, window_params = [{transform_indices = @transform_0, window_bounds = array<i64: 2, 8, 128>}, {pipeline_mode = #tpu.pipeline_mode<synchronous>, transform_indices = @transform_1, window_bounds = array<i64: 128, 384>}, {pipeline_mode = #tpu.pipeline_mode<synchronous>, transform_indices = @transform_2, window_bounds = array<i64: 1, 128, 384>}, {pipeline_mode = #tpu.pipeline_mode<synchronous>, transform_indices = @transform_3, window_bounds = array<i64: 2, 128, 384>}, {pipeline_mode = #tpu.pipeline_mode<synchronous>, transform_indices = @transform_4, window_bounds = array<i64: 2, 1, 384>}, {pipeline_mode = #tpu.pipeline_mode<synchronous>, transform_indices = @transform_5, window_bounds = array<i64: 2, 1, 128>}, {transform_indices = @transform_6, window_bounds = array<i64: 2, 8, 128>}, {pipeline_mode = #tpu.pipeline_mode<synchronous>, transform_indices = @transform_7, window_bounds = array<i64: 2, 2, 128>}]} {
    %c0_i32 = arith.constant 0 : i32
    %0 = arith.cmpi eq, %arg0, %c0_i32 : i32
    %1 = arith.extui %0 : i1 to i32
    %c0_i32_0 = arith.constant 0 : i32
    %2 = arith.cmpi ne, %1, %c0_i32_0 : i32
    scf.if %2 {
      %cst_281 = arith.constant 0.000000e+00 : f32
      %717 = vector.broadcast %cst_281 : f32 to vector<2x2x128xf32>
      %c0_282 = arith.constant 0 : index
      %c0_283 = arith.constant 0 : index
      %c0_284 = arith.constant 0 : index
      %718 = vector.load %arg9[%c0_282, %c0_283, %c0_284] : memref<2x2x128xf32, #tpu.memory_space<vmem>>, vector<2x2x128xf32>
      tpu.vector_store %arg9[%c0_282, %c0_283, %c0_284], %717 {strides = array<i32>} : memref<2x2x128xf32, #tpu.memory_space<vmem>>, vector<2x2x128xf32>,
    } else {
    }
    %c0 = arith.constant 0 : index
    %c0_1 = arith.constant 0 : index
    %c0_2 = arith.constant 0 : index
    %3 = vector.load %arg1[%c0, %c0_1, %c0_2] : memref<2x8x128xbf16, #tpu.memory_space<vmem>>, vector<2x1x128xbf16>
    %4 = vector.shape_cast %3 : vector<2x1x128xbf16> to vector<2x128xbf16>
    %c0_3 = arith.constant 0 : index
    %c0_4 = arith.constant 0 : index
    %c0_5 = arith.constant 0 : index
    %5 = vector.load %arg10[%c0_3, %c0_4, %c0_5] : memref<8x2x128xbf16, #tpu.memory_space<vmem>>, vector<1x2x128xbf16>
    %6 = vector.shape_cast %5 : vector<1x2x128xbf16> to vector<2x128xbf16>
    %7 = vector.shape_cast %4 : vector<2x128xbf16> to vector<1x2x128xbf16>
    tpu.vector_store %arg10[%c0_3, %c0_4, %c0_5], %7 {strides = array<i32>} : memref<8x2x128xbf16, #tpu.memory_space<vmem>>, vector<1x2x128xbf16>,
    %c0_6 = arith.constant 0 : index
    %c1 = arith.constant 1 : index
    %c0_7 = arith.constant 0 : index
    %8 = vector.load %arg1[%c0_6, %c1, %c0_7] : memref<2x8x128xbf16, #tpu.memory_space<vmem>>, vector<2x1x128xbf16>
    %9 = vector.shape_cast %8 : vector<2x1x128xbf16> to vector<2x128xbf16>
    %c1_8 = arith.constant 1 : index
    %c0_9 = arith.constant 0 : index
    %c0_10 = arith.constant 0 : index
    %10 = vector.load %arg10[%c1_8, %c0_9, %c0_10] : memref<8x2x128xbf16, #tpu.memory_space<vmem>>, vector<1x2x128xbf16>
    %11 = vector.shape_cast %10 : vector<1x2x128xbf16> to vector<2x128xbf16>
    %12 = vector.shape_cast %9 : vector<2x128xbf16> to vector<1x2x128xbf16>
    tpu.vector_store %arg10[%c1_8, %c0_9, %c0_10], %12 {strides = array<i32>} : memref<8x2x128xbf16, #tpu.memory_space<vmem>>, vector<1x2x128xbf16>,
    %c0_11 = arith.constant 0 : index
    %c2 = arith.constant 2 : index
    %c0_12 = arith.constant 0 : index
    %13 = vector.load %arg1[%c0_11, %c2, %c0_12] : memref<2x8x128xbf16, #tpu.memory_space<vmem>>, vector<2x1x128xbf16>
    %14 = vector.shape_cast %13 : vector<2x1x128xbf16> to vector<2x128xbf16>
    %c2_13 = arith.constant 2 : index
    %c0_14 = arith.constant 0 : index
    %c0_15 = arith.constant 0 : index
    %15 = vector.load %arg10[%c2_13, %c0_14, %c0_15] : memref<8x2x128xbf16, #tpu.memory_space<vmem>>, vector<1x2x128xbf16>
    %16 = vector.shape_cast %15 : vector<1x2x128xbf16> to vector<2x128xbf16>
    %17 = vector.shape_cast %14 : vector<2x128xbf16> to vector<1x2x128xbf16>
    tpu.vector_store %arg10[%c2_13, %c0_14, %c0_15], %17 {strides = array<i32>} : memref<8x2x128xbf16, #tpu.memory_space<vmem>>, vector<1x2x128xbf16>,
    %c0_16 = arith.constant 0 : index
    %c3 = arith.constant 3 : index
    %c0_17 = arith.constant 0 : index
    %18 = vector.load %arg1[%c0_16, %c3, %c0_17] : memref<2x8x128xbf16, #tpu.memory_space<vmem>>, vector<2x1x128xbf16>
    %19 = vector.shape_cast %18 : vector<2x1x128xbf16> to vector<2x128xbf16>
    %c3_18 = arith.constant 3 : index
    %c0_19 = arith.constant 0 : index
    %c0_20 = arith.constant 0 : index
    %20 = vector.load %arg10[%c3_18, %c0_19, %c0_20] : memref<8x2x128xbf16, #tpu.memory_space<vmem>>, vector<1x2x128xbf16>
    %21 = vector.shape_cast %20 : vector<1x2x128xbf16> to vector<2x128xbf16>
    %22 = vector.shape_cast %19 : vector<2x128xbf16> to vector<1x2x128xbf16>
    tpu.vector_store %arg10[%c3_18, %c0_19, %c0_20], %22 {strides = array<i32>} : memref<8x2x128xbf16, #tpu.memory_space<vmem>>, vector<1x2x128xbf16>,
    %c0_21 = arith.constant 0 : index
    %c4 = arith.constant 4 : index
    %c0_22 = arith.constant 0 : index
    %23 = vector.load %arg1[%c0_21, %c4, %c0_22] : memref<2x8x128xbf16, #tpu.memory_space<vmem>>, vector<2x1x128xbf16>
    %24 = vector.shape_cast %23 : vector<2x1x128xbf16> to vector<2x128xbf16>
    %c4_23 = arith.constant 4 : index
    %c0_24 = arith.constant 0 : index
    %c0_25 = arith.constant 0 : index
    %25 = vector.load %arg10[%c4_23, %c0_24, %c0_25] : memref<8x2x128xbf16, #tpu.memory_space<vmem>>, vector<1x2x128xbf16>
    %26 = vector.shape_cast %25 : vector<1x2x128xbf16> to vector<2x128xbf16>
    %27 = vector.shape_cast %24 : vector<2x128xbf16> to vector<1x2x128xbf16>
    tpu.vector_store %arg10[%c4_23, %c0_24, %c0_25], %27 {strides = array<i32>} : memref<8x2x128xbf16, #tpu.memory_space<vmem>>, vector<1x2x128xbf16>,
    %c0_26 = arith.constant 0 : index
    %c5 = arith.constant 5 : index
    %c0_27 = arith.constant 0 : index
    %28 = vector.load %arg1[%c0_26, %c5, %c0_27] : memref<2x8x128xbf16, #tpu.memory_space<vmem>>, vector<2x1x128xbf16>
    %29 = vector.shape_cast %28 : vector<2x1x128xbf16> to vector<2x128xbf16>
    %c5_28 = arith.constant 5 : index
    %c0_29 = arith.constant 0 : index
    %c0_30 = arith.constant 0 : index
    %30 = vector.load %arg10[%c5_28, %c0_29, %c0_30] : memref<8x2x128xbf16, #tpu.memory_space<vmem>>, vector<1x2x128xbf16>
    %31 = vector.shape_cast %30 : vector<1x2x128xbf16> to vector<2x128xbf16>
    %32 = vector.shape_cast %29 : vector<2x128xbf16> to vector<1x2x128xbf16>
    tpu.vector_store %arg10[%c5_28, %c0_29, %c0_30], %32 {strides = array<i32>} : memref<8x2x128xbf16, #tpu.memory_space<vmem>>, vector<1x2x128xbf16>,
    %c0_31 = arith.constant 0 : index
    %c6 = arith.constant 6 : index
    %c0_32 = arith.constant 0 : index
    %33 = vector.load %arg1[%c0_31, %c6, %c0_32] : memref<2x8x128xbf16, #tpu.memory_space<vmem>>, vector<2x1x128xbf16>
    %34 = vector.shape_cast %33 : vector<2x1x128xbf16> to vector<2x128xbf16>
    %c6_33 = arith.constant 6 : index
    %c0_34 = arith.constant 0 : index
    %c0_35 = arith.constant 0 : index
    %35 = vector.load %arg10[%c6_33, %c0_34, %c0_35] : memref<8x2x128xbf16, #tpu.memory_space<vmem>>, vector<1x2x128xbf16>
    %36 = vector.shape_cast %35 : vector<1x2x128xbf16> to vector<2x128xbf16>
    %37 = vector.shape_cast %34 : vector<2x128xbf16> to vector<1x2x128xbf16>
    tpu.vector_store %arg10[%c6_33, %c0_34, %c0_35], %37 {strides = array<i32>} : memref<8x2x128xbf16, #tpu.memory_space<vmem>>, vector<1x2x128xbf16>,
    %c0_36 = arith.constant 0 : index
    %c7 = arith.constant 7 : index
    %c0_37 = arith.constant 0 : index
    %38 = vector.load %arg1[%c0_36, %c7, %c0_37] : memref<2x8x128xbf16, #tpu.memory_space<vmem>>, vector<2x1x128xbf16>
    %39 = vector.shape_cast %38 : vector<2x1x128xbf16> to vector<2x128xbf16>
    %c7_38 = arith.constant 7 : index
    %c0_39 = arith.constant 0 : index
    %c0_40 = arith.constant 0 : index
    %40 = vector.load %arg10[%c7_38, %c0_39, %c0_40] : memref<8x2x128xbf16, #tpu.memory_space<vmem>>, vector<1x2x128xbf16>
    %41 = vector.shape_cast %40 : vector<1x2x128xbf16> to vector<2x128xbf16>
    %42 = vector.shape_cast %39 : vector<2x128xbf16> to vector<1x2x128xbf16>
    tpu.vector_store %arg10[%c7_38, %c0_39, %c0_40], %42 {strides = array<i32>} : memref<8x2x128xbf16, #tpu.memory_space<vmem>>, vector<1x2x128xbf16>,
    %c0_41 = arith.constant 0 : index
    %c0_42 = arith.constant 0 : index
    %c0_43 = arith.constant 0 : index
    %43 = vector.load %arg10[%c0_41, %c0_42, %c0_43] : memref<8x2x128xbf16, #tpu.memory_space<vmem>>, vector<8x2x128xbf16>
    %44 = vector.shape_cast %43 : vector<8x2x128xbf16> to vector<16x128xbf16>
    %c0_44 = arith.constant 0 : index
    %c0_45 = arith.constant 0 : index
    %45 = vector.load %arg2[%c0_44, %c0_45] : memref<128x384xbf16, #tpu.memory_space<vmem>>, vector<128x384xbf16>
    %cst = arith.constant dense<0.000000e+00> : vector<16x384xf32>
    %46 = tpu.matmul %44, %45, %cst {dimension_numbers = #tpu.dot_dimension_numbers<[1], [0], [0], [1], [0, 0, 1, 1], [], []>} : vector<16x128xbf16>, vector<128x384xbf16>, vector<16x384xf32> -> vector<16x384xf32>
    %c0_46 = arith.constant 0 : index
    %c0_47 = arith.constant 0 : index
    %c0_48 = arith.constant 0 : index
    %47 = vector.load %arg5[%c0_46, %c0_47, %c0_48] : memref<2x1x384xf32, #tpu.memory_space<vmem>>, vector<1x1x384xf32>
    %48 = vector.shape_cast %47 : vector<1x1x384xf32> to vector<1x384xf32>
    %49 = vector.broadcast %48 : vector<1x384xf32> to vector<16x384xf32>
    %50 = arith.addf %46, %49 : vector<16x384xf32>
    %51 = vector.shape_cast %50 : vector<16x384xf32> to vector<8x2x384xf32>
    %c0_49 = arith.constant 0 : index
    %c0_50 = arith.constant 0 : index
    %c0_51 = arith.constant 0 : index
    %52 = vector.load %arg11[%c0_49, %c0_50, %c0_51] : memref<8x2x384xf32, #tpu.memory_space<vmem>>, vector<8x2x384xf32>
    tpu.vector_store %arg11[%c0_49, %c0_50, %c0_51], %51 {strides = array<i32>} : memref<8x2x384xf32, #tpu.memory_space<vmem>>, vector<8x2x384xf32>,
    %c0_52 = arith.constant 0 : index
    %c0_53 = arith.constant 0 : index
    %c0_54 = arith.constant 0 : index
    %53 = vector.load %arg4[%c0_52, %c0_53, %c0_54] : memref<2x128x384xbf16, #tpu.memory_space<vmem>>, vector<1x128x384xbf16>
    %54 = vector.shape_cast %53 : vector<1x128x384xbf16> to vector<128x384xbf16>
    %c0_55 = arith.constant 0 : index
    %c0_56 = arith.constant 0 : index
    %c0_57 = arith.constant 0 : index
    %55 = vector.load %arg6[%c0_55, %c0_56, %c0_57] : memref<2x1x128xf32, #tpu.memory_space<vmem>>, vector<1x1x128xf32>
    %56 = vector.shape_cast %55 : vector<1x1x128xf32> to vector<1x128xf32>
    %c0_58 = arith.constant 0 : index
    %c0_59 = arith.constant 0 : index
    %c0_60 = arith.constant 0 : index
    %57 = vector.load %arg9[%c0_58, %c0_59, %c0_60] : memref<2x2x128xf32, #tpu.memory_space<vmem>>, vector<1x2x128xf32>
    %58 = vector.shape_cast %57 : vector<1x2x128xf32> to vector<2x128xf32>
    %c0_i32_61 = arith.constant 0 : i32
    %59 = arith.index_cast %c0_i32_61 : i32 to index
    %c0_62 = arith.constant 0 : index
    %c0_63 = arith.constant 0 : index
    %60 = vector.load %arg11[%59, %c0_62, %c0_63] : memref<8x2x384xf32, #tpu.memory_space<vmem>>, vector<1x2x384xf32>
    %61 = vector.shape_cast %60 : vector<1x2x384xf32> to vector<2x384xf32>
    %62 = arith.truncf %58 : vector<2x128xf32> to vector<2x128xbf16>
    %cst_64 = arith.constant dense<0.000000e+00> : vector<2x384xf32>
    %63 = tpu.matmul %62, %54, %cst_64 {dimension_numbers = #tpu.dot_dimension_numbers<[1], [0], [0], [1], [0, 0, 1, 1], [], []>} : vector<2x128xbf16>, vector<128x384xbf16>, vector<2x384xf32> -> vector<2x384xf32>
    %64 = vector.extract_strided_slice %61 {offsets = [0, 0], sizes = [2, 128], strides = [1, 1]} : vector<2x384xf32> to vector<2x128xf32>
    %65 = vector.extract_strided_slice %63 {offsets = [0, 0], sizes = [2, 128], strides = [1, 1]} : vector<2x384xf32> to vector<2x128xf32>
    %66 = arith.addf %64, %65 : vector<2x128xf32>
    %67 = arith.negf %66 : vector<2x128xf32>
    %68 = math.exp %67 : vector<2x128xf32>
    %cst_65 = arith.constant 1.000000e+00 : f32
    %69 = vector.broadcast %cst_65 : f32 to vector<2x128xf32>
    %70 = arith.addf %69, %68 : vector<2x128xf32>
    %71 = arith.divf %69, %70 : vector<2x128xf32>
    %72 = vector.extract_strided_slice %61 {offsets = [0, 128], sizes = [2, 128], strides = [1, 1]} : vector<2x384xf32> to vector<2x128xf32>
    %73 = vector.extract_strided_slice %63 {offsets = [0, 128], sizes = [2, 128], strides = [1, 1]} : vector<2x384xf32> to vector<2x128xf32>
    %74 = arith.addf %72, %73 : vector<2x128xf32>
    %75 = arith.negf %74 : vector<2x128xf32>
    %76 = math.exp %75 : vector<2x128xf32>
    %cst_66 = arith.constant 1.000000e+00 : f32
    %77 = vector.broadcast %cst_66 : f32 to vector<2x128xf32>
    %78 = arith.addf %77, %76 : vector<2x128xf32>
    %79 = arith.divf %77, %78 : vector<2x128xf32>
    %80 = vector.extract_strided_slice %61 {offsets = [0, 256], sizes = [2, 128], strides = [1, 1]} : vector<2x384xf32> to vector<2x128xf32>
    %81 = vector.extract_strided_slice %63 {offsets = [0, 256], sizes = [2, 128], strides = [1, 1]} : vector<2x384xf32> to vector<2x128xf32>
    %82 = vector.broadcast %56 : vector<1x128xf32> to vector<2x128xf32>
    %83 = arith.addf %81, %82 : vector<2x128xf32>
    %84 = arith.mulf %71, %83 : vector<2x128xf32>
    %85 = arith.addf %80, %84 : vector<2x128xf32>
    %86 = math.tanh %85 : vector<2x128xf32>
    %cst_67 = arith.constant 1.000000e+00 : f32
    %87 = vector.broadcast %cst_67 : f32 to vector<2x128xf32>
    %88 = arith.subf %87, %79 : vector<2x128xf32>
    %89 = arith.mulf %88, %86 : vector<2x128xf32>
    %90 = arith.mulf %79, %58 : vector<2x128xf32>
    %91 = arith.addf %89, %90 : vector<2x128xf32>
    %92 = arith.index_cast %c0_i32_61 : i32 to index
    %c0_68 = arith.constant 0 : index
    %c0_69 = arith.constant 0 : index
    %93 = vector.load %arg12[%92, %c0_68, %c0_69] : memref<8x2x128xf32, #tpu.memory_space<vmem>>, vector<1x2x128xf32>
    %94 = vector.shape_cast %93 : vector<1x2x128xf32> to vector<2x128xf32>
    %95 = vector.shape_cast %91 : vector<2x128xf32> to vector<1x2x128xf32>
    tpu.vector_store %arg12[%92, %c0_68, %c0_69], %95 {strides = array<i32>} : memref<8x2x128xf32, #tpu.memory_space<vmem>>, vector<1x2x128xf32>,
    %c1_i32 = arith.constant 1 : i32
    %96 = arith.index_cast %c1_i32 : i32 to index
    %c0_70 = arith.constant 0 : index
    %c0_71 = arith.constant 0 : index
    %97 = vector.load %arg11[%96, %c0_70, %c0_71] : memref<8x2x384xf32, #tpu.memory_space<vmem>>, vector<1x2x384xf32>
    %98 = vector.shape_cast %97 : vector<1x2x384xf32> to vector<2x384xf32>
    %99 = arith.truncf %91 : vector<2x128xf32> to vector<2x128xbf16>
    %cst_72 = arith.constant dense<0.000000e+00> : vector<2x384xf32>
    %100 = tpu.matmul %99, %54, %cst_72 {dimension_numbers = #tpu.dot_dimension_numbers<[1], [0], [0], [1], [0, 0, 1, 1], [], []>} : vector<2x128xbf16>, vector<128x384xbf16>, vector<2x384xf32> -> vector<2x384xf32>
    %101 = vector.extract_strided_slice %98 {offsets = [0, 0], sizes = [2, 128], strides = [1, 1]} : vector<2x384xf32> to vector<2x128xf32>
    %102 = vector.extract_strided_slice %100 {offsets = [0, 0], sizes = [2, 128], strides = [1, 1]} : vector<2x384xf32> to vector<2x128xf32>
    %103 = arith.addf %101, %102 : vector<2x128xf32>
    %104 = arith.negf %103 : vector<2x128xf32>
    %105 = math.exp %104 : vector<2x128xf32>
    %cst_73 = arith.constant 1.000000e+00 : f32
    %106 = vector.broadcast %cst_73 : f32 to vector<2x128xf32>
    %107 = arith.addf %106, %105 : vector<2x128xf32>
    %108 = arith.divf %106, %107 : vector<2x128xf32>
    %109 = vector.extract_strided_slice %98 {offsets = [0, 128], sizes = [2, 128], strides = [1, 1]} : vector<2x384xf32> to vector<2x128xf32>
    %110 = vector.extract_strided_slice %100 {offsets = [0, 128], sizes = [2, 128], strides = [1, 1]} : vector<2x384xf32> to vector<2x128xf32>
    %111 = arith.addf %109, %110 : vector<2x128xf32>
    %112 = arith.negf %111 : vector<2x128xf32>
    %113 = math.exp %112 : vector<2x128xf32>
    %cst_74 = arith.constant 1.000000e+00 : f32
    %114 = vector.broadcast %cst_74 : f32 to vector<2x128xf32>
    %115 = arith.addf %114, %113 : vector<2x128xf32>
    %116 = arith.divf %114, %115 : vector<2x128xf32>
    %117 = vector.extract_strided_slice %98 {offsets = [0, 256], sizes = [2, 128], strides = [1, 1]} : vector<2x384xf32> to vector<2x128xf32>
    %118 = vector.extract_strided_slice %100 {offsets = [0, 256], sizes = [2, 128], strides = [1, 1]} : vector<2x384xf32> to vector<2x128xf32>
    %119 = vector.broadcast %56 : vector<1x128xf32> to vector<2x128xf32>
    %120 = arith.addf %118, %119 : vector<2x128xf32>
    %121 = arith.mulf %108, %120 : vector<2x128xf32>
    %122 = arith.addf %117, %121 : vector<2x128xf32>
    %123 = math.tanh %122 : vector<2x128xf32>
    %cst_75 = arith.constant 1.000000e+00 : f32
    %124 = vector.broadcast %cst_75 : f32 to vector<2x128xf32>
    %125 = arith.subf %124, %116 : vector<2x128xf32>
    %126 = arith.mulf %125, %123 : vector<2x128xf32>
    %127 = arith.mulf %116, %91 : vector<2x128xf32>
    %128 = arith.addf %126, %127 : vector<2x128xf32>
    %129 = arith.index_cast %c1_i32 : i32 to index
    %c0_76 = arith.constant 0 : index
    %c0_77 = arith.constant 0 : index
    %130 = vector.load %arg12[%129, %c0_76, %c0_77] : memref<8x2x128xf32, #tpu.memory_space<vmem>>, vector<1x2x128xf32>
    %131 = vector.shape_cast %130 : vector<1x2x128xf32> to vector<2x128xf32>
    %132 = vector.shape_cast %128 : vector<2x128xf32> to vector<1x2x128xf32>
    tpu.vector_store %arg12[%129, %c0_76, %c0_77], %132 {strides = array<i32>} : memref<8x2x128xf32, #tpu.memory_space<vmem>>, vector<1x2x128xf32>,
    %c2_i32 = arith.constant 2 : i32
    %133 = arith.index_cast %c2_i32 : i32 to index
    %c0_78 = arith.constant 0 : index
    %c0_79 = arith.constant 0 : index
    %134 = vector.load %arg11[%133, %c0_78, %c0_79] : memref<8x2x384xf32, #tpu.memory_space<vmem>>, vector<1x2x384xf32>
    %135 = vector.shape_cast %134 : vector<1x2x384xf32> to vector<2x384xf32>
    %136 = arith.truncf %128 : vector<2x128xf32> to vector<2x128xbf16>
    %cst_80 = arith.constant dense<0.000000e+00> : vector<2x384xf32>
    %137 = tpu.matmul %136, %54, %cst_80 {dimension_numbers = #tpu.dot_dimension_numbers<[1], [0], [0], [1], [0, 0, 1, 1], [], []>} : vector<2x128xbf16>, vector<128x384xbf16>, vector<2x384xf32> -> vector<2x384xf32>
    %138 = vector.extract_strided_slice %135 {offsets = [0, 0], sizes = [2, 128], strides = [1, 1]} : vector<2x384xf32> to vector<2x128xf32>
    %139 = vector.extract_strided_slice %137 {offsets = [0, 0], sizes = [2, 128], strides = [1, 1]} : vector<2x384xf32> to vector<2x128xf32>
    %140 = arith.addf %138, %139 : vector<2x128xf32>
    %141 = arith.negf %140 : vector<2x128xf32>
    %142 = math.exp %141 : vector<2x128xf32>
    %cst_81 = arith.constant 1.000000e+00 : f32
    %143 = vector.broadcast %cst_81 : f32 to vector<2x128xf32>
    %144 = arith.addf %143, %142 : vector<2x128xf32>
    %145 = arith.divf %143, %144 : vector<2x128xf32>
    %146 = vector.extract_strided_slice %135 {offsets = [0, 128], sizes = [2, 128], strides = [1, 1]} : vector<2x384xf32> to vector<2x128xf32>
    %147 = vector.extract_strided_slice %137 {offsets = [0, 128], sizes = [2, 128], strides = [1, 1]} : vector<2x384xf32> to vector<2x128xf32>
    %148 = arith.addf %146, %147 : vector<2x128xf32>
    %149 = arith.negf %148 : vector<2x128xf32>
    %150 = math.exp %149 : vector<2x128xf32>
    %cst_82 = arith.constant 1.000000e+00 : f32
    %151 = vector.broadcast %cst_82 : f32 to vector<2x128xf32>
    %152 = arith.addf %151, %150 : vector<2x128xf32>
    %153 = arith.divf %151, %152 : vector<2x128xf32>
    %154 = vector.extract_strided_slice %135 {offsets = [0, 256], sizes = [2, 128], strides = [1, 1]} : vector<2x384xf32> to vector<2x128xf32>
    %155 = vector.extract_strided_slice %137 {offsets = [0, 256], sizes = [2, 128], strides = [1, 1]} : vector<2x384xf32> to vector<2x128xf32>
    %156 = vector.broadcast %56 : vector<1x128xf32> to vector<2x128xf32>
    %157 = arith.addf %155, %156 : vector<2x128xf32>
    %158 = arith.mulf %145, %157 : vector<2x128xf32>
    %159 = arith.addf %154, %158 : vector<2x128xf32>
    %160 = math.tanh %159 : vector<2x128xf32>
    %cst_83 = arith.constant 1.000000e+00 : f32
    %161 = vector.broadcast %cst_83 : f32 to vector<2x128xf32>
    %162 = arith.subf %161, %153 : vector<2x128xf32>
    %163 = arith.mulf %162, %160 : vector<2x128xf32>
    %164 = arith.mulf %153, %128 : vector<2x128xf32>
    %165 = arith.addf %163, %164 : vector<2x128xf32>
    %166 = arith.index_cast %c2_i32 : i32 to index
    %c0_84 = arith.constant 0 : index
    %c0_85 = arith.constant 0 : index
    %167 = vector.load %arg12[%166, %c0_84, %c0_85] : memref<8x2x128xf32, #tpu.memory_space<vmem>>, vector<1x2x128xf32>
    %168 = vector.shape_cast %167 : vector<1x2x128xf32> to vector<2x128xf32>
    %169 = vector.shape_cast %165 : vector<2x128xf32> to vector<1x2x128xf32>
    tpu.vector_store %arg12[%166, %c0_84, %c0_85], %169 {strides = array<i32>} : memref<8x2x128xf32, #tpu.memory_space<vmem>>, vector<1x2x128xf32>,
    %c3_i32 = arith.constant 3 : i32
    %170 = arith.index_cast %c3_i32 : i32 to index
    %c0_86 = arith.constant 0 : index
    %c0_87 = arith.constant 0 : index
    %171 = vector.load %arg11[%170, %c0_86, %c0_87] : memref<8x2x384xf32, #tpu.memory_space<vmem>>, vector<1x2x384xf32>
    %172 = vector.shape_cast %171 : vector<1x2x384xf32> to vector<2x384xf32>
    %173 = arith.truncf %165 : vector<2x128xf32> to vector<2x128xbf16>
    %cst_88 = arith.constant dense<0.000000e+00> : vector<2x384xf32>
    %174 = tpu.matmul %173, %54, %cst_88 {dimension_numbers = #tpu.dot_dimension_numbers<[1], [0], [0], [1], [0, 0, 1, 1], [], []>} : vector<2x128xbf16>, vector<128x384xbf16>, vector<2x384xf32> -> vector<2x384xf32>
    %175 = vector.extract_strided_slice %172 {offsets = [0, 0], sizes = [2, 128], strides = [1, 1]} : vector<2x384xf32> to vector<2x128xf32>
    %176 = vector.extract_strided_slice %174 {offsets = [0, 0], sizes = [2, 128], strides = [1, 1]} : vector<2x384xf32> to vector<2x128xf32>
    %177 = arith.addf %175, %176 : vector<2x128xf32>
    %178 = arith.negf %177 : vector<2x128xf32>
    %179 = math.exp %178 : vector<2x128xf32>
    %cst_89 = arith.constant 1.000000e+00 : f32
    %180 = vector.broadcast %cst_89 : f32 to vector<2x128xf32>
    %181 = arith.addf %180, %179 : vector<2x128xf32>
    %182 = arith.divf %180, %181 : vector<2x128xf32>
    %183 = vector.extract_strided_slice %172 {offsets = [0, 128], sizes = [2, 128], strides = [1, 1]} : vector<2x384xf32> to vector<2x128xf32>
    %184 = vector.extract_strided_slice %174 {offsets = [0, 128], sizes = [2, 128], strides = [1, 1]} : vector<2x384xf32> to vector<2x128xf32>
    %185 = arith.addf %183, %184 : vector<2x128xf32>
    %186 = arith.negf %185 : vector<2x128xf32>
    %187 = math.exp %186 : vector<2x128xf32>
    %cst_90 = arith.constant 1.000000e+00 : f32
    %188 = vector.broadcast %cst_90 : f32 to vector<2x128xf32>
    %189 = arith.addf %188, %187 : vector<2x128xf32>
    %190 = arith.divf %188, %189 : vector<2x128xf32>
    %191 = vector.extract_strided_slice %172 {offsets = [0, 256], sizes = [2, 128], strides = [1, 1]} : vector<2x384xf32> to vector<2x128xf32>
    %192 = vector.extract_strided_slice %174 {offsets = [0, 256], sizes = [2, 128], strides = [1, 1]} : vector<2x384xf32> to vector<2x128xf32>
    %193 = vector.broadcast %56 : vector<1x128xf32> to vector<2x128xf32>
    %194 = arith.addf %192, %193 : vector<2x128xf32>
    %195 = arith.mulf %182, %194 : vector<2x128xf32>
    %196 = arith.addf %191, %195 : vector<2x128xf32>
    %197 = math.tanh %196 : vector<2x128xf32>
    %cst_91 = arith.constant 1.000000e+00 : f32
    %198 = vector.broadcast %cst_91 : f32 to vector<2x128xf32>
    %199 = arith.subf %198, %190 : vector<2x128xf32>
    %200 = arith.mulf %199, %197 : vector<2x128xf32>
    %201 = arith.mulf %190, %165 : vector<2x128xf32>
    %202 = arith.addf %200, %201 : vector<2x128xf32>
    %203 = arith.index_cast %c3_i32 : i32 to index
    %c0_92 = arith.constant 0 : index
    %c0_93 = arith.constant 0 : index
    %204 = vector.load %arg12[%203, %c0_92, %c0_93] : memref<8x2x128xf32, #tpu.memory_space<vmem>>, vector<1x2x128xf32>
    %205 = vector.shape_cast %204 : vector<1x2x128xf32> to vector<2x128xf32>
    %206 = vector.shape_cast %202 : vector<2x128xf32> to vector<1x2x128xf32>
    tpu.vector_store %arg12[%203, %c0_92, %c0_93], %206 {strides = array<i32>} : memref<8x2x128xf32, #tpu.memory_space<vmem>>, vector<1x2x128xf32>,
    %c4_i32 = arith.constant 4 : i32
    %207 = arith.index_cast %c4_i32 : i32 to index
    %c0_94 = arith.constant 0 : index
    %c0_95 = arith.constant 0 : index
    %208 = vector.load %arg11[%207, %c0_94, %c0_95] : memref<8x2x384xf32, #tpu.memory_space<vmem>>, vector<1x2x384xf32>
    %209 = vector.shape_cast %208 : vector<1x2x384xf32> to vector<2x384xf32>
    %210 = arith.truncf %202 : vector<2x128xf32> to vector<2x128xbf16>
    %cst_96 = arith.constant dense<0.000000e+00> : vector<2x384xf32>
    %211 = tpu.matmul %210, %54, %cst_96 {dimension_numbers = #tpu.dot_dimension_numbers<[1], [0], [0], [1], [0, 0, 1, 1], [], []>} : vector<2x128xbf16>, vector<128x384xbf16>, vector<2x384xf32> -> vector<2x384xf32>
    %212 = vector.extract_strided_slice %209 {offsets = [0, 0], sizes = [2, 128], strides = [1, 1]} : vector<2x384xf32> to vector<2x128xf32>
    %213 = vector.extract_strided_slice %211 {offsets = [0, 0], sizes = [2, 128], strides = [1, 1]} : vector<2x384xf32> to vector<2x128xf32>
    %214 = arith.addf %212, %213 : vector<2x128xf32>
    %215 = arith.negf %214 : vector<2x128xf32>
    %216 = math.exp %215 : vector<2x128xf32>
    %cst_97 = arith.constant 1.000000e+00 : f32
    %217 = vector.broadcast %cst_97 : f32 to vector<2x128xf32>
    %218 = arith.addf %217, %216 : vector<2x128xf32>
    %219 = arith.divf %217, %218 : vector<2x128xf32>
    %220 = vector.extract_strided_slice %209 {offsets = [0, 128], sizes = [2, 128], strides = [1, 1]} : vector<2x384xf32> to vector<2x128xf32>
    %221 = vector.extract_strided_slice %211 {offsets = [0, 128], sizes = [2, 128], strides = [1, 1]} : vector<2x384xf32> to vector<2x128xf32>
    %222 = arith.addf %220, %221 : vector<2x128xf32>
    %223 = arith.negf %222 : vector<2x128xf32>
    %224 = math.exp %223 : vector<2x128xf32>
    %cst_98 = arith.constant 1.000000e+00 : f32
    %225 = vector.broadcast %cst_98 : f32 to vector<2x128xf32>
    %226 = arith.addf %225, %224 : vector<2x128xf32>
    %227 = arith.divf %225, %226 : vector<2x128xf32>
    %228 = vector.extract_strided_slice %209 {offsets = [0, 256], sizes = [2, 128], strides = [1, 1]} : vector<2x384xf32> to vector<2x128xf32>
    %229 = vector.extract_strided_slice %211 {offsets = [0, 256], sizes = [2, 128], strides = [1, 1]} : vector<2x384xf32> to vector<2x128xf32>
    %230 = vector.broadcast %56 : vector<1x128xf32> to vector<2x128xf32>
    %231 = arith.addf %229, %230 : vector<2x128xf32>
    %232 = arith.mulf %219, %231 : vector<2x128xf32>
    %233 = arith.addf %228, %232 : vector<2x128xf32>
    %234 = math.tanh %233 : vector<2x128xf32>
    %cst_99 = arith.constant 1.000000e+00 : f32
    %235 = vector.broadcast %cst_99 : f32 to vector<2x128xf32>
    %236 = arith.subf %235, %227 : vector<2x128xf32>
    %237 = arith.mulf %236, %234 : vector<2x128xf32>
    %238 = arith.mulf %227, %202 : vector<2x128xf32>
    %239 = arith.addf %237, %238 : vector<2x128xf32>
    %240 = arith.index_cast %c4_i32 : i32 to index
    %c0_100 = arith.constant 0 : index
    %c0_101 = arith.constant 0 : index
    %241 = vector.load %arg12[%240, %c0_100, %c0_101] : memref<8x2x128xf32, #tpu.memory_space<vmem>>, vector<1x2x128xf32>
    %242 = vector.shape_cast %241 : vector<1x2x128xf32> to vector<2x128xf32>
    %243 = vector.shape_cast %239 : vector<2x128xf32> to vector<1x2x128xf32>
    tpu.vector_store %arg12[%240, %c0_100, %c0_101], %243 {strides = array<i32>} : memref<8x2x128xf32, #tpu.memory_space<vmem>>, vector<1x2x128xf32>,
    %c5_i32 = arith.constant 5 : i32
    %244 = arith.index_cast %c5_i32 : i32 to index
    %c0_102 = arith.constant 0 : index
    %c0_103 = arith.constant 0 : index
    %245 = vector.load %arg11[%244, %c0_102, %c0_103] : memref<8x2x384xf32, #tpu.memory_space<vmem>>, vector<1x2x384xf32>
    %246 = vector.shape_cast %245 : vector<1x2x384xf32> to vector<2x384xf32>
    %247 = arith.truncf %239 : vector<2x128xf32> to vector<2x128xbf16>
    %cst_104 = arith.constant dense<0.000000e+00> : vector<2x384xf32>
    %248 = tpu.matmul %247, %54, %cst_104 {dimension_numbers = #tpu.dot_dimension_numbers<[1], [0], [0], [1], [0, 0, 1, 1], [], []>} : vector<2x128xbf16>, vector<128x384xbf16>, vector<2x384xf32> -> vector<2x384xf32>
    %249 = vector.extract_strided_slice %246 {offsets = [0, 0], sizes = [2, 128], strides = [1, 1]} : vector<2x384xf32> to vector<2x128xf32>
    %250 = vector.extract_strided_slice %248 {offsets = [0, 0], sizes = [2, 128], strides = [1, 1]} : vector<2x384xf32> to vector<2x128xf32>
    %251 = arith.addf %249, %250 : vector<2x128xf32>
    %252 = arith.negf %251 : vector<2x128xf32>
    %253 = math.exp %252 : vector<2x128xf32>
    %cst_105 = arith.constant 1.000000e+00 : f32
    %254 = vector.broadcast %cst_105 : f32 to vector<2x128xf32>
    %255 = arith.addf %254, %253 : vector<2x128xf32>
    %256 = arith.divf %254, %255 : vector<2x128xf32>
    %257 = vector.extract_strided_slice %246 {offsets = [0, 128], sizes = [2, 128], strides = [1, 1]} : vector<2x384xf32> to vector<2x128xf32>
    %258 = vector.extract_strided_slice %248 {offsets = [0, 128], sizes = [2, 128], strides = [1, 1]} : vector<2x384xf32> to vector<2x128xf32>
    %259 = arith.addf %257, %258 : vector<2x128xf32>
    %260 = arith.negf %259 : vector<2x128xf32>
    %261 = math.exp %260 : vector<2x128xf32>
    %cst_106 = arith.constant 1.000000e+00 : f32
    %262 = vector.broadcast %cst_106 : f32 to vector<2x128xf32>
    %263 = arith.addf %262, %261 : vector<2x128xf32>
    %264 = arith.divf %262, %263 : vector<2x128xf32>
    %265 = vector.extract_strided_slice %246 {offsets = [0, 256], sizes = [2, 128], strides = [1, 1]} : vector<2x384xf32> to vector<2x128xf32>
    %266 = vector.extract_strided_slice %248 {offsets = [0, 256], sizes = [2, 128], strides = [1, 1]} : vector<2x384xf32> to vector<2x128xf32>
    %267 = vector.broadcast %56 : vector<1x128xf32> to vector<2x128xf32>
    %268 = arith.addf %266, %267 : vector<2x128xf32>
    %269 = arith.mulf %256, %268 : vector<2x128xf32>
    %270 = arith.addf %265, %269 : vector<2x128xf32>
    %271 = math.tanh %270 : vector<2x128xf32>
    %cst_107 = arith.constant 1.000000e+00 : f32
    %272 = vector.broadcast %cst_107 : f32 to vector<2x128xf32>
    %273 = arith.subf %272, %264 : vector<2x128xf32>
    %274 = arith.mulf %273, %271 : vector<2x128xf32>
    %275 = arith.mulf %264, %239 : vector<2x128xf32>
    %276 = arith.addf %274, %275 : vector<2x128xf32>
    %277 = arith.index_cast %c5_i32 : i32 to index
    %c0_108 = arith.constant 0 : index
    %c0_109 = arith.constant 0 : index
    %278 = vector.load %arg12[%277, %c0_108, %c0_109] : memref<8x2x128xf32, #tpu.memory_space<vmem>>, vector<1x2x128xf32>
    %279 = vector.shape_cast %278 : vector<1x2x128xf32> to vector<2x128xf32>
    %280 = vector.shape_cast %276 : vector<2x128xf32> to vector<1x2x128xf32>
    tpu.vector_store %arg12[%277, %c0_108, %c0_109], %280 {strides = array<i32>} : memref<8x2x128xf32, #tpu.memory_space<vmem>>, vector<1x2x128xf32>,
    %c6_i32 = arith.constant 6 : i32
    %281 = arith.index_cast %c6_i32 : i32 to index
    %c0_110 = arith.constant 0 : index
    %c0_111 = arith.constant 0 : index
    %282 = vector.load %arg11[%281, %c0_110, %c0_111] : memref<8x2x384xf32, #tpu.memory_space<vmem>>, vector<1x2x384xf32>
    %283 = vector.shape_cast %282 : vector<1x2x384xf32> to vector<2x384xf32>
    %284 = arith.truncf %276 : vector<2x128xf32> to vector<2x128xbf16>
    %cst_112 = arith.constant dense<0.000000e+00> : vector<2x384xf32>
    %285 = tpu.matmul %284, %54, %cst_112 {dimension_numbers = #tpu.dot_dimension_numbers<[1], [0], [0], [1], [0, 0, 1, 1], [], []>} : vector<2x128xbf16>, vector<128x384xbf16>, vector<2x384xf32> -> vector<2x384xf32>
    %286 = vector.extract_strided_slice %283 {offsets = [0, 0], sizes = [2, 128], strides = [1, 1]} : vector<2x384xf32> to vector<2x128xf32>
    %287 = vector.extract_strided_slice %285 {offsets = [0, 0], sizes = [2, 128], strides = [1, 1]} : vector<2x384xf32> to vector<2x128xf32>
    %288 = arith.addf %286, %287 : vector<2x128xf32>
    %289 = arith.negf %288 : vector<2x128xf32>
    %290 = math.exp %289 : vector<2x128xf32>
    %cst_113 = arith.constant 1.000000e+00 : f32
    %291 = vector.broadcast %cst_113 : f32 to vector<2x128xf32>
    %292 = arith.addf %291, %290 : vector<2x128xf32>
    %293 = arith.divf %291, %292 : vector<2x128xf32>
    %294 = vector.extract_strided_slice %283 {offsets = [0, 128], sizes = [2, 128], strides = [1, 1]} : vector<2x384xf32> to vector<2x128xf32>
    %295 = vector.extract_strided_slice %285 {offsets = [0, 128], sizes = [2, 128], strides = [1, 1]} : vector<2x384xf32> to vector<2x128xf32>
    %296 = arith.addf %294, %295 : vector<2x128xf32>
    %297 = arith.negf %296 : vector<2x128xf32>
    %298 = math.exp %297 : vector<2x128xf32>
    %cst_114 = arith.constant 1.000000e+00 : f32
    %299 = vector.broadcast %cst_114 : f32 to vector<2x128xf32>
    %300 = arith.addf %299, %298 : vector<2x128xf32>
    %301 = arith.divf %299, %300 : vector<2x128xf32>
    %302 = vector.extract_strided_slice %283 {offsets = [0, 256], sizes = [2, 128], strides = [1, 1]} : vector<2x384xf32> to vector<2x128xf32>
    %303 = vector.extract_strided_slice %285 {offsets = [0, 256], sizes = [2, 128], strides = [1, 1]} : vector<2x384xf32> to vector<2x128xf32>
    %304 = vector.broadcast %56 : vector<1x128xf32> to vector<2x128xf32>
    %305 = arith.addf %303, %304 : vector<2x128xf32>
    %306 = arith.mulf %293, %305 : vector<2x128xf32>
    %307 = arith.addf %302, %306 : vector<2x128xf32>
    %308 = math.tanh %307 : vector<2x128xf32>
    %cst_115 = arith.constant 1.000000e+00 : f32
    %309 = vector.broadcast %cst_115 : f32 to vector<2x128xf32>
    %310 = arith.subf %309, %301 : vector<2x128xf32>
    %311 = arith.mulf %310, %308 : vector<2x128xf32>
    %312 = arith.mulf %301, %276 : vector<2x128xf32>
    %313 = arith.addf %311, %312 : vector<2x128xf32>
    %314 = arith.index_cast %c6_i32 : i32 to index
    %c0_116 = arith.constant 0 : index
    %c0_117 = arith.constant 0 : index
    %315 = vector.load %arg12[%314, %c0_116, %c0_117] : memref<8x2x128xf32, #tpu.memory_space<vmem>>, vector<1x2x128xf32>
    %316 = vector.shape_cast %315 : vector<1x2x128xf32> to vector<2x128xf32>
    %317 = vector.shape_cast %313 : vector<2x128xf32> to vector<1x2x128xf32>
    tpu.vector_store %arg12[%314, %c0_116, %c0_117], %317 {strides = array<i32>} : memref<8x2x128xf32, #tpu.memory_space<vmem>>, vector<1x2x128xf32>,
    %c7_i32 = arith.constant 7 : i32
    %318 = arith.index_cast %c7_i32 : i32 to index
    %c0_118 = arith.constant 0 : index
    %c0_119 = arith.constant 0 : index
    %319 = vector.load %arg11[%318, %c0_118, %c0_119] : memref<8x2x384xf32, #tpu.memory_space<vmem>>, vector<1x2x384xf32>
    %320 = vector.shape_cast %319 : vector<1x2x384xf32> to vector<2x384xf32>
    %321 = arith.truncf %313 : vector<2x128xf32> to vector<2x128xbf16>
    %cst_120 = arith.constant dense<0.000000e+00> : vector<2x384xf32>
    %322 = tpu.matmul %321, %54, %cst_120 {dimension_numbers = #tpu.dot_dimension_numbers<[1], [0], [0], [1], [0, 0, 1, 1], [], []>} : vector<2x128xbf16>, vector<128x384xbf16>, vector<2x384xf32> -> vector<2x384xf32>
    %323 = vector.extract_strided_slice %320 {offsets = [0, 0], sizes = [2, 128], strides = [1, 1]} : vector<2x384xf32> to vector<2x128xf32>
    %324 = vector.extract_strided_slice %322 {offsets = [0, 0], sizes = [2, 128], strides = [1, 1]} : vector<2x384xf32> to vector<2x128xf32>
    %325 = arith.addf %323, %324 : vector<2x128xf32>
    %326 = arith.negf %325 : vector<2x128xf32>
    %327 = math.exp %326 : vector<2x128xf32>
    %cst_121 = arith.constant 1.000000e+00 : f32
    %328 = vector.broadcast %cst_121 : f32 to vector<2x128xf32>
    %329 = arith.addf %328, %327 : vector<2x128xf32>
    %330 = arith.divf %328, %329 : vector<2x128xf32>
    %331 = vector.extract_strided_slice %320 {offsets = [0, 128], sizes = [2, 128], strides = [1, 1]} : vector<2x384xf32> to vector<2x128xf32>
    %332 = vector.extract_strided_slice %322 {offsets = [0, 128], sizes = [2, 128], strides = [1, 1]} : vector<2x384xf32> to vector<2x128xf32>
    %333 = arith.addf %331, %332 : vector<2x128xf32>
    %334 = arith.negf %333 : vector<2x128xf32>
    %335 = math.exp %334 : vector<2x128xf32>
    %cst_122 = arith.constant 1.000000e+00 : f32
    %336 = vector.broadcast %cst_122 : f32 to vector<2x128xf32>
    %337 = arith.addf %336, %335 : vector<2x128xf32>
    %338 = arith.divf %336, %337 : vector<2x128xf32>
    %339 = vector.extract_strided_slice %320 {offsets = [0, 256], sizes = [2, 128], strides = [1, 1]} : vector<2x384xf32> to vector<2x128xf32>
    %340 = vector.extract_strided_slice %322 {offsets = [0, 256], sizes = [2, 128], strides = [1, 1]} : vector<2x384xf32> to vector<2x128xf32>
    %341 = vector.broadcast %56 : vector<1x128xf32> to vector<2x128xf32>
    %342 = arith.addf %340, %341 : vector<2x128xf32>
    %343 = arith.mulf %330, %342 : vector<2x128xf32>
    %344 = arith.addf %339, %343 : vector<2x128xf32>
    %345 = math.tanh %344 : vector<2x128xf32>
    %cst_123 = arith.constant 1.000000e+00 : f32
    %346 = vector.broadcast %cst_123 : f32 to vector<2x128xf32>
    %347 = arith.subf %346, %338 : vector<2x128xf32>
    %348 = arith.mulf %347, %345 : vector<2x128xf32>
    %349 = arith.mulf %338, %313 : vector<2x128xf32>
    %350 = arith.addf %348, %349 : vector<2x128xf32>
    %351 = arith.index_cast %c7_i32 : i32 to index
    %c0_124 = arith.constant 0 : index
    %c0_125 = arith.constant 0 : index
    %352 = vector.load %arg12[%351, %c0_124, %c0_125] : memref<8x2x128xf32, #tpu.memory_space<vmem>>, vector<1x2x128xf32>
    %353 = vector.shape_cast %352 : vector<1x2x128xf32> to vector<2x128xf32>
    %354 = vector.shape_cast %350 : vector<2x128xf32> to vector<1x2x128xf32>
    tpu.vector_store %arg12[%351, %c0_124, %c0_125], %354 {strides = array<i32>} : memref<8x2x128xf32, #tpu.memory_space<vmem>>, vector<1x2x128xf32>,
    %c8_i32 = arith.constant 8 : i32
    %c0_126 = arith.constant 0 : index
    %c0_127 = arith.constant 0 : index
    %c0_128 = arith.constant 0 : index
    %355 = vector.load %arg9[%c0_126, %c0_127, %c0_128] : memref<2x2x128xf32, #tpu.memory_space<vmem>>, vector<1x2x128xf32>
    %356 = vector.shape_cast %355 : vector<1x2x128xf32> to vector<2x128xf32>
    %357 = vector.shape_cast %350 : vector<2x128xf32> to vector<1x2x128xf32>
    tpu.vector_store %arg9[%c0_126, %c0_127, %c0_128], %357 {strides = array<i32>} : memref<2x2x128xf32, #tpu.memory_space<vmem>>, vector<1x2x128xf32>,
    %c0_129 = arith.constant 0 : index
    %c0_130 = arith.constant 0 : index
    %c0_131 = arith.constant 0 : index
    %358 = vector.load %arg12[%c0_129, %c0_130, %c0_131] : memref<8x2x128xf32, #tpu.memory_space<vmem>>, vector<8x2x128xf32>
    %359 = arith.truncf %358 : vector<8x2x128xf32> to vector<8x2x128xbf16>
    %360 = vector.shape_cast %359 : vector<8x2x128xbf16> to vector<16x128xbf16>
    %c0_132 = arith.constant 0 : index
    %c0_133 = arith.constant 0 : index
    %c0_134 = arith.constant 0 : index
    %361 = vector.load %arg3[%c0_132, %c0_133, %c0_134] : memref<1x128x384xbf16, #tpu.memory_space<vmem>>, vector<1x128x384xbf16>
    %362 = vector.shape_cast %361 : vector<1x128x384xbf16> to vector<128x384xbf16>
    %cst_135 = arith.constant dense<0.000000e+00> : vector<16x384xf32>
    %363 = tpu.matmul %360, %362, %cst_135 {dimension_numbers = #tpu.dot_dimension_numbers<[1], [0], [0], [1], [0, 0, 1, 1], [], []>} : vector<16x128xbf16>, vector<128x384xbf16>, vector<16x384xf32> -> vector<16x384xf32>
    %c1_136 = arith.constant 1 : index
    %c0_137 = arith.constant 0 : index
    %c0_138 = arith.constant 0 : index
    %364 = vector.load %arg5[%c1_136, %c0_137, %c0_138] : memref<2x1x384xf32, #tpu.memory_space<vmem>>, vector<1x1x384xf32>
    %365 = vector.shape_cast %364 : vector<1x1x384xf32> to vector<1x384xf32>
    %366 = vector.broadcast %365 : vector<1x384xf32> to vector<16x384xf32>
    %367 = arith.addf %363, %366 : vector<16x384xf32>
    %368 = vector.shape_cast %367 : vector<16x384xf32> to vector<8x2x384xf32>
    %c0_139 = arith.constant 0 : index
    %c0_140 = arith.constant 0 : index
    %c0_141 = arith.constant 0 : index
    %369 = vector.load %arg11[%c0_139, %c0_140, %c0_141] : memref<8x2x384xf32, #tpu.memory_space<vmem>>, vector<8x2x384xf32>
    tpu.vector_store %arg11[%c0_139, %c0_140, %c0_141], %368 {strides = array<i32>} : memref<8x2x384xf32, #tpu.memory_space<vmem>>, vector<8x2x384xf32>,
    %c1_142 = arith.constant 1 : index
    %c0_143 = arith.constant 0 : index
    %c0_144 = arith.constant 0 : index
    %370 = vector.load %arg4[%c1_142, %c0_143, %c0_144] : memref<2x128x384xbf16, #tpu.memory_space<vmem>>, vector<1x128x384xbf16>
    %371 = vector.shape_cast %370 : vector<1x128x384xbf16> to vector<128x384xbf16>
    %c1_145 = arith.constant 1 : index
    %c0_146 = arith.constant 0 : index
    %c0_147 = arith.constant 0 : index
    %372 = vector.load %arg6[%c1_145, %c0_146, %c0_147] : memref<2x1x128xf32, #tpu.memory_space<vmem>>, vector<1x1x128xf32>
    %373 = vector.shape_cast %372 : vector<1x1x128xf32> to vector<1x128xf32>
    %c1_148 = arith.constant 1 : index
    %c0_149 = arith.constant 0 : index
    %c0_150 = arith.constant 0 : index
    %374 = vector.load %arg9[%c1_148, %c0_149, %c0_150] : memref<2x2x128xf32, #tpu.memory_space<vmem>>, vector<1x2x128xf32>
    %375 = vector.shape_cast %374 : vector<1x2x128xf32> to vector<2x128xf32>
    %c0_i32_151 = arith.constant 0 : i32
    %376 = arith.index_cast %c0_i32_151 : i32 to index
    %c0_152 = arith.constant 0 : index
    %c0_153 = arith.constant 0 : index
    %377 = vector.load %arg11[%376, %c0_152, %c0_153] : memref<8x2x384xf32, #tpu.memory_space<vmem>>, vector<1x2x384xf32>
    %378 = vector.shape_cast %377 : vector<1x2x384xf32> to vector<2x384xf32>
    %379 = arith.truncf %375 : vector<2x128xf32> to vector<2x128xbf16>
    %cst_154 = arith.constant dense<0.000000e+00> : vector<2x384xf32>
    %380 = tpu.matmul %379, %371, %cst_154 {dimension_numbers = #tpu.dot_dimension_numbers<[1], [0], [0], [1], [0, 0, 1, 1], [], []>} : vector<2x128xbf16>, vector<128x384xbf16>, vector<2x384xf32> -> vector<2x384xf32>
    %381 = vector.extract_strided_slice %378 {offsets = [0, 0], sizes = [2, 128], strides = [1, 1]} : vector<2x384xf32> to vector<2x128xf32>
    %382 = vector.extract_strided_slice %380 {offsets = [0, 0], sizes = [2, 128], strides = [1, 1]} : vector<2x384xf32> to vector<2x128xf32>
    %383 = arith.addf %381, %382 : vector<2x128xf32>
    %384 = arith.negf %383 : vector<2x128xf32>
    %385 = math.exp %384 : vector<2x128xf32>
    %cst_155 = arith.constant 1.000000e+00 : f32
    %386 = vector.broadcast %cst_155 : f32 to vector<2x128xf32>
    %387 = arith.addf %386, %385 : vector<2x128xf32>
    %388 = arith.divf %386, %387 : vector<2x128xf32>
    %389 = vector.extract_strided_slice %378 {offsets = [0, 128], sizes = [2, 128], strides = [1, 1]} : vector<2x384xf32> to vector<2x128xf32>
    %390 = vector.extract_strided_slice %380 {offsets = [0, 128], sizes = [2, 128], strides = [1, 1]} : vector<2x384xf32> to vector<2x128xf32>
    %391 = arith.addf %389, %390 : vector<2x128xf32>
    %392 = arith.negf %391 : vector<2x128xf32>
    %393 = math.exp %392 : vector<2x128xf32>
    %cst_156 = arith.constant 1.000000e+00 : f32
    %394 = vector.broadcast %cst_156 : f32 to vector<2x128xf32>
    %395 = arith.addf %394, %393 : vector<2x128xf32>
    %396 = arith.divf %394, %395 : vector<2x128xf32>
    %397 = vector.extract_strided_slice %378 {offsets = [0, 256], sizes = [2, 128], strides = [1, 1]} : vector<2x384xf32> to vector<2x128xf32>
    %398 = vector.extract_strided_slice %380 {offsets = [0, 256], sizes = [2, 128], strides = [1, 1]} : vector<2x384xf32> to vector<2x128xf32>
    %399 = vector.broadcast %373 : vector<1x128xf32> to vector<2x128xf32>
    %400 = arith.addf %398, %399 : vector<2x128xf32>
    %401 = arith.mulf %388, %400 : vector<2x128xf32>
    %402 = arith.addf %397, %401 : vector<2x128xf32>
    %403 = math.tanh %402 : vector<2x128xf32>
    %cst_157 = arith.constant 1.000000e+00 : f32
    %404 = vector.broadcast %cst_157 : f32 to vector<2x128xf32>
    %405 = arith.subf %404, %396 : vector<2x128xf32>
    %406 = arith.mulf %405, %403 : vector<2x128xf32>
    %407 = arith.mulf %396, %375 : vector<2x128xf32>
    %408 = arith.addf %406, %407 : vector<2x128xf32>
    %409 = arith.index_cast %c0_i32_151 : i32 to index
    %c0_158 = arith.constant 0 : index
    %c0_159 = arith.constant 0 : index
    %410 = vector.load %arg12[%409, %c0_158, %c0_159] : memref<8x2x128xf32, #tpu.memory_space<vmem>>, vector<1x2x128xf32>
    %411 = vector.shape_cast %410 : vector<1x2x128xf32> to vector<2x128xf32>
    %412 = vector.shape_cast %408 : vector<2x128xf32> to vector<1x2x128xf32>
    tpu.vector_store %arg12[%409, %c0_158, %c0_159], %412 {strides = array<i32>} : memref<8x2x128xf32, #tpu.memory_space<vmem>>, vector<1x2x128xf32>,
    %c1_i32_160 = arith.constant 1 : i32
    %413 = arith.index_cast %c1_i32_160 : i32 to index
    %c0_161 = arith.constant 0 : index
    %c0_162 = arith.constant 0 : index
    %414 = vector.load %arg11[%413, %c0_161, %c0_162] : memref<8x2x384xf32, #tpu.memory_space<vmem>>, vector<1x2x384xf32>
    %415 = vector.shape_cast %414 : vector<1x2x384xf32> to vector<2x384xf32>
    %416 = arith.truncf %408 : vector<2x128xf32> to vector<2x128xbf16>
    %cst_163 = arith.constant dense<0.000000e+00> : vector<2x384xf32>
    %417 = tpu.matmul %416, %371, %cst_163 {dimension_numbers = #tpu.dot_dimension_numbers<[1], [0], [0], [1], [0, 0, 1, 1], [], []>} : vector<2x128xbf16>, vector<128x384xbf16>, vector<2x384xf32> -> vector<2x384xf32>
    %418 = vector.extract_strided_slice %415 {offsets = [0, 0], sizes = [2, 128], strides = [1, 1]} : vector<2x384xf32> to vector<2x128xf32>
    %419 = vector.extract_strided_slice %417 {offsets = [0, 0], sizes = [2, 128], strides = [1, 1]} : vector<2x384xf32> to vector<2x128xf32>
    %420 = arith.addf %418, %419 : vector<2x128xf32>
    %421 = arith.negf %420 : vector<2x128xf32>
    %422 = math.exp %421 : vector<2x128xf32>
    %cst_164 = arith.constant 1.000000e+00 : f32
    %423 = vector.broadcast %cst_164 : f32 to vector<2x128xf32>
    %424 = arith.addf %423, %422 : vector<2x128xf32>
    %425 = arith.divf %423, %424 : vector<2x128xf32>
    %426 = vector.extract_strided_slice %415 {offsets = [0, 128], sizes = [2, 128], strides = [1, 1]} : vector<2x384xf32> to vector<2x128xf32>
    %427 = vector.extract_strided_slice %417 {offsets = [0, 128], sizes = [2, 128], strides = [1, 1]} : vector<2x384xf32> to vector<2x128xf32>
    %428 = arith.addf %426, %427 : vector<2x128xf32>
    %429 = arith.negf %428 : vector<2x128xf32>
    %430 = math.exp %429 : vector<2x128xf32>
    %cst_165 = arith.constant 1.000000e+00 : f32
    %431 = vector.broadcast %cst_165 : f32 to vector<2x128xf32>
    %432 = arith.addf %431, %430 : vector<2x128xf32>
    %433 = arith.divf %431, %432 : vector<2x128xf32>
    %434 = vector.extract_strided_slice %415 {offsets = [0, 256], sizes = [2, 128], strides = [1, 1]} : vector<2x384xf32> to vector<2x128xf32>
    %435 = vector.extract_strided_slice %417 {offsets = [0, 256], sizes = [2, 128], strides = [1, 1]} : vector<2x384xf32> to vector<2x128xf32>
    %436 = vector.broadcast %373 : vector<1x128xf32> to vector<2x128xf32>
    %437 = arith.addf %435, %436 : vector<2x128xf32>
    %438 = arith.mulf %425, %437 : vector<2x128xf32>
    %439 = arith.addf %434, %438 : vector<2x128xf32>
    %440 = math.tanh %439 : vector<2x128xf32>
    %cst_166 = arith.constant 1.000000e+00 : f32
    %441 = vector.broadcast %cst_166 : f32 to vector<2x128xf32>
    %442 = arith.subf %441, %433 : vector<2x128xf32>
    %443 = arith.mulf %442, %440 : vector<2x128xf32>
    %444 = arith.mulf %433, %408 : vector<2x128xf32>
    %445 = arith.addf %443, %444 : vector<2x128xf32>
    %446 = arith.index_cast %c1_i32_160 : i32 to index
    %c0_167 = arith.constant 0 : index
    %c0_168 = arith.constant 0 : index
    %447 = vector.load %arg12[%446, %c0_167, %c0_168] : memref<8x2x128xf32, #tpu.memory_space<vmem>>, vector<1x2x128xf32>
    %448 = vector.shape_cast %447 : vector<1x2x128xf32> to vector<2x128xf32>
    %449 = vector.shape_cast %445 : vector<2x128xf32> to vector<1x2x128xf32>
    tpu.vector_store %arg12[%446, %c0_167, %c0_168], %449 {strides = array<i32>} : memref<8x2x128xf32, #tpu.memory_space<vmem>>, vector<1x2x128xf32>,
    %c2_i32_169 = arith.constant 2 : i32
    %450 = arith.index_cast %c2_i32_169 : i32 to index
    %c0_170 = arith.constant 0 : index
    %c0_171 = arith.constant 0 : index
    %451 = vector.load %arg11[%450, %c0_170, %c0_171] : memref<8x2x384xf32, #tpu.memory_space<vmem>>, vector<1x2x384xf32>
    %452 = vector.shape_cast %451 : vector<1x2x384xf32> to vector<2x384xf32>
    %453 = arith.truncf %445 : vector<2x128xf32> to vector<2x128xbf16>
    %cst_172 = arith.constant dense<0.000000e+00> : vector<2x384xf32>
    %454 = tpu.matmul %453, %371, %cst_172 {dimension_numbers = #tpu.dot_dimension_numbers<[1], [0], [0], [1], [0, 0, 1, 1], [], []>} : vector<2x128xbf16>, vector<128x384xbf16>, vector<2x384xf32> -> vector<2x384xf32>
    %455 = vector.extract_strided_slice %452 {offsets = [0, 0], sizes = [2, 128], strides = [1, 1]} : vector<2x384xf32> to vector<2x128xf32>
    %456 = vector.extract_strided_slice %454 {offsets = [0, 0], sizes = [2, 128], strides = [1, 1]} : vector<2x384xf32> to vector<2x128xf32>
    %457 = arith.addf %455, %456 : vector<2x128xf32>
    %458 = arith.negf %457 : vector<2x128xf32>
    %459 = math.exp %458 : vector<2x128xf32>
    %cst_173 = arith.constant 1.000000e+00 : f32
    %460 = vector.broadcast %cst_173 : f32 to vector<2x128xf32>
    %461 = arith.addf %460, %459 : vector<2x128xf32>
    %462 = arith.divf %460, %461 : vector<2x128xf32>
    %463 = vector.extract_strided_slice %452 {offsets = [0, 128], sizes = [2, 128], strides = [1, 1]} : vector<2x384xf32> to vector<2x128xf32>
    %464 = vector.extract_strided_slice %454 {offsets = [0, 128], sizes = [2, 128], strides = [1, 1]} : vector<2x384xf32> to vector<2x128xf32>
    %465 = arith.addf %463, %464 : vector<2x128xf32>
    %466 = arith.negf %465 : vector<2x128xf32>
    %467 = math.exp %466 : vector<2x128xf32>
    %cst_174 = arith.constant 1.000000e+00 : f32
    %468 = vector.broadcast %cst_174 : f32 to vector<2x128xf32>
    %469 = arith.addf %468, %467 : vector<2x128xf32>
    %470 = arith.divf %468, %469 : vector<2x128xf32>
    %471 = vector.extract_strided_slice %452 {offsets = [0, 256], sizes = [2, 128], strides = [1, 1]} : vector<2x384xf32> to vector<2x128xf32>
    %472 = vector.extract_strided_slice %454 {offsets = [0, 256], sizes = [2, 128], strides = [1, 1]} : vector<2x384xf32> to vector<2x128xf32>
    %473 = vector.broadcast %373 : vector<1x128xf32> to vector<2x128xf32>
    %474 = arith.addf %472, %473 : vector<2x128xf32>
    %475 = arith.mulf %462, %474 : vector<2x128xf32>
    %476 = arith.addf %471, %475 : vector<2x128xf32>
    %477 = math.tanh %476 : vector<2x128xf32>
    %cst_175 = arith.constant 1.000000e+00 : f32
    %478 = vector.broadcast %cst_175 : f32 to vector<2x128xf32>
    %479 = arith.subf %478, %470 : vector<2x128xf32>
    %480 = arith.mulf %479, %477 : vector<2x128xf32>
    %481 = arith.mulf %470, %445 : vector<2x128xf32>
    %482 = arith.addf %480, %481 : vector<2x128xf32>
    %483 = arith.index_cast %c2_i32_169 : i32 to index
    %c0_176 = arith.constant 0 : index
    %c0_177 = arith.constant 0 : index
    %484 = vector.load %arg12[%483, %c0_176, %c0_177] : memref<8x2x128xf32, #tpu.memory_space<vmem>>, vector<1x2x128xf32>
    %485 = vector.shape_cast %484 : vector<1x2x128xf32> to vector<2x128xf32>
    %486 = vector.shape_cast %482 : vector<2x128xf32> to vector<1x2x128xf32>
    tpu.vector_store %arg12[%483, %c0_176, %c0_177], %486 {strides = array<i32>} : memref<8x2x128xf32, #tpu.memory_space<vmem>>, vector<1x2x128xf32>,
    %c3_i32_178 = arith.constant 3 : i32
    %487 = arith.index_cast %c3_i32_178 : i32 to index
    %c0_179 = arith.constant 0 : index
    %c0_180 = arith.constant 0 : index
    %488 = vector.load %arg11[%487, %c0_179, %c0_180] : memref<8x2x384xf32, #tpu.memory_space<vmem>>, vector<1x2x384xf32>
    %489 = vector.shape_cast %488 : vector<1x2x384xf32> to vector<2x384xf32>
    %490 = arith.truncf %482 : vector<2x128xf32> to vector<2x128xbf16>
    %cst_181 = arith.constant dense<0.000000e+00> : vector<2x384xf32>
    %491 = tpu.matmul %490, %371, %cst_181 {dimension_numbers = #tpu.dot_dimension_numbers<[1], [0], [0], [1], [0, 0, 1, 1], [], []>} : vector<2x128xbf16>, vector<128x384xbf16>, vector<2x384xf32> -> vector<2x384xf32>
    %492 = vector.extract_strided_slice %489 {offsets = [0, 0], sizes = [2, 128], strides = [1, 1]} : vector<2x384xf32> to vector<2x128xf32>
    %493 = vector.extract_strided_slice %491 {offsets = [0, 0], sizes = [2, 128], strides = [1, 1]} : vector<2x384xf32> to vector<2x128xf32>
    %494 = arith.addf %492, %493 : vector<2x128xf32>
    %495 = arith.negf %494 : vector<2x128xf32>
    %496 = math.exp %495 : vector<2x128xf32>
    %cst_182 = arith.constant 1.000000e+00 : f32
    %497 = vector.broadcast %cst_182 : f32 to vector<2x128xf32>
    %498 = arith.addf %497, %496 : vector<2x128xf32>
    %499 = arith.divf %497, %498 : vector<2x128xf32>
    %500 = vector.extract_strided_slice %489 {offsets = [0, 128], sizes = [2, 128], strides = [1, 1]} : vector<2x384xf32> to vector<2x128xf32>
    %501 = vector.extract_strided_slice %491 {offsets = [0, 128], sizes = [2, 128], strides = [1, 1]} : vector<2x384xf32> to vector<2x128xf32>
    %502 = arith.addf %500, %501 : vector<2x128xf32>
    %503 = arith.negf %502 : vector<2x128xf32>
    %504 = math.exp %503 : vector<2x128xf32>
    %cst_183 = arith.constant 1.000000e+00 : f32
    %505 = vector.broadcast %cst_183 : f32 to vector<2x128xf32>
    %506 = arith.addf %505, %504 : vector<2x128xf32>
    %507 = arith.divf %505, %506 : vector<2x128xf32>
    %508 = vector.extract_strided_slice %489 {offsets = [0, 256], sizes = [2, 128], strides = [1, 1]} : vector<2x384xf32> to vector<2x128xf32>
    %509 = vector.extract_strided_slice %491 {offsets = [0, 256], sizes = [2, 128], strides = [1, 1]} : vector<2x384xf32> to vector<2x128xf32>
    %510 = vector.broadcast %373 : vector<1x128xf32> to vector<2x128xf32>
    %511 = arith.addf %509, %510 : vector<2x128xf32>
    %512 = arith.mulf %499, %511 : vector<2x128xf32>
    %513 = arith.addf %508, %512 : vector<2x128xf32>
    %514 = math.tanh %513 : vector<2x128xf32>
    %cst_184 = arith.constant 1.000000e+00 : f32
    %515 = vector.broadcast %cst_184 : f32 to vector<2x128xf32>
    %516 = arith.subf %515, %507 : vector<2x128xf32>
    %517 = arith.mulf %516, %514 : vector<2x128xf32>
    %518 = arith.mulf %507, %482 : vector<2x128xf32>
    %519 = arith.addf %517, %518 : vector<2x128xf32>
    %520 = arith.index_cast %c3_i32_178 : i32 to index
    %c0_185 = arith.constant 0 : index
    %c0_186 = arith.constant 0 : index
    %521 = vector.load %arg12[%520, %c0_185, %c0_186] : memref<8x2x128xf32, #tpu.memory_space<vmem>>, vector<1x2x128xf32>
    %522 = vector.shape_cast %521 : vector<1x2x128xf32> to vector<2x128xf32>
    %523 = vector.shape_cast %519 : vector<2x128xf32> to vector<1x2x128xf32>
    tpu.vector_store %arg12[%520, %c0_185, %c0_186], %523 {strides = array<i32>} : memref<8x2x128xf32, #tpu.memory_space<vmem>>, vector<1x2x128xf32>,
    %c4_i32_187 = arith.constant 4 : i32
    %524 = arith.index_cast %c4_i32_187 : i32 to index
    %c0_188 = arith.constant 0 : index
    %c0_189 = arith.constant 0 : index
    %525 = vector.load %arg11[%524, %c0_188, %c0_189] : memref<8x2x384xf32, #tpu.memory_space<vmem>>, vector<1x2x384xf32>
    %526 = vector.shape_cast %525 : vector<1x2x384xf32> to vector<2x384xf32>
    %527 = arith.truncf %519 : vector<2x128xf32> to vector<2x128xbf16>
    %cst_190 = arith.constant dense<0.000000e+00> : vector<2x384xf32>
    %528 = tpu.matmul %527, %371, %cst_190 {dimension_numbers = #tpu.dot_dimension_numbers<[1], [0], [0], [1], [0, 0, 1, 1], [], []>} : vector<2x128xbf16>, vector<128x384xbf16>, vector<2x384xf32> -> vector<2x384xf32>
    %529 = vector.extract_strided_slice %526 {offsets = [0, 0], sizes = [2, 128], strides = [1, 1]} : vector<2x384xf32> to vector<2x128xf32>
    %530 = vector.extract_strided_slice %528 {offsets = [0, 0], sizes = [2, 128], strides = [1, 1]} : vector<2x384xf32> to vector<2x128xf32>
    %531 = arith.addf %529, %530 : vector<2x128xf32>
    %532 = arith.negf %531 : vector<2x128xf32>
    %533 = math.exp %532 : vector<2x128xf32>
    %cst_191 = arith.constant 1.000000e+00 : f32
    %534 = vector.broadcast %cst_191 : f32 to vector<2x128xf32>
    %535 = arith.addf %534, %533 : vector<2x128xf32>
    %536 = arith.divf %534, %535 : vector<2x128xf32>
    %537 = vector.extract_strided_slice %526 {offsets = [0, 128], sizes = [2, 128], strides = [1, 1]} : vector<2x384xf32> to vector<2x128xf32>
    %538 = vector.extract_strided_slice %528 {offsets = [0, 128], sizes = [2, 128], strides = [1, 1]} : vector<2x384xf32> to vector<2x128xf32>
    %539 = arith.addf %537, %538 : vector<2x128xf32>
    %540 = arith.negf %539 : vector<2x128xf32>
    %541 = math.exp %540 : vector<2x128xf32>
    %cst_192 = arith.constant 1.000000e+00 : f32
    %542 = vector.broadcast %cst_192 : f32 to vector<2x128xf32>
    %543 = arith.addf %542, %541 : vector<2x128xf32>
    %544 = arith.divf %542, %543 : vector<2x128xf32>
    %545 = vector.extract_strided_slice %526 {offsets = [0, 256], sizes = [2, 128], strides = [1, 1]} : vector<2x384xf32> to vector<2x128xf32>
    %546 = vector.extract_strided_slice %528 {offsets = [0, 256], sizes = [2, 128], strides = [1, 1]} : vector<2x384xf32> to vector<2x128xf32>
    %547 = vector.broadcast %373 : vector<1x128xf32> to vector<2x128xf32>
    %548 = arith.addf %546, %547 : vector<2x128xf32>
    %549 = arith.mulf %536, %548 : vector<2x128xf32>
    %550 = arith.addf %545, %549 : vector<2x128xf32>
    %551 = math.tanh %550 : vector<2x128xf32>
    %cst_193 = arith.constant 1.000000e+00 : f32
    %552 = vector.broadcast %cst_193 : f32 to vector<2x128xf32>
    %553 = arith.subf %552, %544 : vector<2x128xf32>
    %554 = arith.mulf %553, %551 : vector<2x128xf32>
    %555 = arith.mulf %544, %519 : vector<2x128xf32>
    %556 = arith.addf %554, %555 : vector<2x128xf32>
    %557 = arith.index_cast %c4_i32_187 : i32 to index
    %c0_194 = arith.constant 0 : index
    %c0_195 = arith.constant 0 : index
    %558 = vector.load %arg12[%557, %c0_194, %c0_195] : memref<8x2x128xf32, #tpu.memory_space<vmem>>, vector<1x2x128xf32>
    %559 = vector.shape_cast %558 : vector<1x2x128xf32> to vector<2x128xf32>
    %560 = vector.shape_cast %556 : vector<2x128xf32> to vector<1x2x128xf32>
    tpu.vector_store %arg12[%557, %c0_194, %c0_195], %560 {strides = array<i32>} : memref<8x2x128xf32, #tpu.memory_space<vmem>>, vector<1x2x128xf32>,
    %c5_i32_196 = arith.constant 5 : i32
    %561 = arith.index_cast %c5_i32_196 : i32 to index
    %c0_197 = arith.constant 0 : index
    %c0_198 = arith.constant 0 : index
    %562 = vector.load %arg11[%561, %c0_197, %c0_198] : memref<8x2x384xf32, #tpu.memory_space<vmem>>, vector<1x2x384xf32>
    %563 = vector.shape_cast %562 : vector<1x2x384xf32> to vector<2x384xf32>
    %564 = arith.truncf %556 : vector<2x128xf32> to vector<2x128xbf16>
    %cst_199 = arith.constant dense<0.000000e+00> : vector<2x384xf32>
    %565 = tpu.matmul %564, %371, %cst_199 {dimension_numbers = #tpu.dot_dimension_numbers<[1], [0], [0], [1], [0, 0, 1, 1], [], []>} : vector<2x128xbf16>, vector<128x384xbf16>, vector<2x384xf32> -> vector<2x384xf32>
    %566 = vector.extract_strided_slice %563 {offsets = [0, 0], sizes = [2, 128], strides = [1, 1]} : vector<2x384xf32> to vector<2x128xf32>
    %567 = vector.extract_strided_slice %565 {offsets = [0, 0], sizes = [2, 128], strides = [1, 1]} : vector<2x384xf32> to vector<2x128xf32>
    %568 = arith.addf %566, %567 : vector<2x128xf32>
    %569 = arith.negf %568 : vector<2x128xf32>
    %570 = math.exp %569 : vector<2x128xf32>
    %cst_200 = arith.constant 1.000000e+00 : f32
    %571 = vector.broadcast %cst_200 : f32 to vector<2x128xf32>
    %572 = arith.addf %571, %570 : vector<2x128xf32>
    %573 = arith.divf %571, %572 : vector<2x128xf32>
    %574 = vector.extract_strided_slice %563 {offsets = [0, 128], sizes = [2, 128], strides = [1, 1]} : vector<2x384xf32> to vector<2x128xf32>
    %575 = vector.extract_strided_slice %565 {offsets = [0, 128], sizes = [2, 128], strides = [1, 1]} : vector<2x384xf32> to vector<2x128xf32>
    %576 = arith.addf %574, %575 : vector<2x128xf32>
    %577 = arith.negf %576 : vector<2x128xf32>
    %578 = math.exp %577 : vector<2x128xf32>
    %cst_201 = arith.constant 1.000000e+00 : f32
    %579 = vector.broadcast %cst_201 : f32 to vector<2x128xf32>
    %580 = arith.addf %579, %578 : vector<2x128xf32>
    %581 = arith.divf %579, %580 : vector<2x128xf32>
    %582 = vector.extract_strided_slice %563 {offsets = [0, 256], sizes = [2, 128], strides = [1, 1]} : vector<2x384xf32> to vector<2x128xf32>
    %583 = vector.extract_strided_slice %565 {offsets = [0, 256], sizes = [2, 128], strides = [1, 1]} : vector<2x384xf32> to vector<2x128xf32>
    %584 = vector.broadcast %373 : vector<1x128xf32> to vector<2x128xf32>
    %585 = arith.addf %583, %584 : vector<2x128xf32>
    %586 = arith.mulf %573, %585 : vector<2x128xf32>
    %587 = arith.addf %582, %586 : vector<2x128xf32>
    %588 = math.tanh %587 : vector<2x128xf32>
    %cst_202 = arith.constant 1.000000e+00 : f32
    %589 = vector.broadcast %cst_202 : f32 to vector<2x128xf32>
    %590 = arith.subf %589, %581 : vector<2x128xf32>
    %591 = arith.mulf %590, %588 : vector<2x128xf32>
    %592 = arith.mulf %581, %556 : vector<2x128xf32>
    %593 = arith.addf %591, %592 : vector<2x128xf32>
    %594 = arith.index_cast %c5_i32_196 : i32 to index
    %c0_203 = arith.constant 0 : index
    %c0_204 = arith.constant 0 : index
    %595 = vector.load %arg12[%594, %c0_203, %c0_204] : memref<8x2x128xf32, #tpu.memory_space<vmem>>, vector<1x2x128xf32>
    %596 = vector.shape_cast %595 : vector<1x2x128xf32> to vector<2x128xf32>
    %597 = vector.shape_cast %593 : vector<2x128xf32> to vector<1x2x128xf32>
    tpu.vector_store %arg12[%594, %c0_203, %c0_204], %597 {strides = array<i32>} : memref<8x2x128xf32, #tpu.memory_space<vmem>>, vector<1x2x128xf32>,
    %c6_i32_205 = arith.constant 6 : i32
    %598 = arith.index_cast %c6_i32_205 : i32 to index
    %c0_206 = arith.constant 0 : index
    %c0_207 = arith.constant 0 : index
    %599 = vector.load %arg11[%598, %c0_206, %c0_207] : memref<8x2x384xf32, #tpu.memory_space<vmem>>, vector<1x2x384xf32>
    %600 = vector.shape_cast %599 : vector<1x2x384xf32> to vector<2x384xf32>
    %601 = arith.truncf %593 : vector<2x128xf32> to vector<2x128xbf16>
    %cst_208 = arith.constant dense<0.000000e+00> : vector<2x384xf32>
    %602 = tpu.matmul %601, %371, %cst_208 {dimension_numbers = #tpu.dot_dimension_numbers<[1], [0], [0], [1], [0, 0, 1, 1], [], []>} : vector<2x128xbf16>, vector<128x384xbf16>, vector<2x384xf32> -> vector<2x384xf32>
    %603 = vector.extract_strided_slice %600 {offsets = [0, 0], sizes = [2, 128], strides = [1, 1]} : vector<2x384xf32> to vector<2x128xf32>
    %604 = vector.extract_strided_slice %602 {offsets = [0, 0], sizes = [2, 128], strides = [1, 1]} : vector<2x384xf32> to vector<2x128xf32>
    %605 = arith.addf %603, %604 : vector<2x128xf32>
    %606 = arith.negf %605 : vector<2x128xf32>
    %607 = math.exp %606 : vector<2x128xf32>
    %cst_209 = arith.constant 1.000000e+00 : f32
    %608 = vector.broadcast %cst_209 : f32 to vector<2x128xf32>
    %609 = arith.addf %608, %607 : vector<2x128xf32>
    %610 = arith.divf %608, %609 : vector<2x128xf32>
    %611 = vector.extract_strided_slice %600 {offsets = [0, 128], sizes = [2, 128], strides = [1, 1]} : vector<2x384xf32> to vector<2x128xf32>
    %612 = vector.extract_strided_slice %602 {offsets = [0, 128], sizes = [2, 128], strides = [1, 1]} : vector<2x384xf32> to vector<2x128xf32>
    %613 = arith.addf %611, %612 : vector<2x128xf32>
    %614 = arith.negf %613 : vector<2x128xf32>
    %615 = math.exp %614 : vector<2x128xf32>
    %cst_210 = arith.constant 1.000000e+00 : f32
    %616 = vector.broadcast %cst_210 : f32 to vector<2x128xf32>
    %617 = arith.addf %616, %615 : vector<2x128xf32>
    %618 = arith.divf %616, %617 : vector<2x128xf32>
    %619 = vector.extract_strided_slice %600 {offsets = [0, 256], sizes = [2, 128], strides = [1, 1]} : vector<2x384xf32> to vector<2x128xf32>
    %620 = vector.extract_strided_slice %602 {offsets = [0, 256], sizes = [2, 128], strides = [1, 1]} : vector<2x384xf32> to vector<2x128xf32>
    %621 = vector.broadcast %373 : vector<1x128xf32> to vector<2x128xf32>
    %622 = arith.addf %620, %621 : vector<2x128xf32>
    %623 = arith.mulf %610, %622 : vector<2x128xf32>
    %624 = arith.addf %619, %623 : vector<2x128xf32>
    %625 = math.tanh %624 : vector<2x128xf32>
    %cst_211 = arith.constant 1.000000e+00 : f32
    %626 = vector.broadcast %cst_211 : f32 to vector<2x128xf32>
    %627 = arith.subf %626, %618 : vector<2x128xf32>
    %628 = arith.mulf %627, %625 : vector<2x128xf32>
    %629 = arith.mulf %618, %593 : vector<2x128xf32>
    %630 = arith.addf %628, %629 : vector<2x128xf32>
    %631 = arith.index_cast %c6_i32_205 : i32 to index
    %c0_212 = arith.constant 0 : index
    %c0_213 = arith.constant 0 : index
    %632 = vector.load %arg12[%631, %c0_212, %c0_213] : memref<8x2x128xf32, #tpu.memory_space<vmem>>, vector<1x2x128xf32>
    %633 = vector.shape_cast %632 : vector<1x2x128xf32> to vector<2x128xf32>
    %634 = vector.shape_cast %630 : vector<2x128xf32> to vector<1x2x128xf32>
    tpu.vector_store %arg12[%631, %c0_212, %c0_213], %634 {strides = array<i32>} : memref<8x2x128xf32, #tpu.memory_space<vmem>>, vector<1x2x128xf32>,
    %c7_i32_214 = arith.constant 7 : i32
    %635 = arith.index_cast %c7_i32_214 : i32 to index
    %c0_215 = arith.constant 0 : index
    %c0_216 = arith.constant 0 : index
    %636 = vector.load %arg11[%635, %c0_215, %c0_216] : memref<8x2x384xf32, #tpu.memory_space<vmem>>, vector<1x2x384xf32>
    %637 = vector.shape_cast %636 : vector<1x2x384xf32> to vector<2x384xf32>
    %638 = arith.truncf %630 : vector<2x128xf32> to vector<2x128xbf16>
    %cst_217 = arith.constant dense<0.000000e+00> : vector<2x384xf32>
    %639 = tpu.matmul %638, %371, %cst_217 {dimension_numbers = #tpu.dot_dimension_numbers<[1], [0], [0], [1], [0, 0, 1, 1], [], []>} : vector<2x128xbf16>, vector<128x384xbf16>, vector<2x384xf32> -> vector<2x384xf32>
    %640 = vector.extract_strided_slice %637 {offsets = [0, 0], sizes = [2, 128], strides = [1, 1]} : vector<2x384xf32> to vector<2x128xf32>
    %641 = vector.extract_strided_slice %639 {offsets = [0, 0], sizes = [2, 128], strides = [1, 1]} : vector<2x384xf32> to vector<2x128xf32>
    %642 = arith.addf %640, %641 : vector<2x128xf32>
    %643 = arith.negf %642 : vector<2x128xf32>
    %644 = math.exp %643 : vector<2x128xf32>
    %cst_218 = arith.constant 1.000000e+00 : f32
    %645 = vector.broadcast %cst_218 : f32 to vector<2x128xf32>
    %646 = arith.addf %645, %644 : vector<2x128xf32>
    %647 = arith.divf %645, %646 : vector<2x128xf32>
    %648 = vector.extract_strided_slice %637 {offsets = [0, 128], sizes = [2, 128], strides = [1, 1]} : vector<2x384xf32> to vector<2x128xf32>
    %649 = vector.extract_strided_slice %639 {offsets = [0, 128], sizes = [2, 128], strides = [1, 1]} : vector<2x384xf32> to vector<2x128xf32>
    %650 = arith.addf %648, %649 : vector<2x128xf32>
    %651 = arith.negf %650 : vector<2x128xf32>
    %652 = math.exp %651 : vector<2x128xf32>
    %cst_219 = arith.constant 1.000000e+00 : f32
    %653 = vector.broadcast %cst_219 : f32 to vector<2x128xf32>
    %654 = arith.addf %653, %652 : vector<2x128xf32>
    %655 = arith.divf %653, %654 : vector<2x128xf32>
    %656 = vector.extract_strided_slice %637 {offsets = [0, 256], sizes = [2, 128], strides = [1, 1]} : vector<2x384xf32> to vector<2x128xf32>
    %657 = vector.extract_strided_slice %639 {offsets = [0, 256], sizes = [2, 128], strides = [1, 1]} : vector<2x384xf32> to vector<2x128xf32>
    %658 = vector.broadcast %373 : vector<1x128xf32> to vector<2x128xf32>
    %659 = arith.addf %657, %658 : vector<2x128xf32>
    %660 = arith.mulf %647, %659 : vector<2x128xf32>
    %661 = arith.addf %656, %660 : vector<2x128xf32>
    %662 = math.tanh %661 : vector<2x128xf32>
    %cst_220 = arith.constant 1.000000e+00 : f32
    %663 = vector.broadcast %cst_220 : f32 to vector<2x128xf32>
    %664 = arith.subf %663, %655 : vector<2x128xf32>
    %665 = arith.mulf %664, %662 : vector<2x128xf32>
    %666 = arith.mulf %655, %630 : vector<2x128xf32>
    %667 = arith.addf %665, %666 : vector<2x128xf32>
    %668 = arith.index_cast %c7_i32_214 : i32 to index
    %c0_221 = arith.constant 0 : index
    %c0_222 = arith.constant 0 : index
    %669 = vector.load %arg12[%668, %c0_221, %c0_222] : memref<8x2x128xf32, #tpu.memory_space<vmem>>, vector<1x2x128xf32>
    %670 = vector.shape_cast %669 : vector<1x2x128xf32> to vector<2x128xf32>
    %671 = vector.shape_cast %667 : vector<2x128xf32> to vector<1x2x128xf32>
    tpu.vector_store %arg12[%668, %c0_221, %c0_222], %671 {strides = array<i32>} : memref<8x2x128xf32, #tpu.memory_space<vmem>>, vector<1x2x128xf32>,
    %c8_i32_223 = arith.constant 8 : i32
    %c1_224 = arith.constant 1 : index
    %c0_225 = arith.constant 0 : index
    %c0_226 = arith.constant 0 : index
    %672 = vector.load %arg9[%c1_224, %c0_225, %c0_226] : memref<2x2x128xf32, #tpu.memory_space<vmem>>, vector<1x2x128xf32>
    %673 = vector.shape_cast %672 : vector<1x2x128xf32> to vector<2x128xf32>
    %674 = vector.shape_cast %667 : vector<2x128xf32> to vector<1x2x128xf32>
    tpu.vector_store %arg9[%c1_224, %c0_225, %c0_226], %674 {strides = array<i32>} : memref<2x2x128xf32, #tpu.memory_space<vmem>>, vector<1x2x128xf32>,
    %c0_227 = arith.constant 0 : index
    %c0_228 = arith.constant 0 : index
    %c0_229 = arith.constant 0 : index
    %675 = vector.load %arg12[%c0_227, %c0_228, %c0_229] : memref<8x2x128xf32, #tpu.memory_space<vmem>>, vector<1x2x128xf32>
    %676 = vector.shape_cast %675 : vector<1x2x128xf32> to vector<2x128xf32>
    %c0_230 = arith.constant 0 : index
    %c0_231 = arith.constant 0 : index
    %c0_232 = arith.constant 0 : index
    %677 = vector.load %arg7[%c0_230, %c0_231, %c0_232] : memref<2x8x128xf32, #tpu.memory_space<vmem>>, vector<2x1x128xf32>
    %678 = vector.shape_cast %677 : vector<2x1x128xf32> to vector<2x128xf32>
    %679 = vector.shape_cast %676 : vector<2x128xf32> to vector<2x1x128xf32>
    tpu.vector_store %arg7[%c0_230, %c0_231, %c0_232], %679 {strides = array<i32>} : memref<2x8x128xf32, #tpu.memory_space<vmem>>, vector<2x1x128xf32>,
    %c1_233 = arith.constant 1 : index
    %c0_234 = arith.constant 0 : index
    %c0_235 = arith.constant 0 : index
    %680 = vector.load %arg12[%c1_233, %c0_234, %c0_235] : memref<8x2x128xf32, #tpu.memory_space<vmem>>, vector<1x2x128xf32>
    %681 = vector.shape_cast %680 : vector<1x2x128xf32> to vector<2x128xf32>
    %c0_236 = arith.constant 0 : index
    %c1_237 = arith.constant 1 : index
    %c0_238 = arith.constant 0 : index
    %682 = vector.load %arg7[%c0_236, %c1_237, %c0_238] : memref<2x8x128xf32, #tpu.memory_space<vmem>>, vector<2x1x128xf32>
    %683 = vector.shape_cast %682 : vector<2x1x128xf32> to vector<2x128xf32>
    %684 = vector.shape_cast %681 : vector<2x128xf32> to vector<2x1x128xf32>
    tpu.vector_store %arg7[%c0_236, %c1_237, %c0_238], %684 {strides = array<i32>} : memref<2x8x128xf32, #tpu.memory_space<vmem>>, vector<2x1x128xf32>,
    %c2_239 = arith.constant 2 : index
    %c0_240 = arith.constant 0 : index
    %c0_241 = arith.constant 0 : index
    %685 = vector.load %arg12[%c2_239, %c0_240, %c0_241] : memref<8x2x128xf32, #tpu.memory_space<vmem>>, vector<1x2x128xf32>
    %686 = vector.shape_cast %685 : vector<1x2x128xf32> to vector<2x128xf32>
    %c0_242 = arith.constant 0 : index
    %c2_243 = arith.constant 2 : index
    %c0_244 = arith.constant 0 : index
    %687 = vector.load %arg7[%c0_242, %c2_243, %c0_244] : memref<2x8x128xf32, #tpu.memory_space<vmem>>, vector<2x1x128xf32>
    %688 = vector.shape_cast %687 : vector<2x1x128xf32> to vector<2x128xf32>
    %689 = vector.shape_cast %686 : vector<2x128xf32> to vector<2x1x128xf32>
    tpu.vector_store %arg7[%c0_242, %c2_243, %c0_244], %689 {strides = array<i32>} : memref<2x8x128xf32, #tpu.memory_space<vmem>>, vector<2x1x128xf32>,
    %c3_245 = arith.constant 3 : index
    %c0_246 = arith.constant 0 : index
    %c0_247 = arith.constant 0 : index
    %690 = vector.load %arg12[%c3_245, %c0_246, %c0_247] : memref<8x2x128xf32, #tpu.memory_space<vmem>>, vector<1x2x128xf32>
    %691 = vector.shape_cast %690 : vector<1x2x128xf32> to vector<2x128xf32>
    %c0_248 = arith.constant 0 : index
    %c3_249 = arith.constant 3 : index
    %c0_250 = arith.constant 0 : index
    %692 = vector.load %arg7[%c0_248, %c3_249, %c0_250] : memref<2x8x128xf32, #tpu.memory_space<vmem>>, vector<2x1x128xf32>
    %693 = vector.shape_cast %692 : vector<2x1x128xf32> to vector<2x128xf32>
    %694 = vector.shape_cast %691 : vector<2x128xf32> to vector<2x1x128xf32>
    tpu.vector_store %arg7[%c0_248, %c3_249, %c0_250], %694 {strides = array<i32>} : memref<2x8x128xf32, #tpu.memory_space<vmem>>, vector<2x1x128xf32>,
    %c4_251 = arith.constant 4 : index
    %c0_252 = arith.constant 0 : index
    %c0_253 = arith.constant 0 : index
    %695 = vector.load %arg12[%c4_251, %c0_252, %c0_253] : memref<8x2x128xf32, #tpu.memory_space<vmem>>, vector<1x2x128xf32>
    %696 = vector.shape_cast %695 : vector<1x2x128xf32> to vector<2x128xf32>
    %c0_254 = arith.constant 0 : index
    %c4_255 = arith.constant 4 : index
    %c0_256 = arith.constant 0 : index
    %697 = vector.load %arg7[%c0_254, %c4_255, %c0_256] : memref<2x8x128xf32, #tpu.memory_space<vmem>>, vector<2x1x128xf32>
    %698 = vector.shape_cast %697 : vector<2x1x128xf32> to vector<2x128xf32>
    %699 = vector.shape_cast %696 : vector<2x128xf32> to vector<2x1x128xf32>
    tpu.vector_store %arg7[%c0_254, %c4_255, %c0_256], %699 {strides = array<i32>} : memref<2x8x128xf32, #tpu.memory_space<vmem>>, vector<2x1x128xf32>,
    %c5_257 = arith.constant 5 : index
    %c0_258 = arith.constant 0 : index
    %c0_259 = arith.constant 0 : index
    %700 = vector.load %arg12[%c5_257, %c0_258, %c0_259] : memref<8x2x128xf32, #tpu.memory_space<vmem>>, vector<1x2x128xf32>
    %701 = vector.shape_cast %700 : vector<1x2x128xf32> to vector<2x128xf32>
    %c0_260 = arith.constant 0 : index
    %c5_261 = arith.constant 5 : index
    %c0_262 = arith.constant 0 : index
    %702 = vector.load %arg7[%c0_260, %c5_261, %c0_262] : memref<2x8x128xf32, #tpu.memory_space<vmem>>, vector<2x1x128xf32>
    %703 = vector.shape_cast %702 : vector<2x1x128xf32> to vector<2x128xf32>
    %704 = vector.shape_cast %701 : vector<2x128xf32> to vector<2x1x128xf32>
    tpu.vector_store %arg7[%c0_260, %c5_261, %c0_262], %704 {strides = array<i32>} : memref<2x8x128xf32, #tpu.memory_space<vmem>>, vector<2x1x128xf32>,
    %c6_263 = arith.constant 6 : index
    %c0_264 = arith.constant 0 : index
    %c0_265 = arith.constant 0 : index
    %705 = vector.load %arg12[%c6_263, %c0_264, %c0_265] : memref<8x2x128xf32, #tpu.memory_space<vmem>>, vector<1x2x128xf32>
    %706 = vector.shape_cast %705 : vector<1x2x128xf32> to vector<2x128xf32>
    %c0_266 = arith.constant 0 : index
    %c6_267 = arith.constant 6 : index
    %c0_268 = arith.constant 0 : index
    %707 = vector.load %arg7[%c0_266, %c6_267, %c0_268] : memref<2x8x128xf32, #tpu.memory_space<vmem>>, vector<2x1x128xf32>
    %708 = vector.shape_cast %707 : vector<2x1x128xf32> to vector<2x128xf32>
    %709 = vector.shape_cast %706 : vector<2x128xf32> to vector<2x1x128xf32>
    tpu.vector_store %arg7[%c0_266, %c6_267, %c0_268], %709 {strides = array<i32>} : memref<2x8x128xf32, #tpu.memory_space<vmem>>, vector<2x1x128xf32>,
    %c7_269 = arith.constant 7 : index
    %c0_270 = arith.constant 0 : index
    %c0_271 = arith.constant 0 : index
    %710 = vector.load %arg12[%c7_269, %c0_270, %c0_271] : memref<8x2x128xf32, #tpu.memory_space<vmem>>, vector<1x2x128xf32>
    %711 = vector.shape_cast %710 : vector<1x2x128xf32> to vector<2x128xf32>
    %c0_272 = arith.constant 0 : index
    %c7_273 = arith.constant 7 : index
    %c0_274 = arith.constant 0 : index
    %712 = vector.load %arg7[%c0_272, %c7_273, %c0_274] : memref<2x8x128xf32, #tpu.memory_space<vmem>>, vector<2x1x128xf32>
    %713 = vector.shape_cast %712 : vector<2x1x128xf32> to vector<2x128xf32>
    %714 = vector.shape_cast %711 : vector<2x128xf32> to vector<2x1x128xf32>
    tpu.vector_store %arg7[%c0_272, %c7_273, %c0_274], %714 {strides = array<i32>} : memref<2x8x128xf32, #tpu.memory_space<vmem>>, vector<2x1x128xf32>,
    %c0_275 = arith.constant 0 : index
    %c0_276 = arith.constant 0 : index
    %c0_277 = arith.constant 0 : index
    %715 = vector.load %arg9[%c0_275, %c0_276, %c0_277] : memref<2x2x128xf32, #tpu.memory_space<vmem>>, vector<2x2x128xf32>
    %c0_278 = arith.constant 0 : index
    %c0_279 = arith.constant 0 : index
    %c0_280 = arith.constant 0 : index
    %716 = vector.load %arg8[%c0_278, %c0_279, %c0_280] : memref<2x2x128xf32, #tpu.memory_space<vmem>>, vector<2x2x128xf32>
    tpu.vector_store %arg8[%c0_278, %c0_279, %c0_280], %715 {strides = array<i32>} : memref<2x2x128xf32, #tpu.memory_space<vmem>>, vector<2x2x128xf32>,
    return
  }
  func.func @transform_0(%arg0: i32) -> (i32, i32, i32) {
    %c0_i32 = arith.constant 0 : i32
    %c0_i32_0 = arith.constant 0 : i32
    %c0_i32_1 = arith.constant 0 : i32
    return %c0_i32, %arg0, %c0_i32_0 : i32, i32, i32
  }
  func.func @transform_1(%arg0: i32) -> (i32, i32) {
    %c0_i32 = arith.constant 0 : i32
    %c0_i32_0 = arith.constant 0 : i32
    %c0_i32_1 = arith.constant 0 : i32
    return %c0_i32, %c0_i32_0 : i32, i32
  }
  func.func @transform_2(%arg0: i32) -> (i32, i32, i32) {
    %c0_i32 = arith.constant 0 : i32
    %c0_i32_0 = arith.constant 0 : i32
    %c0_i32_1 = arith.constant 0 : i32
    %c0_i32_2 = arith.constant 0 : i32
    return %c0_i32, %c0_i32_0, %c0_i32_1 : i32, i32, i32
  }
  func.func @transform_3(%arg0: i32) -> (i32, i32, i32) {
    %c0_i32 = arith.constant 0 : i32
    %c0_i32_0 = arith.constant 0 : i32
    %c0_i32_1 = arith.constant 0 : i32
    %c0_i32_2 = arith.constant 0 : i32
    return %c0_i32, %c0_i32_0, %c0_i32_1 : i32, i32, i32
  }
  func.func @transform_4(%arg0: i32) -> (i32, i32, i32) {
    %c0_i32 = arith.constant 0 : i32
    %c0_i32_0 = arith.constant 0 : i32
    %c0_i32_1 = arith.constant 0 : i32
    %c0_i32_2 = arith.constant 0 : i32
    return %c0_i32, %c0_i32_0, %c0_i32_1 : i32, i32, i32
  }
  func.func @transform_5(%arg0: i32) -> (i32, i32, i32) {
    %c0_i32 = arith.constant 0 : i32
    %c0_i32_0 = arith.constant 0 : i32
    %c0_i32_1 = arith.constant 0 : i32
    %c0_i32_2 = arith.constant 0 : i32
    return %c0_i32, %c0_i32_0, %c0_i32_1 : i32, i32, i32
  }
  func.func @transform_6(%arg0: i32) -> (i32, i32, i32) {
    %c0_i32 = arith.constant 0 : i32
    %c0_i32_0 = arith.constant 0 : i32
    %c0_i32_1 = arith.constant 0 : i32
    return %c0_i32, %arg0, %c0_i32_0 : i32, i32, i32
  }
  func.func @transform_7(%arg0: i32) -> (i32, i32, i32) {
    %c0_i32 = arith.constant 0 : i32
    %c0_i32_0 = arith.constant 0 : i32
    %c0_i32_1 = arith.constant 0 : i32
    %c0_i32_2 = arith.constant 0 : i32
    return %c0_i32, %c0_i32_0, %c0_i32_1 : i32, i32, i32
  }
}

</mosaic_0001>

<bundles_post_ra>
// kernel: encoder_forward.1
= control target key start
LH: loop header
LB: loop body
LE: loop exit
PB: predicated region body
PF: predicated region fallthrough
CT: control target
= control target key end

     0   :  { %13 = vsyncpa [#allocation7], 0  ;;  %v5077_v2 = vmov 0.0   ;;  %v5078_v3 = vmov 0   ;;  %v48_v12 = vlaneseq  ;;  %vm5079_vm0 = vmmov 0   ;;  %s6468_s0 = inlined_call_operand.vmem [shape: bf16[2,8,128], index: 0, kind: input, shape index: {}]   ;;  %s6469_s1 = inlined_call_operand.vmem [shape: bf16[128,384], index: 1, kind: input, shape index: {}]   ;;  %s6470_s2 = inlined_call_operand.vmem [shape: bf16[1,128,384], index: 2, kind: input, shape index: {}]   ;;  %s6471_s3 = inlined_call_operand.vmem [shape: bf16[2,128,384], index: 3, kind: input, shape index: {}]   ;;  %s6472_s4 = inlined_call_operand.vmem [shape: f32[2,1,384], index: 4, kind: input, shape index: {}]   ;;  %s6473_s5 = inlined_call_operand.vmem [shape: f32[2,1,128], index: 5, kind: input, shape index: {}]   ;;  %s6474_s6 = inlined_call_operand.hbm [shape: f32[2,8,128], index: 6, kind: output, shape index: {0}]   ;;  %s6475_s7 = inlined_call_operand.hbm [shape: f32[2,2,128], index: 7, kind: output, shape index: {1}]  }
   0x1   :  { %v4694_v0 = vld [vmem:[%s6469_s1 + $0x4] ss:$12 sps:$4 sm:$0xff]   ;;  %v4696_v1 = vld [vmem:[%s6469_s1] ss:$12 sps:$4 sm:$0xff]   ;;  %4322 = vmatprep.subr.bf16.mxu1 %v5077_v2  ;;  %32 = vst [vmem:[#allocation2] sm:$0x3] %v5077_v2  ;;  %981 = vmatprep.mubr.bf16.mxu0 %v5078_v3 }
   0x2   :  { %33 = vst [vmem:[#allocation2 + $0x2] sm:$0x3] %v5077_v2  ;;  %949 = vmatprep.subr.bf16.mxu0 %v4694_v0  ;;  %v4697_v4 = vld [vmem:[%s6469_s1 + $0x8] ss:$12 sps:$4 sm:$0xff]   ;;  %v4700_v6 = vld [vmem:[%s6469_s1 + $0x18] ss:$12 sps:$4 sm:$0xff]   ;;  %4338 = vmatprep.mubr.msk.bf16.mxu1 %vm5079_vm0, %v5077_v2 }
   0x3   :  { %950 = vmatpush1.bf16.msra.mxu0 %v4696_v1  ;;  %v4698_v5 = vld [vmem:[%s6469_s1 + $0x1c] ss:$12 sps:$4 sm:$0xff]   ;;  %4323 = vmatpush3.bf16.msra.mxu1 %v4697_v4  ;;  %v4701_v7 = vld [vmem:[%s6469_s1 + $0x20] ss:$12 sps:$4 sm:$0xff]   ;;  %v4705_v10 = vld [vmem:[%s6469_s1 + $0x38] ss:$12 sps:$4 sm:$0xff]  }
   0x4   :  { %951 = vmatprep.subr.bf16.mxu0 %v4698_v5  ;;  %4324 = vmatprep.subr.bf16.mxu1 %v5077_v2  ;;  %v4702_v8 = vld [vmem:[%s6469_s1 + $0x34] ss:$12 sps:$4 sm:$0xff]   ;;  %v4704_v9 = vld [vmem:[%s6469_s1 + $0x30] ss:$12 sps:$4 sm:$0xff]   ;;  %v4706_v11 = vld [vmem:[%s6469_s1 + $0x4c] ss:$12 sps:$4 sm:$0xff]  }
   0x5   :  { %v4708_v13 = vld [vmem:[%s6469_s1 + $0x48] ss:$12 sps:$4 sm:$0xff]   ;;  %v5080_v14 = vmov 1966171168   ;;  %v5081_v16 = vmov 1935823168  }
   0x6   :  { %v46_v15 = vunpack.c.l.s4 %v5080_v14  ;;  %v67_v17 = vunpack.c.l.s4 %v5081_v16  ;;  %v4709_v18 = vld [vmem:[%s6469_s1 + $0x50] ss:$12 sps:$4 sm:$0xff]   ;;  %v4712_v20 = vld [vmem:[%s6469_s1 + $0x60] ss:$12 sps:$4 sm:$0xff]   ;;  %v5180_v21 = vshrl.u32 %v48_v12, 7  ;;  %vm97_vm1 = vcmask 1041409  }
   0x7   :  { %952 = vmatpush1.bf16.msra.mxu0 %v4700_v6  ;;  %4325 = vmatpush3.bf16.msra.mxu1 %v4701_v7  ;;  %v4710_v19 = vld [vmem:[%s6469_s1 + $0x64] ss:$12 sps:$4 sm:$0xff]   ;;  %v4713_v22 = vld [vmem:[%s6469_s1 + $0x68] ss:$12 sps:$4 sm:$0xff]   ;;  %v4717_v27 = vld [vmem:[%s6469_s1 + $0x80] ss:$12 sps:$4 sm:$0xff]  }
   0x8   :  { %953 = vmatprep.subr.bf16.mxu0 %v4702_v8  ;;  %4326 = vmatprep.subr.bf16.mxu1 %v5077_v2  ;;  %v47_v23 = vunpack.c.0.s8 %v46_v15  ;;  %v68_v24 = vunpack.c.0.s8 %v67_v17  ;;  %v4714_v25 = vld [vmem:[%s6469_s1 + $0x7c] ss:$12 sps:$4 sm:$0xff]   ;;  %v4716_v26 = vld [vmem:[%s6469_s1 + $0x78] ss:$12 sps:$4 sm:$0xff]   ;;  %v4718_v28 = vld [vmem:[%s6469_s1 + $0x94] ss:$12 sps:$4 sm:$0xff]  }
   0x9   :  { %v3944_v31 = vld.sshfl [vmem:[%s6468_s0] sm:$0x1 pattern:$0x75316420]  ;;  %v4720_v32 = vld [vmem:[%s6469_s1 + $0x90] ss:$12 sps:$4 sm:$0xff]  }
   0xa   :  { %v5199_v29 = vsub.s32 %v47_v23, %v5180_v21  ;;  %v5202_v30 = vsub.s32 %v68_v24, %v5180_v21  ;;  %v3945_v33 = vld.sshfl [vmem:[%s6468_s0 + $0x4] sm:$0x1 pattern:$0x75316420]  ;;  %v4722_v41 = vld [vmem:[%s6469_s1 + $0xac] ss:$12 sps:$4 sm:$0xff]  }
   0xb   :  { %954 = vmatpush1.bf16.msra.mxu0 %v4704_v9  ;;  %4327 = vmatpush3.bf16.msra.mxu1 %v4705_v10  ;;  %v4721_v35 = vld [vmem:[%s6469_s1 + $0x98] ss:$12 sps:$4 sm:$0xff]   ;;  %v3950_v37 = vld.sshfl [vmem:[%s6468_s0] sm:$0x10 pattern:$0x75316420] }
   0xc   :  { %955 = vmatprep.subr.bf16.mxu0 %v4706_v11  ;;  %4328 = vmatprep.subr.bf16.mxu1 %v5077_v2  ;;  %v51_v34 = vrot.slane %v3944_v31, %v5199_v29  ;;  %v65_v36 = vrot.slane %v3945_v33, %v5199_v29  ;;  %v3951_v39 = vld.sshfl [vmem:[%s6468_s0 + $0x4] sm:$0x10 pattern:$0x75316420]  ;;  %v209_v40 = vcombine.high %v3950_v37, %v3950_v37  ;;  %v4724_v53 = vld [vmem:[%s6469_s1 + $0xa8] ss:$12 sps:$4 sm:$0xff]  }
   0xd   :  { %v224_v43 = vcombine.high %v3951_v39, %v3951_v39  ;;  %v3956_v44 = vld.sshfl [vmem:[%s6468_s0] sm:$0x2 pattern:$0x75316420]  ;;  %v4725_v59 = vld [vmem:[%s6469_s1 + $0xb0] ss:$12 sps:$4 sm:$0xff]  }
   0xe   :  { %v72_v38 = vrot.slane %v51_v34, %v5202_v30  ;;  %v86_v42 = vrot.slane %v65_v36, %v5202_v30  ;;  %v216_v46 = vrot.slane %v209_v40, %v5199_v29  ;;  %v3957_v47 = vld.sshfl [vmem:[%s6468_s0 + $0x4] sm:$0x2 pattern:$0x75316420]  ;;  %v383_v48 = vrot.slane %v3956_v44, %v5199_v29 }
   0xf   :  { %956 = vmatpush1.bf16.msra.mxu0 %v4708_v13  ;;  %4329 = vmatpush3.bf16.msra.mxu1 %v4709_v18  ;;  %v231_v50 = vrot.slane %v224_v43, %v5199_v29  ;;  %v398_v51 = vrot.slane %v3957_v47, %v5199_v29  ;;  %v3962_v52 = vld.sshfl [vmem:[%s6468_s0] sm:$0x20 pattern:$0x75316420]  ;;  %v5259_v60 = vld [vmem:[%s6471_s3 + $0x4] ss:$12 sps:$4 sm:$0xff]  }
  0x10   :  { %957 = vmatprep.subr.bf16.mxu0 %v4710_v19  ;;  %4330 = vmatprep.subr.bf16.mxu1 %v5077_v2  ;;  %v79_v45 = vrot.slane %v72_v38, %v5202_v30  ;;  %v93_v49 = vrot.slane %v86_v42, %v5202_v30  ;;  %v238_v55 = vrot.slane %v216_v46, %v5202_v30  ;;  %v3963_v57 = vld.sshfl [vmem:[%s6468_s0 + $0x4] sm:$0x20 pattern:$0x75316420] }
  0x11   :  { %v384_v56 = vcombine.high %v383_v48, %v383_v48  ;;  %v545_v58 = vcombine.high %v3962_v52, %v3962_v52  ;;  %v252_v62 = vrot.slane %v231_v50, %v5202_v30  ;;  %v399_v63 = vcombine.high %v398_v51, %v398_v51 }
  0x12   :  { %v94_v54 = vunpack.c.l.b16 %v79_v45  ;;  %v95_v61 = vunpack.c.l.b16 %v93_v49  ;;  %v561_v0 = vcombine.high %v3963_v57, %v3963_v57  ;;  %v245_v4 = vrot.slane %v238_v55, %v5202_v30 }
  0x13   :  { %958 = vmatpush1.bf16.msra.mxu0 %v4712_v20  ;;  %4331 = vmatpush3.bf16.msra.mxu1 %v4713_v22  ;;  %v406_v5 = vrot.slane %v384_v56, %v5202_v30  ;;  %v552_v6 = vrot.slane %v545_v58, %v5199_v29  ;;  %v259_v8 = vrot.slane %v252_v62, %v5202_v30 }
  0x14   :  { %959 = vmatprep.subr.bf16.mxu0 %v4714_v25  ;;  %4332 = vmatprep.subr.bf16.mxu1 %v5077_v2  ;;  %v178_v1 = vrot.slane %v94_v54, 1  ;;  %v96_v7 = vrot.slane %v95_v61, 7  ;;  %v420_v9 = vrot.slane %v399_v63, %v5202_v30  ;;  %v568_v10 = vrot.slane %v561_v0, %v5199_v29 }
  0x15   :  { %v260_v12 = vunpack.c.l.b16 %v245_v4  ;;  %v413_v13 = vrot.slane %v406_v5, %v5202_v30  ;;  %v553_v14 = vcombine.high %v552_v6, %v552_v6  ;;  %v261_v17 = vunpack.c.l.b16 %v259_v8 }
  0x16   :  { %v179_v11 = vsel %vm97_vm1, %v95_v61, %v178_v1  ;;  %v98_v15 = vsel %vm97_vm1, %v96_v7, %v94_v54  ;;  %v427_v18 = vrot.slane %v420_v9, %v5202_v30  ;;  %v569_v23 = vcombine.high %v568_v10, %v568_v10 }
  0x17   :  { %960 = vmatpush1.bf16.msra.mxu0 %v4716_v26  ;;  %4333 = vmatpush3.bf16.msra.mxu1 %v4717_v27  ;;  %v180_v16 = vpack.c.b16 %v179_v11, %v179_v11  ;;  %v99_v19 = vpack.c.b16 %v98_v15, %v98_v15  ;;  %v346_v20 = vrot.slane %v260_v12, 1  ;;  %v428_v22 = vunpack.c.l.b16 %v413_v13  ;;  %v1127_v13 = vld [vmem:[%s6471_s3 + $0xc] sm:$0xff] }
  0x18   :  { %961 = vmatprep.subr.bf16.mxu0 %v4718_v28  ;;  %4334 = vmatprep.subr.bf16.mxu1 %v5077_v2  ;;  %v262_v25 = vrot.slane %v261_v17, 7  ;;  %v429_v26 = vunpack.c.l.b16 %v427_v18  ;;  %v576_v27 = vrot.slane %v553_v14, %v5202_v30  ;;  %v590_v33 = vrot.slane %v569_v23, %v5202_v30 }
  0x19   :  { %v187_v24 = vrot.slane %v180_v16, %v5199_v29  ;;  %v106_v28 = vrot.slane %v99_v19, %v5199_v29  ;;  %v347_v31 = vsel %vm97_vm1, %v261_v17, %v346_v20  ;;  %v5307_v17 = vld [vmem:[%s6471_s3 + $0x8] ss:$12 sps:$4 sm:$0xff]  }
  0x1a   :  { %v263_v34 = vsel %vm97_vm1, %v262_v25, %v260_v12  ;;  %v430_v36 = vrot.slane %v429_v26, 7  ;;  %v583_v37 = vrot.slane %v576_v27, %v5202_v30  ;;  %v597_v40 = vrot.slane %v590_v33, %v5202_v30  ;;  %v1125_v12 = vld [vmem:[%s6471_s3] sm:$0xff]  ;;  %v5313_v19 = vld [vmem:[%s6471_s3 + $0x1c] ss:$12 sps:$4 sm:$0xff]  }
  0x1b   :  { %962 = vmatpush1.bf16.msra.mxu0 %v4720_v32  ;;  %4335 = vmatpush3.bf16.msra.mxu1 %v4721_v35  ;;  %v514_v32 = vrot.slane %v428_v22, 1  ;;  %3949 = vst.sshfl [vmem:[#allocation3 + $0x1] sm:$0x1 pattern:$0x73625140] %v187_v24  ;;  %v348_v35 = vpack.c.b16 %v347_v31, %v347_v31  ;;  %v264_v38 = vpack.c.b16 %v263_v34, %v263_v34 }
  0x1c   :  { %963 = vmatprep.subr.bf16.mxu0 %v4722_v41  ;;  %4336 = vmatprep.subr.bf16.mxu1 %v5077_v2  ;;  %3946 = vst.sshfl [vmem:[#allocation3] sm:$0x1 pattern:$0x73625140] %v106_v28  ;;  %v431_v42 = vsel %vm97_vm1, %v430_v36, %v428_v22  ;;  %v598_v44 = vunpack.c.l.b16 %v583_v37  ;;  %v599_v47 = vunpack.c.l.b16 %v597_v40  ;;  %v5315_v20 = vcombine.low %v1125_v12, %v1127_v13 }
  0x1d   :  { %v515_v39 = vsel %vm97_vm1, %v429_v26, %v514_v32  ;;  %v355_v41 = vrot.slane %v348_v35, %v5199_v29  ;;  %v271_v45 = vrot.slane %v264_v38, %v5199_v29  ;;  %v432_v46 = vpack.c.b16 %v431_v42, %v431_v42 }
  0x1e   :  { %v516_v43 = vpack.c.b16 %v515_v39, %v515_v39  ;;  %v686_v49 = vrot.slane %v598_v44, 1  ;;  %v600_v51 = vrot.slane %v599_v47, 7 }
  0x1f   :  { %964 = vmatpush1.bf16.msra.mxu0 %v4724_v53  ;;  %4337 = vmatpush3.bf16.msra.mxu1 %v4725_v59  ;;  %3955 = vst.sshfl [vmem:[#allocation3 + $0x3] sm:$0x1 pattern:$0x73625140] %v355_v41  ;;  %v439_v50 = vrot.slane %v432_v46, %v5199_v29 }
  0x20   :  { %1289 = vmatprep.subr.bf16.mxu0 %v5259_v60  ;;  %4342 = vmatprep.subr.bf16.mxu1 %v5077_v2  ;;  %v523_v48 = vrot.slane %v516_v43, %v5199_v29  ;;  %3952 = vst.sshfl [vmem:[#allocation3 + $0x2] sm:$0x1 pattern:$0x73625140] %v271_v45  ;;  %v687_v30 = vsel %vm97_vm1, %v599_v47, %v686_v49 }
  0x21   :  { %3958 = vst.sshfl [vmem:[#allocation3 + $0x4] sm:$0x1 pattern:$0x73625140] %v439_v50  ;;  %v601_v52 = vsel %vm97_vm1, %v600_v51, %v598_v44  ;;  %v688_v53 = vpack.c.b16 %v687_v30, %v687_v30 }
  0x22   :  { %3961 = vst.sshfl [vmem:[#allocation3 + $0x5] sm:$0x1 pattern:$0x73625140] %v523_v48  ;;  %v707_v54 = vld [vmem:[#allocation3 + $0x1] sm:$0x1]  ;;  %v602_v55 = vpack.c.b16 %v601_v52, %v601_v52 }
  0x23   :  { %v706_v56 = vld [vmem:[#allocation3] sm:$0x1]  ;;  %v695_v57 = vrot.slane %v688_v53, %v5199_v29 }
  0x24   :  { %v609_v58 = vrot.slane %v602_v55, %v5199_v29  ;;  %v771_v62 = vcombine.low %v706_v56, %v707_v54 }
  0x25   :  { %3967 = vst.sshfl [vmem:[#allocation3 + $0x7] sm:$0x1 pattern:$0x73625140] %v695_v57 }
  0x26   :  { %v709_v59 = vld [vmem:[#allocation3 + $0x3] sm:$0x1]  ;;  %3964 = vst.sshfl [vmem:[#allocation3 + $0x6] sm:$0x1 pattern:$0x73625140] %v609_v58  ;;  %v781_v5 = vrot.slane %v771_v62, %v5199_v29 }
  0x27   :  { %v708_v61 = vld [vmem:[#allocation3 + $0x2] sm:$0x1] }
  0x28   :  { %v772_v0 = vcombine.low %v708_v61, %v709_v59  ;;  %v710_v1 = vld [vmem:[#allocation3 + $0x4] sm:$0x1] }
  0x29   :  { %v711_v63 = vld [vmem:[#allocation3 + $0x5] sm:$0x1] }
  0x2a   :  { %v773_v4 = vcombine.low %v710_v1, %v711_v63  ;;  %v788_v6 = vrot.slane %v772_v0, %v5199_v29 }
  0x2c   :  { %v713_v7 = vld [vmem:[#allocation3 + $0x7] sm:$0x1]  ;;  %v795_v10 = vrot.slane %v773_v4, %v5199_v29  ;;  %v803_v11 = vcombine.low %v781_v5, %v788_v6 }
  0x2d   :  { %v712_v8 = vld [vmem:[#allocation3 + $0x6] sm:$0x1] }
  0x2e   :  { %v774_v9 = vcombine.low %v712_v8, %v713_v7  ;;  %v811_v16 = vrot.slane %v803_v11, %v5199_v29 }
  0x30   :  { %v802_v14 = vrot.slane %v774_v9, %v5199_v29 }
  0x32   :  { %v804_v15 = vcombine.low %v795_v10, %v802_v14 }
  0x34   :  { %v818_v18 = vrot.slane %v804_v15, %v5199_v29 }
  0x36   :  { %v819_v22 = vcombine.low %v811_v16, %v818_v18 }
  0x38   :  { %982 = vmatmul.mubr.bf16.vlgmr.msra.gmra.mrb[0].mxu0 %v819_v22  ;;  %4339 = vmatmul.mubr.bf16.vlgmr.msra.gmra.mrb[0].mxu1 %v819_v22 }
  0x39   :  { %14 = vsyncpa [#allocation9], 0  ;;  %1290 = vmatpush1.bf16.msra.mxu0 %v5315_v20  ;;  %v5321_v23 = vld [vmem:[%s6471_s3 + $0x18] ss:$12 sps:$4 sm:$0xff]   ;;  %4343 = vmatpush3.bf16.msra.mxu1 %v5307_v17  ;;  %v5327_v24 = vld [vmem:[%s6471_s3 + $0x20] ss:$12 sps:$4 sm:$0xff]  }
  0x3a   :  { %1291 = vmatprep.subr.bf16.mxu0 %v5313_v19  ;;  %v5333_v25 = vld [vmem:[%s6471_s3 + $0x34] ss:$12 sps:$4 sm:$0xff]   ;;  %4344 = vmatprep.subr.bf16.mxu1 %v5077_v2  ;;  %v5343_v26 = vld [vmem:[%s6471_s3 + $0x30] ss:$12 sps:$4 sm:$0xff]   ;;  %v5349_v27 = vld [vmem:[%s6471_s3 + $0x38] ss:$12 sps:$4 sm:$0xff]  }
  0x3b   :  { %1321 = vmatprep.mubr.bf16.mxu0 %v5078_v3  ;;  %4358 = vmatprep.mubr.msk.bf16.mxu1 %vm5079_vm0, %v5077_v2  ;;  %v5355_v28 = vld [vmem:[%s6471_s3 + $0x4c] ss:$12 sps:$4 sm:$0xff]   ;;  %v5362_v31 = vld [vmem:[%s6471_s3 + $0x48] ss:$12 sps:$4 sm:$0xff]   ;;  %v5368_v32 = vld [vmem:[%s6471_s3 + $0x50] ss:$12 sps:$4 sm:$0xff]  }
  0x3c   :  { %v5374_v33 = vld [vmem:[%s6471_s3 + $0x64] ss:$12 sps:$4 sm:$0xff]   ;;  %v5381_v34 = vld [vmem:[%s6471_s3 + $0x60] ss:$12 sps:$4 sm:$0xff]   ;;  %v5387_v35 = vld [vmem:[%s6471_s3 + $0x68] ss:$12 sps:$4 sm:$0xff]  }
  0x3d   :  { %1292 = vmatpush1.bf16.msra.mxu0 %v5321_v23  ;;  %4345 = vmatpush3.bf16.msra.mxu1 %v5327_v24  ;;  %v5393_v36 = vld [vmem:[%s6471_s3 + $0x7c] ss:$12 sps:$4 sm:$0xff]   ;;  %v5400_v37 = vld [vmem:[%s6471_s3 + $0x78] ss:$12 sps:$4 sm:$0xff]   ;;  %v5406_v38 = vld [vmem:[%s6471_s3 + $0x80] ss:$12 sps:$4 sm:$0xff]  }
  0x3e   :  { %1293 = vmatprep.subr.bf16.mxu0 %v5333_v25  ;;  %4346 = vmatprep.subr.bf16.mxu1 %v5077_v2  ;;  %v5412_v39 = vld [vmem:[%s6471_s3 + $0x94] ss:$12 sps:$4 sm:$0xff]   ;;  %v5419_v40 = vld [vmem:[%s6471_s3 + $0x90] ss:$12 sps:$4 sm:$0xff]   ;;  %v5425_v41 = vld [vmem:[%s6471_s3 + $0x98] ss:$12 sps:$4 sm:$0xff]  }
  0x3f   :  { %v5431_v42 = vld [vmem:[%s6471_s3 + $0xac] ss:$12 sps:$4 sm:$0xff]   ;;  %v5438_v43 = vld [vmem:[%s6471_s3 + $0xa8] ss:$12 sps:$4 sm:$0xff]   ;;  %v5440_v44 = vld [vmem:[#allocation2] sm:$0x3] }
  0x40   :  { %v5446_v45 = vld [vmem:[%s6471_s3 + $0xb0] ss:$12 sps:$4 sm:$0xff]   ;;  %v1160_v46 = vpack.c.bf16 %v5440_v44, %v5440_v44  ;;  %v5082_v47 = vmov 1983009808   ;;  %v750_v49 = vsub.s32 0, %v5180_v21  ;;  %v758_v50 = vsub.s32 2, %v5180_v21 }
  0x41   :  { %1294 = vmatpush1.bf16.msra.mxu0 %v5343_v26  ;;  %4347 = vmatpush3.bf16.msra.mxu1 %v5349_v27  ;;  %v1043_v48 = vunpack.c.l.s4 %v5082_v47  ;;  %v746_v51 = vld [vmem:[%s6472_s4] sm:$0x7]  ;;  %v754_v30 = vsub.s32 1, %v5180_v21  ;;  %s5084_s12 = smov [#allocation6]  }
  0x42   :  { %1295 = vmatprep.subr.bf16.mxu0 %v5355_v28  ;;  %4348 = vmatprep.subr.bf16.mxu1 %v5077_v2  ;;  %v751_v53 = vrot.slane %v746_v51, %v750_v49  ;;  %v759_v54 = vrot.slane %v746_v51, %v758_v50  ;;  %s3917_s13 = sshll.u32 %s5084_s12, 4  ;;  %s6437_s13 = int_to_ptr.vmem [resolvable:$true] %s3917_s13 }
  0x43   :  { %v1044_v52 = vunpack.c.0.s8 %v1043_v48  ;;  %v755_v55 = vrot.slane %v746_v51, %v754_v30 }
  0x45   :  { %1296 = vmatpush1.bf16.msra.mxu0 %v5362_v31  ;;  %4349 = vmatpush3.bf16.msra.mxu1 %v5368_v32  ;;  %v5504_v57 = vsub.s32 %v1044_v52, %v5180_v21 }
  0x46   :  { %1297 = vmatprep.subr.bf16.mxu0 %v5374_v33  ;;  %4350 = vmatprep.subr.bf16.mxu1 %v5077_v2 }
  0x49   :  { %1298 = vmatpush1.bf16.msra.mxu0 %v5381_v34  ;;  %4351 = vmatpush3.bf16.msra.mxu1 %v5387_v35 }
  0x4a   :  { %1299 = vmatprep.subr.bf16.mxu0 %v5393_v36  ;;  %4352 = vmatprep.subr.bf16.mxu1 %v5077_v2 }
  0x4d   :  { %1300 = vmatpush1.bf16.msra.mxu0 %v5400_v37  ;;  %4353 = vmatpush3.bf16.msra.mxu1 %v5406_v38 }
  0x4e   :  { %1301 = vmatprep.subr.bf16.mxu0 %v5412_v39  ;;  %4354 = vmatprep.subr.bf16.mxu1 %v5077_v2 }
  0x51   :  { %1302 = vmatpush1.bf16.msra.mxu0 %v5419_v40  ;;  %4355 = vmatpush3.bf16.msra.mxu1 %v5425_v41 }
  0x52   :  { %1303 = vmatprep.subr.bf16.mxu0 %v5431_v42  ;;  %4356 = vmatprep.subr.bf16.mxu1 %v5077_v2 }
  0x55   :  { %1304 = vmatpush1.bf16.msra.mxu0 %v5438_v43  ;;  %4357 = vmatpush3.bf16.msra.mxu1 %v5446_v45 }
  0x56   :  { %1407 = vmatprep.subr.bf16.mxu0 %v5259_v60  ;;  %4362 = vmatprep.subr.bf16.mxu1 %v5077_v2 }
  0x58   :  { %1322 = vmatmul.mubr.bf16.vlgmr.msra.gmra.mrb[4].mxu0 %v1160_v46  ;;  %4359 = vmatmul.mubr.bf16.vlgmr.msra.gmra.mrb[4].mxu1 %v1160_v46 }
  0x59   :  { %1408 = vmatpush1.bf16.msra.mxu0 %v5315_v20  ;;  %4363 = vmatpush3.bf16.msra.mxu1 %v5307_v17 }
  0x5a   :  { %1409 = vmatprep.subr.bf16.mxu0 %v5313_v19  ;;  %4364 = vmatprep.subr.bf16.mxu1 %v5077_v2 }
  0x5b   :  { %1439 = vmatprep.mubr.bf16.mxu0 %v5078_v3  ;;  %4378 = vmatprep.mubr.msk.bf16.mxu1 %vm5079_vm0, %v5077_v2 }
  0x5d   :  { %1410 = vmatpush1.bf16.msra.mxu0 %v5321_v23  ;;  %4365 = vmatpush3.bf16.msra.mxu1 %v5327_v24 }
  0x5e   :  { %1411 = vmatprep.subr.bf16.mxu0 %v5333_v25  ;;  %4366 = vmatprep.subr.bf16.mxu1 %v5077_v2 }
  0x61   :  { %1412 = vmatpush1.bf16.msra.mxu0 %v5343_v26  ;;  %4367 = vmatpush3.bf16.msra.mxu1 %v5349_v27 }
  0x62   :  { %1413 = vmatprep.subr.bf16.mxu0 %v5355_v28  ;;  %4368 = vmatprep.subr.bf16.mxu1 %v5077_v2 }
  0x65   :  { %1414 = vmatpush1.bf16.msra.mxu0 %v5362_v31  ;;  %4369 = vmatpush3.bf16.msra.mxu1 %v5368_v32 }
  0x66   :  { %1415 = vmatprep.subr.bf16.mxu0 %v5374_v33  ;;  %4370 = vmatprep.subr.bf16.mxu1 %v5077_v2 }
  0x69   :  { %1416 = vmatpush1.bf16.msra.mxu0 %v5381_v34  ;;  %4371 = vmatpush3.bf16.msra.mxu1 %v5387_v35 }
  0x6a   :  { %1417 = vmatprep.subr.bf16.mxu0 %v5393_v36  ;;  %4372 = vmatprep.subr.bf16.mxu1 %v5077_v2 }
  0x6d   :  { %1418 = vmatpush1.bf16.msra.mxu0 %v5400_v37  ;;  %4373 = vmatpush3.bf16.msra.mxu1 %v5406_v38 }
  0x6e   :  { %1419 = vmatprep.subr.bf16.mxu0 %v5412_v39  ;;  %4374 = vmatprep.subr.bf16.mxu1 %v5077_v2 }
  0x71   :  { %1420 = vmatpush1.bf16.msra.mxu0 %v5419_v40  ;;  %4375 = vmatpush3.bf16.msra.mxu1 %v5425_v41 }
  0x72   :  { %1421 = vmatprep.subr.bf16.mxu0 %v5431_v42  ;;  %4376 = vmatprep.subr.bf16.mxu1 %v5077_v2 }
  0x75   :  { %1422 = vmatpush1.bf16.msra.mxu0 %v5438_v43  ;;  %4377 = vmatpush3.bf16.msra.mxu1 %v5446_v45 }
  0x76   :  { %1520 = vmatprep.subr.bf16.mxu0 %v5259_v60  ;;  %4382 = vmatprep.subr.bf16.mxu1 %v5077_v2 }
 0x10b   :  { %v983_v56 = vpop.f32.mrb[0].mxu0  ;;  %v1026_v58 = vpop.f32.mrb[0].mxu1 }
 0x10c   :  { %v984_v59 = vadd.f32 %v983_v56, %v751_v53  ;;  %v985_v61 = vpop.f32.mrb[1].mxu0  ;;  %v1027_v62 = vadd.f32 %v1026_v58, %v759_v54  ;;  %v4340_v63 = vpop.f32.mrb[1].mxu1 }
 0x10d   :  { %v986_v0 = vadd.f32 %v985_v61, %v755_v55  ;;  %v987_v1 = vpop.f32.mrb[2].mxu0  ;;  %v1029_v4 = vpop.f32.mrb[2].mxu1 }
 0x10e   :  { %v1041_v5 = vcombine.high %v1027_v62, %v1027_v62  ;;  %v988_v6 = vadd.f32 %v987_v1, %v751_v53  ;;  %v989_v7 = vpop.f32.mrb[3].mxu0  ;;  %v1030_v8 = vadd.f32 %v1029_v4, %v759_v54  ;;  %v4341_v9 = vpop.f32.mrb[3].mxu1  ;;  %v1062_v12 = vrot.slane %v1027_v62, %v5504_v57 }
 0x10f   :  { %v1039_v10 = vcombine.low %v984_v59, %v986_v0  ;;  %v1040_v11 = vcombine.high %v984_v59, %v986_v0  ;;  %v990_v13 = vadd.f32 %v989_v7, %v755_v55 }
 0x110   :  { %v1069_v14 = vrot.slane %v1041_v5, %v5504_v57  ;;  %v1076_v15 = vcombine.high %v1030_v8, %v1030_v8  ;;  %v1097_v47 = vrot.slane %v1030_v8, %v5504_v57 }
 0x111   :  { %v1048_v16 = vrot.slane %v1039_v10, %v5504_v57  ;;  %v1055_v18 = vrot.slane %v1040_v11, %v5504_v57  ;;  %v1074_v22 = vcombine.low %v988_v6, %v990_v13  ;;  %v1075_v46 = vcombine.high %v988_v6, %v990_v13 }
 0x112   :  { %v1104_v48 = vrot.slane %v1076_v15, %v5504_v57 }
 0x113   :  { %v1070_v51 = vcombine.low %v1048_v16, %v1062_v12  ;;  %v1071_v52 = vcombine.high %v1048_v16, %v1062_v12  ;;  %v1072_v53 = vcombine.low %v1055_v18, %v1069_v14  ;;  %v1073_v54 = vcombine.high %v1055_v18, %v1069_v14 }
 0x114   :  { %v1083_v56 = vrot.slane %v1074_v22, %v5504_v57  ;;  %v1090_v55 = vrot.slane %v1075_v46, %v5504_v57  ;;  %v5517_v22 = vld [vmem:[%s6473_s5] ss:$0 sm:$0xff] }
 0x115   :  { %1117 = vst [vmem:[#allocation4] sm:$0x3f] %v1070_v51  ;;  %1118 = vst [vmem:[#allocation4 + $0x6] sm:$0x3f] %v1071_v52 }
 0x116   :  { %1119 = vst [vmem:[#allocation4 + $0xc] sm:$0x3f] %v1072_v53  ;;  %1120 = vst [vmem:[#allocation4 + $0x12] sm:$0x3f] %v1073_v54  ;;  %v1105_v58 = vcombine.low %v1083_v56, %v1097_v47  ;;  %v1106_v59 = vcombine.high %v1083_v56, %v1097_v47  ;;  %v1107_v61 = vcombine.low %v1090_v55, %v1104_v48 }
 0x117   :  { %v1108_v62 = vcombine.high %v1090_v55, %v1104_v48 }
 0x118   :  { %1121 = vst [vmem:[#allocation4 + $0x18] sm:$0x3f] %v1105_v58  ;;  %1122 = vst [vmem:[#allocation4 + $0x1e] sm:$0x3f] %v1106_v59 }
 0x119   :  { %1123 = vst [vmem:[#allocation4 + $0x24] sm:$0x3f] %v1107_v61  ;;  %1124 = vst [vmem:[#allocation4 + $0x2a] sm:$0x3f] %v1108_v62 }
 0x11c   :  { %v1159_v63 = vld [vmem:[#allocation4] sm:$0x3f] }
 0x11d   :  { %v1378_v7 = vrot.slane %v1159_v63, 2  ;;  %v1395_v52 = vrot.slane %v1159_v63, 4 }
 0x12b   :  { %v1323_v0 = vpop.f32.mrb[4].mxu0  ;;  %v1364_v1 = vpop.f32.mrb[4].mxu1 }
 0x12c   :  { %v1370_v4 = vadd.f32 %v1323_v0, %v1159_v63  ;;  %v1325_v5 = vpop.f32.mrb[5].mxu0  ;;  %v4360_v6 = vpop.f32.mrb[5].mxu1  ;;  %v1393_v47 = vadd.f32 %v5517_v22, %v1364_v1 }
 0x12d   :  { %v1327_v8 = vpop.f32.mrb[6].mxu0  ;;  %v1367_v9 = vpop.f32.mrb[6].mxu1  ;;  %v1380_v13 = vadd.f32 %v1378_v7, %v1325_v5 }
 0x12e   :  { %v4016_v10 = vmul.f32 -1.442695, %v1370_v4  ;;  %v1328_v11 = vpop.f32.mrb[7].mxu0  ;;  %v4361_v12 = vpop.f32.mrb[7].mxu1 }
 0x12f   :  { %v4017_v14 = vmul.f32 -1.442695, %v1380_v13 }
 0x130   :  { %4821 = vpow2.f32 %v4016_v10 }
 0x131   :  { %4823 = vpow2.f32 %v4017_v14 }
 0x13a   :  { %v4822_v15 = vpop.eup %4821 }
 0x13b   :  { %v1374_v16 = vadd.f32 1.0, %v4822_v15  ;;  %v4824_v18 = vpop.eup %4823 }
 0x13c   :  { %v1384_v46 = vadd.f32 1.0, %v4824_v18 }
 0x13d   :  { %4825 = vrcp.f32 %v1374_v16 }
 0x13e   :  { %4827 = vrcp.f32 %v1384_v46 }
 0x147   :  { %v4826_v48 = vpop.eup %4825 }
 0x148   :  { %v1394_v51 = vmul.f32 %v4826_v48, %v1393_v47  ;;  %v4828_v54 = vpop.eup %4827 }
 0x149   :  { %v1399_v56 = vsub.f32 1.0, %v4828_v54  ;;  %v1401_v59 = vmul.f32 %v4828_v54, %v5440_v44  ;;  %v1405_v44 = vld [vmem:[#allocation4 + $0x6] sm:$0x3f] }
 0x14a   :  { %v1397_v53 = vadd.f32 %v1395_v52, %v1394_v51  ;;  %v1496_v6 = vrot.slane %v1405_v44, 2  ;;  %v1507_v51 = vrot.slane %v1405_v44, 4 }
 0x14c   :  { %4829 = vtanh.f32 %v1397_v53 }
 0x156   :  { %v4830_v55 = vpop.eup %4829 }
 0x157   :  { %v1400_v58 = vmul.f32 %v4830_v55, %v1399_v56 }
 0x159   :  { %v5521_v61 = vadd.f32 %v1401_v59, %v1400_v58 }
 0x15b   :  { %1403 = vst [vmem:[#allocation5] sm:$0x3] %v5521_v61  ;;  %v1406_v62 = vpack.c.bf16 %v5521_v61, %v5521_v61 }
 0x15d   :  { %1440 = vmatmul.mubr.bf16.vlgmr.msra.gmra.mrb[8].mxu0 %v1406_v62  ;;  %4379 = vmatmul.mubr.bf16.vlgmr.msra.gmra.mrb[8].mxu1 %v1406_v62 }
 0x15e   :  { %1521 = vmatpush1.bf16.msra.mxu0 %v5315_v20  ;;  %4383 = vmatpush3.bf16.msra.mxu1 %v5307_v17 }
 0x15f   :  { %1522 = vmatprep.subr.bf16.mxu0 %v5313_v19  ;;  %4384 = vmatprep.subr.bf16.mxu1 %v5077_v2 }
 0x160   :  { %1552 = vmatprep.mubr.bf16.mxu0 %v5078_v3  ;;  %4398 = vmatprep.mubr.msk.bf16.mxu1 %vm5079_vm0, %v5077_v2 }
 0x162   :  { %1523 = vmatpush1.bf16.msra.mxu0 %v5321_v23  ;;  %4385 = vmatpush3.bf16.msra.mxu1 %v5327_v24 }
 0x163   :  { %1524 = vmatprep.subr.bf16.mxu0 %v5333_v25  ;;  %4386 = vmatprep.subr.bf16.mxu1 %v5077_v2 }
 0x166   :  { %1525 = vmatpush1.bf16.msra.mxu0 %v5343_v26  ;;  %4387 = vmatpush3.bf16.msra.mxu1 %v5349_v27 }
 0x167   :  { %1526 = vmatprep.subr.bf16.mxu0 %v5355_v28  ;;  %4388 = vmatprep.subr.bf16.mxu1 %v5077_v2 }
 0x16a   :  { %1527 = vmatpush1.bf16.msra.mxu0 %v5362_v31  ;;  %4389 = vmatpush3.bf16.msra.mxu1 %v5368_v32 }
 0x16b   :  { %1528 = vmatprep.subr.bf16.mxu0 %v5374_v33  ;;  %4390 = vmatprep.subr.bf16.mxu1 %v5077_v2 }
 0x16e   :  { %1529 = vmatpush1.bf16.msra.mxu0 %v5381_v34  ;;  %4391 = vmatpush3.bf16.msra.mxu1 %v5387_v35 }
 0x16f   :  { %1530 = vmatprep.subr.bf16.mxu0 %v5393_v36  ;;  %4392 = vmatprep.subr.bf16.mxu1 %v5077_v2 }
 0x172   :  { %1531 = vmatpush1.bf16.msra.mxu0 %v5400_v37  ;;  %4393 = vmatpush3.bf16.msra.mxu1 %v5406_v38 }
 0x173   :  { %1532 = vmatprep.subr.bf16.mxu0 %v5412_v39  ;;  %4394 = vmatprep.subr.bf16.mxu1 %v5077_v2 }
 0x176   :  { %1533 = vmatpush1.bf16.msra.mxu0 %v5419_v40  ;;  %4395 = vmatpush3.bf16.msra.mxu1 %v5425_v41 }
 0x177   :  { %1534 = vmatprep.subr.bf16.mxu0 %v5431_v42  ;;  %4396 = vmatprep.subr.bf16.mxu1 %v5077_v2 }
 0x17a   :  { %1535 = vmatpush1.bf16.msra.mxu0 %v5438_v43  ;;  %4397 = vmatpush3.bf16.msra.mxu1 %v5446_v45 }
 0x17b   :  { %1633 = vmatprep.subr.bf16.mxu0 %v5259_v60  ;;  %4402 = vmatprep.subr.bf16.mxu1 %v5077_v2 }
 0x230   :  { %v1441_v63 = vpop.f32.mrb[8].mxu0  ;;  %v1482_v0 = vpop.f32.mrb[8].mxu1 }
 0x231   :  { %v1488_v1 = vadd.f32 %v1441_v63, %v1405_v44  ;;  %v1443_v4 = vpop.f32.mrb[9].mxu0  ;;  %v4380_v5 = vpop.f32.mrb[9].mxu1  ;;  %v1505_v46 = vadd.f32 %v5517_v22, %v1482_v0 }
 0x232   :  { %v1445_v7 = vpop.f32.mrb[10].mxu0  ;;  %v1485_v8 = vpop.f32.mrb[10].mxu1  ;;  %v1498_v12 = vadd.f32 %v1496_v6, %v1443_v4 }
 0x233   :  { %v4019_v9 = vmul.f32 -1.442695, %v1488_v1  ;;  %v1446_v10 = vpop.f32.mrb[11].mxu0  ;;  %v4381_v11 = vpop.f32.mrb[11].mxu1 }
 0x234   :  { %v4020_v13 = vmul.f32 -1.442695, %v1498_v12 }
 0x235   :  { %4831 = vpow2.f32 %v4019_v9 }
 0x236   :  { %4833 = vpow2.f32 %v4020_v13 }
 0x23f   :  { %v4832_v14 = vpop.eup %4831 }
 0x240   :  { %v1492_v15 = vadd.f32 1.0, %v4832_v14  ;;  %v4834_v16 = vpop.eup %4833 }
 0x241   :  { %v1502_v18 = vadd.f32 1.0, %v4834_v16 }
 0x242   :  { %4835 = vrcp.f32 %v1492_v15 }
 0x243   :  { %4837 = vrcp.f32 %v1502_v18 }
 0x24c   :  { %v4836_v47 = vpop.eup %4835 }
 0x24d   :  { %v1506_v48 = vmul.f32 %v4836_v47, %v1505_v46  ;;  %v4838_v53 = vpop.eup %4837 }
 0x24e   :  { %v1511_v54 = vsub.f32 1.0, %v4838_v53  ;;  %v1513_v58 = vmul.f32 %v4838_v53, %v5521_v61  ;;  %v1518_v61 = vld [vmem:[#allocation4 + $0xc] sm:$0x3f] }
 0x24f   :  { %v1509_v52 = vadd.f32 %v1507_v51, %v1506_v48  ;;  %v1609_v5 = vrot.slane %v1518_v61, 2  ;;  %v1620_v47 = vrot.slane %v1518_v61, 4 }
 0x251   :  { %4839 = vtanh.f32 %v1509_v52 }
 0x25b   :  { %v4840_v56 = vpop.eup %4839 }
 0x25c   :  { %v1512_v55 = vmul.f32 %v4840_v56, %v1511_v54 }
 0x25e   :  { %v5563_v59 = vadd.f32 %v1513_v58, %v1512_v55 }
 0x260   :  { %1516 = vst [vmem:[#allocation5 + $0x2] sm:$0x3] %v5563_v59  ;;  %v1519_v62 = vpack.c.bf16 %v5563_v59, %v5563_v59 }
 0x262   :  { %1553 = vmatmul.mubr.bf16.vlgmr.msra.gmra.mrb[12].mxu0 %v1519_v62  ;;  %4399 = vmatmul.mubr.bf16.vlgmr.msra.gmra.mrb[12].mxu1 %v1519_v62  ;;  %v1631_v62 = vld [vmem:[#allocation4 + $0x12] sm:$0x3f] }
 0x263   :  { %1634 = vmatpush1.bf16.msra.mxu0 %v5315_v20  ;;  %4403 = vmatpush3.bf16.msra.mxu1 %v5307_v17 }
 0x264   :  { %1635 = vmatprep.subr.bf16.mxu0 %v5313_v19  ;;  %4404 = vmatprep.subr.bf16.mxu1 %v5077_v2 }
 0x265   :  { %1665 = vmatprep.mubr.bf16.mxu0 %v5078_v3  ;;  %4418 = vmatprep.mubr.msk.bf16.mxu1 %vm5079_vm0, %v5077_v2 }
 0x267   :  { %1636 = vmatpush1.bf16.msra.mxu0 %v5321_v23  ;;  %4405 = vmatpush3.bf16.msra.mxu1 %v5327_v24 }
 0x268   :  { %1637 = vmatprep.subr.bf16.mxu0 %v5333_v25  ;;  %4406 = vmatprep.subr.bf16.mxu1 %v5077_v2 }
 0x26b   :  { %1638 = vmatpush1.bf16.msra.mxu0 %v5343_v26  ;;  %4407 = vmatpush3.bf16.msra.mxu1 %v5349_v27 }
 0x26c   :  { %1639 = vmatprep.subr.bf16.mxu0 %v5355_v28  ;;  %4408 = vmatprep.subr.bf16.mxu1 %v5077_v2 }
 0x26f   :  { %1640 = vmatpush1.bf16.msra.mxu0 %v5362_v31  ;;  %4409 = vmatpush3.bf16.msra.mxu1 %v5368_v32 }
 0x270   :  { %1641 = vmatprep.subr.bf16.mxu0 %v5374_v33  ;;  %4410 = vmatprep.subr.bf16.mxu1 %v5077_v2 }
 0x273   :  { %1642 = vmatpush1.bf16.msra.mxu0 %v5381_v34  ;;  %4411 = vmatpush3.bf16.msra.mxu1 %v5387_v35 }
 0x274   :  { %1643 = vmatprep.subr.bf16.mxu0 %v5393_v36  ;;  %4412 = vmatprep.subr.bf16.mxu1 %v5077_v2 }
 0x277   :  { %1644 = vmatpush1.bf16.msra.mxu0 %v5400_v37  ;;  %4413 = vmatpush3.bf16.msra.mxu1 %v5406_v38 }
 0x278   :  { %1645 = vmatprep.subr.bf16.mxu0 %v5412_v39  ;;  %4414 = vmatprep.subr.bf16.mxu1 %v5077_v2 }
 0x27b   :  { %1646 = vmatpush1.bf16.msra.mxu0 %v5419_v40  ;;  %4415 = vmatpush3.bf16.msra.mxu1 %v5425_v41 }
 0x27c   :  { %1647 = vmatprep.subr.bf16.mxu0 %v5431_v42  ;;  %4416 = vmatprep.subr.bf16.mxu1 %v5077_v2 }
 0x27f   :  { %1648 = vmatpush1.bf16.msra.mxu0 %v5438_v43  ;;  %4417 = vmatpush3.bf16.msra.mxu1 %v5446_v45 }
 0x280   :  { %1746 = vmatprep.subr.bf16.mxu0 %v5259_v60  ;;  %4422 = vmatprep.subr.bf16.mxu1 %v5077_v2 }
 0x335   :  { %v1554_v44 = vpop.f32.mrb[12].mxu0  ;;  %v1595_v63 = vpop.f32.mrb[12].mxu1 }
 0x336   :  { %v1601_v0 = vadd.f32 %v1554_v44, %v1518_v61  ;;  %v1556_v1 = vpop.f32.mrb[13].mxu0  ;;  %v4400_v4 = vpop.f32.mrb[13].mxu1  ;;  %v1618_v16 = vadd.f32 %v5517_v22, %v1595_v63 }
 0x337   :  { %v1558_v6 = vpop.f32.mrb[14].mxu0  ;;  %v1598_v7 = vpop.f32.mrb[14].mxu1  ;;  %v1611_v11 = vadd.f32 %v1609_v5, %v1556_v1  ;;  %v1722_v4 = vrot.slane %v1631_v62, 2 }
 0x338   :  { %v4021_v8 = vmul.f32 -1.442695, %v1601_v0  ;;  %v1559_v9 = vpop.f32.mrb[15].mxu0  ;;  %v4401_v10 = vpop.f32.mrb[15].mxu1 }
 0x339   :  { %v4022_v12 = vmul.f32 -1.442695, %v1611_v11 }
 0x33a   :  { %4841 = vpow2.f32 %v4021_v8 }
 0x33b   :  { %4843 = vpow2.f32 %v4022_v12 }
 0x344   :  { %v4842_v13 = vpop.eup %4841 }
 0x345   :  { %v1605_v60 = vadd.f32 1.0, %v4842_v13  ;;  %v4844_v14 = vpop.eup %4843 }
 0x346   :  { %v1615_v15 = vadd.f32 1.0, %v4844_v14 }
 0x347   :  { %4845 = vrcp.f32 %v1605_v60 }
 0x348   :  { %4847 = vrcp.f32 %v1615_v15 }
 0x351   :  { %v4846_v18 = vpop.eup %4845 }
 0x352   :  { %v1619_v46 = vmul.f32 %v4846_v18, %v1618_v16  ;;  %v4848_v51 = vpop.eup %4847 }
 0x353   :  { %v1624_v52 = vsub.f32 1.0, %v4848_v51  ;;  %v1626_v56 = vmul.f32 %v4848_v51, %v5563_v59  ;;  %v5646_v59 = vld [vmem:[%s6471_s3 + $0x4] ss:$12 sps:$4 sm:$0xff]  }
 0x354   :  { %v1622_v48 = vadd.f32 %v1620_v47, %v1619_v46  ;;  %v1733_v46 = vrot.slane %v1631_v62, 4 }
 0x356   :  { %4849 = vtanh.f32 %v1622_v48 }
 0x360   :  { %v4850_v53 = vpop.eup %4849 }
 0x361   :  { %v1625_v54 = vmul.f32 %v4850_v53, %v1624_v52 }
 0x363   :  { %v5605_v55 = vadd.f32 %v1626_v56, %v1625_v54 }
 0x365   :  { %1629 = vst [vmem:[#allocation5 + $0x4] sm:$0x3] %v5605_v55  ;;  %v1632_v58 = vpack.c.bf16 %v5605_v55, %v5605_v55 }
 0x367   :  { %1666 = vmatmul.mubr.bf16.vlgmr.msra.gmra.mrb[16].mxu0 %v1632_v58  ;;  %4419 = vmatmul.mubr.bf16.vlgmr.msra.gmra.mrb[16].mxu1 %v1632_v58 }
 0x368   :  { %1747 = vmatpush1.bf16.msra.mxu0 %v5315_v20  ;;  %4423 = vmatpush3.bf16.msra.mxu1 %v5307_v17 }
 0x369   :  { %1748 = vmatprep.subr.bf16.mxu0 %v5313_v19  ;;  %4424 = vmatprep.subr.bf16.mxu1 %v5077_v2 }
 0x36a   :  { %1778 = vmatprep.mubr.bf16.mxu0 %v5078_v3  ;;  %4438 = vmatprep.mubr.msk.bf16.mxu1 %vm5079_vm0, %v5077_v2 }
 0x36c   :  { %1749 = vmatpush1.bf16.msra.mxu0 %v5321_v23  ;;  %4425 = vmatpush3.bf16.msra.mxu1 %v5327_v24 }
 0x36d   :  { %1750 = vmatprep.subr.bf16.mxu0 %v5333_v25  ;;  %4426 = vmatprep.subr.bf16.mxu1 %v5077_v2 }
 0x370   :  { %1751 = vmatpush1.bf16.msra.mxu0 %v5343_v26  ;;  %4427 = vmatpush3.bf16.msra.mxu1 %v5349_v27 }
 0x371   :  { %1752 = vmatprep.subr.bf16.mxu0 %v5355_v28  ;;  %4428 = vmatprep.subr.bf16.mxu1 %v5077_v2 }
 0x374   :  { %1753 = vmatpush1.bf16.msra.mxu0 %v5362_v31  ;;  %4429 = vmatpush3.bf16.msra.mxu1 %v5368_v32 }
 0x375   :  { %1754 = vmatprep.subr.bf16.mxu0 %v5374_v33  ;;  %4430 = vmatprep.subr.bf16.mxu1 %v5077_v2 }
 0x378   :  { %1755 = vmatpush1.bf16.msra.mxu0 %v5381_v34  ;;  %4431 = vmatpush3.bf16.msra.mxu1 %v5387_v35 }
 0x379   :  { %1756 = vmatprep.subr.bf16.mxu0 %v5393_v36  ;;  %4432 = vmatprep.subr.bf16.mxu1 %v5077_v2 }
 0x37c   :  { %1757 = vmatpush1.bf16.msra.mxu0 %v5400_v37  ;;  %4433 = vmatpush3.bf16.msra.mxu1 %v5406_v38 }
 0x37d   :  { %1758 = vmatprep.subr.bf16.mxu0 %v5412_v39  ;;  %4434 = vmatprep.subr.bf16.mxu1 %v5077_v2 }
 0x380   :  { %1759 = vmatpush1.bf16.msra.mxu0 %v5419_v40  ;;  %4435 = vmatpush3.bf16.msra.mxu1 %v5425_v41 }
 0x381   :  { %1760 = vmatprep.subr.bf16.mxu0 %v5431_v42  ;;  %4436 = vmatprep.subr.bf16.mxu1 %v5077_v2 }
 0x384   :  { %1761 = vmatpush1.bf16.msra.mxu0 %v5438_v43  ;;  %4437 = vmatpush3.bf16.msra.mxu1 %v5446_v45 }
 0x385   :  { %1859 = vmatprep.subr.bf16.mxu0 %v5646_v59  ;;  %4442 = vmatprep.subr.bf16.mxu1 %v5077_v2 }
 0x43a   :  { %v1667_v61 = vpop.f32.mrb[16].mxu0  ;;  %v1708_v44 = vpop.f32.mrb[16].mxu1 }
 0x43b   :  { %v1714_v63 = vadd.f32 %v1667_v61, %v1631_v62  ;;  %v1669_v0 = vpop.f32.mrb[17].mxu0  ;;  %v4420_v1 = vpop.f32.mrb[17].mxu1  ;;  %v1731_v15 = vadd.f32 %v5517_v22, %v1708_v44 }
 0x43c   :  { %v1671_v5 = vpop.f32.mrb[18].mxu0  ;;  %v1711_v6 = vpop.f32.mrb[18].mxu1  ;;  %v1724_v10 = vadd.f32 %v1722_v4, %v1669_v0 }
 0x43d   :  { %v4023_v7 = vmul.f32 -1.442695, %v1714_v63  ;;  %v1672_v8 = vpop.f32.mrb[19].mxu0  ;;  %v4421_v9 = vpop.f32.mrb[19].mxu1 }
 0x43e   :  { %v4024_v11 = vmul.f32 -1.442695, %v1724_v10 }
 0x43f   :  { %4851 = vpow2.f32 %v4023_v7 }
 0x440   :  { %4853 = vpow2.f32 %v4024_v11 }
 0x449   :  { %v4852_v12 = vpop.eup %4851 }
 0x44a   :  { %v1718_v13 = vadd.f32 1.0, %v4852_v12  ;;  %v4854_v60 = vpop.eup %4853 }
 0x44b   :  { %v1728_v14 = vadd.f32 1.0, %v4854_v60 }
 0x44c   :  { %4855 = vrcp.f32 %v1718_v13 }
 0x44d   :  { %4857 = vrcp.f32 %v1728_v14 }
 0x456   :  { %v4856_v16 = vpop.eup %4855 }
 0x457   :  { %v1732_v18 = vmul.f32 %v4856_v16, %v1731_v15  ;;  %v4858_v48 = vpop.eup %4857 }
 0x458   :  { %v1737_v51 = vsub.f32 1.0, %v4858_v48  ;;  %v1739_v54 = vmul.f32 %v4858_v48, %v5605_v55  ;;  %v1744_v55 = vld [vmem:[#allocation4 + $0x18] sm:$0x3f] }
 0x459   :  { %v1735_v47 = vadd.f32 %v1733_v46, %v1732_v18  ;;  %v1835_v1 = vrot.slane %v1744_v55, 2  ;;  %v1846_v18 = vrot.slane %v1744_v55, 4 }
 0x45b   :  { %4859 = vtanh.f32 %v1735_v47 }
 0x465   :  { %v4860_v52 = vpop.eup %4859 }
 0x466   :  { %v1738_v53 = vmul.f32 %v4860_v52, %v1737_v51 }
 0x468   :  { %v5652_v56 = vadd.f32 %v1739_v54, %v1738_v53 }
 0x46a   :  { %1742 = vst [vmem:[#allocation5 + $0x6] sm:$0x3] %v5652_v56  ;;  %v1745_v58 = vpack.c.bf16 %v5652_v56, %v5652_v56 }
 0x46c   :  { %1779 = vmatmul.mubr.bf16.vlgmr.msra.gmra.mrb[20].mxu0 %v1745_v58  ;;  %4439 = vmatmul.mubr.bf16.vlgmr.msra.gmra.mrb[20].mxu1 %v1745_v58 }
 0x46d   :  { %1860 = vmatpush1.bf16.msra.mxu0 %v5315_v20  ;;  %4443 = vmatpush3.bf16.msra.mxu1 %v5307_v17 }
 0x46e   :  { %1861 = vmatprep.subr.bf16.mxu0 %v5313_v19  ;;  %4444 = vmatprep.subr.bf16.mxu1 %v5077_v2 }
 0x46f   :  { %1891 = vmatprep.mubr.bf16.mxu0 %v5078_v3  ;;  %4458 = vmatprep.mubr.msk.bf16.mxu1 %vm5079_vm0, %v5077_v2 }
 0x471   :  { %1862 = vmatpush1.bf16.msra.mxu0 %v5321_v23  ;;  %4445 = vmatpush3.bf16.msra.mxu1 %v5327_v24 }
 0x472   :  { %1863 = vmatprep.subr.bf16.mxu0 %v5333_v25  ;;  %4446 = vmatprep.subr.bf16.mxu1 %v5077_v2 }
 0x475   :  { %1864 = vmatpush1.bf16.msra.mxu0 %v5343_v26  ;;  %4447 = vmatpush3.bf16.msra.mxu1 %v5349_v27 }
 0x476   :  { %1865 = vmatprep.subr.bf16.mxu0 %v5355_v28  ;;  %4448 = vmatprep.subr.bf16.mxu1 %v5077_v2 }
 0x479   :  { %1866 = vmatpush1.bf16.msra.mxu0 %v5362_v31  ;;  %4449 = vmatpush3.bf16.msra.mxu1 %v5368_v32 }
 0x47a   :  { %1867 = vmatprep.subr.bf16.mxu0 %v5374_v33  ;;  %4450 = vmatprep.subr.bf16.mxu1 %v5077_v2 }
 0x47d   :  { %1868 = vmatpush1.bf16.msra.mxu0 %v5381_v34  ;;  %4451 = vmatpush3.bf16.msra.mxu1 %v5387_v35 }
 0x47e   :  { %1869 = vmatprep.subr.bf16.mxu0 %v5393_v36  ;;  %4452 = vmatprep.subr.bf16.mxu1 %v5077_v2 }
 0x481   :  { %1870 = vmatpush1.bf16.msra.mxu0 %v5400_v37  ;;  %4453 = vmatpush3.bf16.msra.mxu1 %v5406_v38 }
 0x482   :  { %1871 = vmatprep.subr.bf16.mxu0 %v5412_v39  ;;  %4454 = vmatprep.subr.bf16.mxu1 %v5077_v2 }
 0x485   :  { %1872 = vmatpush1.bf16.msra.mxu0 %v5419_v40  ;;  %4455 = vmatpush3.bf16.msra.mxu1 %v5425_v41 }
 0x486   :  { %1873 = vmatprep.subr.bf16.mxu0 %v5431_v42  ;;  %4456 = vmatprep.subr.bf16.mxu1 %v5077_v2 }
 0x489   :  { %1874 = vmatpush1.bf16.msra.mxu0 %v5438_v43  ;;  %4457 = vmatpush3.bf16.msra.mxu1 %v5446_v45 }
 0x48a   :  { %1972 = vmatprep.subr.bf16.mxu0 %v5646_v59  ;;  %4462 = vmatprep.subr.bf16.mxu1 %v5077_v2 }
 0x53f   :  { %v1780_v62 = vpop.f32.mrb[20].mxu0  ;;  %v1821_v61 = vpop.f32.mrb[20].mxu1 }
 0x540   :  { %v1827_v44 = vadd.f32 %v1780_v62, %v1744_v55  ;;  %v1782_v63 = vpop.f32.mrb[21].mxu0  ;;  %v4440_v0 = vpop.f32.mrb[21].mxu1  ;;  %v1844_v14 = vadd.f32 %v5517_v22, %v1821_v61 }
 0x541   :  { %v1784_v4 = vpop.f32.mrb[22].mxu0  ;;  %v1824_v5 = vpop.f32.mrb[22].mxu1  ;;  %v1837_v9 = vadd.f32 %v1835_v1, %v1782_v63  ;;  %v4982_v1 = vld [vmem:[%s6471_s3 + $0x8] ss:$12 sps:$4 sm:$0xff]  }
 0x542   :  { %v4025_v6 = vmul.f32 -1.442695, %v1827_v44  ;;  %v1785_v7 = vpop.f32.mrb[23].mxu0  ;;  %v4441_v8 = vpop.f32.mrb[23].mxu1  ;;  %v4983_v4 = vld [vmem:[%s6471_s3 + $0x1c] ss:$12 sps:$4 sm:$0xff]  }
 0x543   :  { %v4026_v10 = vmul.f32 -1.442695, %v1837_v9  ;;  %v4985_v5 = vld [vmem:[%s6471_s3 + $0x20] ss:$12 sps:$4 sm:$0xff]   ;;  %v4987_v7 = vld [vmem:[%s6471_s3 + $0x30] ss:$12 sps:$4 sm:$0xff]  }
 0x544   :  { %4861 = vpow2.f32 %v4025_v6  ;;  %v4986_v6 = vld [vmem:[%s6471_s3 + $0x34] ss:$12 sps:$4 sm:$0xff]   ;;  %v4988_v8 = vld [vmem:[%s6471_s3 + $0x38] ss:$12 sps:$4 sm:$0xff]  }
 0x545   :  { %4863 = vpow2.f32 %v4026_v10  ;;  %v4989_v9 = vld [vmem:[%s6471_s3 + $0x4c] ss:$12 sps:$4 sm:$0xff]   ;;  %v4990_v10 = vld [vmem:[%s6471_s3 + $0x48] ss:$12 sps:$4 sm:$0xff]  }
 0x54e   :  { %v4862_v11 = vpop.eup %4861 }
 0x54f   :  { %v1831_v12 = vadd.f32 1.0, %v4862_v11  ;;  %v4864_v13 = vpop.eup %4863  ;;  %v4991_v11 = vld [vmem:[%s6471_s3 + $0x50] ss:$12 sps:$4 sm:$0xff]  }
 0x550   :  { %v1841_v60 = vadd.f32 1.0, %v4864_v13  ;;  %v4993_v13 = vld [vmem:[%s6471_s3 + $0x60] ss:$12 sps:$4 sm:$0xff]  }
 0x551   :  { %4865 = vrcp.f32 %v1831_v12  ;;  %v4992_v12 = vld [vmem:[%s6471_s3 + $0x64] ss:$12 sps:$4 sm:$0xff]  }
 0x552   :  { %4867 = vrcp.f32 %v1841_v60  ;;  %v4994_v60 = vld [vmem:[%s6471_s3 + $0x68] ss:$12 sps:$4 sm:$0xff]  }
 0x55b   :  { %v4866_v15 = vpop.eup %4865 }
 0x55c   :  { %v1845_v16 = vmul.f32 %v4866_v15, %v1844_v14  ;;  %v4868_v47 = vpop.eup %4867  ;;  %v4995_v14 = vld [vmem:[%s6471_s3 + $0x7c] ss:$12 sps:$4 sm:$0xff]   ;;  %v4996_v15 = vld [vmem:[%s6471_s3 + $0x78] ss:$12 sps:$4 sm:$0xff]  }
 0x55d   :  { %v1850_v48 = vsub.f32 1.0, %v4868_v47  ;;  %v1852_v53 = vmul.f32 %v4868_v47, %v5652_v56  ;;  %v5000_v47 = vld [vmem:[%s6471_s3 + $0x98] ss:$12 sps:$4 sm:$0xff]  }
 0x55e   :  { %v1848_v46 = vadd.f32 %v1846_v18, %v1845_v16  ;;  %v4997_v16 = vld [vmem:[%s6471_s3 + $0x80] ss:$12 sps:$4 sm:$0xff]  }
 0x55f   :  { %v4998_v18 = vld [vmem:[%s6471_s3 + $0x94] ss:$12 sps:$4 sm:$0xff]  }
 0x560   :  { %4869 = vtanh.f32 %v1848_v46  ;;  %v4999_v46 = vld [vmem:[%s6471_s3 + $0x90] ss:$12 sps:$4 sm:$0xff]  }
 0x56a   :  { %v4870_v51 = vpop.eup %4869 }
 0x56b   :  { %v1851_v52 = vmul.f32 %v4870_v51, %v1850_v48  ;;  %v5001_v48 = vld [vmem:[%s6471_s3 + $0xac] ss:$12 sps:$4 sm:$0xff]   ;;  %v5002_v51 = vld [vmem:[%s6471_s3 + $0xa8] ss:$12 sps:$4 sm:$0xff]  }
 0x56d   :  { %v5694_v54 = vadd.f32 %v1852_v53, %v1851_v52  ;;  %v5003_v52 = vld [vmem:[%s6471_s3 + $0xb0] ss:$12 sps:$4 sm:$0xff]  }
 0x56e   :  { %v1970_v53 = vld [vmem:[#allocation4 + $0x24] sm:$0x3f] }
 0x56f   :  { %1855 = vst [vmem:[#allocation5 + $0x8] sm:$0x3] %v5694_v54  ;;  %v1858_v58 = vpack.c.bf16 %v5694_v54, %v5694_v54 }
 0x571   :  { %1892 = vmatmul.mubr.bf16.vlgmr.msra.gmra.mrb[24].mxu0 %v1858_v58  ;;  %4459 = vmatmul.mubr.bf16.vlgmr.msra.gmra.mrb[24].mxu1 %v1858_v58 }
 0x572   :  { %1973 = vmatpush1.bf16.msra.mxu0 %v5315_v20  ;;  %4463 = vmatpush3.bf16.msra.mxu1 %v5307_v17  ;;  %v1857_v17 = vld [vmem:[#allocation4 + $0x1e] sm:$0x3f] }
 0x573   :  { %1974 = vmatprep.subr.bf16.mxu0 %v5313_v19  ;;  %4464 = vmatprep.subr.bf16.mxu1 %v5077_v2 }
 0x574   :  { %2004 = vmatprep.mubr.bf16.mxu0 %v5078_v3  ;;  %4478 = vmatprep.mubr.msk.bf16.mxu1 %vm5079_vm0, %v5077_v2 }
 0x576   :  { %1975 = vmatpush1.bf16.msra.mxu0 %v5321_v23  ;;  %4465 = vmatpush3.bf16.msra.mxu1 %v5327_v24 }
 0x577   :  { %1976 = vmatprep.subr.bf16.mxu0 %v5333_v25  ;;  %4466 = vmatprep.subr.bf16.mxu1 %v5077_v2 }
 0x57a   :  { %1977 = vmatpush1.bf16.msra.mxu0 %v5343_v26  ;;  %4467 = vmatpush3.bf16.msra.mxu1 %v5349_v27  ;;  %v1948_v27 = vrot.slane %v1857_v17, 2 }
 0x57b   :  { %1978 = vmatprep.subr.bf16.mxu0 %v5355_v28  ;;  %4468 = vmatprep.subr.bf16.mxu1 %v5077_v2 }
 0x57e   :  { %1979 = vmatpush1.bf16.msra.mxu0 %v5362_v31  ;;  %4469 = vmatpush3.bf16.msra.mxu1 %v5368_v32 }
 0x57f   :  { %1980 = vmatprep.subr.bf16.mxu0 %v5374_v33  ;;  %4470 = vmatprep.subr.bf16.mxu1 %v5077_v2 }
 0x582   :  { %1981 = vmatpush1.bf16.msra.mxu0 %v5381_v34  ;;  %4471 = vmatpush3.bf16.msra.mxu1 %v5387_v35 }
 0x583   :  { %1982 = vmatprep.subr.bf16.mxu0 %v5393_v36  ;;  %4472 = vmatprep.subr.bf16.mxu1 %v5077_v2 }
 0x586   :  { %1983 = vmatpush1.bf16.msra.mxu0 %v5400_v37  ;;  %4473 = vmatpush3.bf16.msra.mxu1 %v5406_v38 }
 0x587   :  { %1984 = vmatprep.subr.bf16.mxu0 %v5412_v39  ;;  %4474 = vmatprep.subr.bf16.mxu1 %v5077_v2 }
 0x58a   :  { %1985 = vmatpush1.bf16.msra.mxu0 %v5419_v40  ;;  %4475 = vmatpush3.bf16.msra.mxu1 %v5425_v41 }
 0x58b   :  { %1986 = vmatprep.subr.bf16.mxu0 %v5431_v42  ;;  %4476 = vmatprep.subr.bf16.mxu1 %v5077_v2 }
 0x58e   :  { %1987 = vmatpush1.bf16.msra.mxu0 %v5438_v43  ;;  %4477 = vmatpush3.bf16.msra.mxu1 %v5446_v45  ;;  %v1959_v45 = vrot.slane %v1857_v17, 4 }
 0x58f   :  { %2085 = vmatprep.subr.bf16.mxu0 %v5646_v59  ;;  %4482 = vmatprep.subr.bf16.mxu1 %v5077_v2 }
 0x644   :  { %v1893_v19 = vpop.f32.mrb[24].mxu0  ;;  %v1934_v23 = vpop.f32.mrb[24].mxu1 }
 0x645   :  { %v1940_v24 = vadd.f32 %v1893_v19, %v1857_v17  ;;  %v1895_v25 = vpop.f32.mrb[25].mxu0  ;;  %v4460_v26 = vpop.f32.mrb[25].mxu1  ;;  %v1957_v41 = vadd.f32 %v5517_v22, %v1934_v23 }
 0x646   :  { %v1897_v28 = vpop.f32.mrb[26].mxu0  ;;  %v1937_v31 = vpop.f32.mrb[26].mxu1  ;;  %v1950_v35 = vadd.f32 %v1948_v27, %v1895_v25 }
 0x647   :  { %v4027_v32 = vmul.f32 -1.442695, %v1940_v24  ;;  %v1898_v33 = vpop.f32.mrb[27].mxu0  ;;  %v4461_v34 = vpop.f32.mrb[27].mxu1  ;;  %v2061_v24 = vrot.slane %v1970_v53, 2 }
 0x648   :  { %v4028_v36 = vmul.f32 -1.442695, %v1950_v35 }
 0x649   :  { %4871 = vpow2.f32 %v4027_v32 }
 0x64a   :  { %4873 = vpow2.f32 %v4028_v36 }
 0x653   :  { %v4872_v37 = vpop.eup %4871 }
 0x654   :  { %v1944_v38 = vadd.f32 1.0, %v4872_v37  ;;  %v4874_v39 = vpop.eup %4873 }
 0x655   :  { %v1954_v40 = vadd.f32 1.0, %v4874_v39 }
 0x656   :  { %4875 = vrcp.f32 %v1944_v38 }
 0x657   :  { %4877 = vrcp.f32 %v1954_v40 }
 0x660   :  { %v4876_v42 = vpop.eup %4875 }
 0x661   :  { %v1958_v43 = vmul.f32 %v4876_v42, %v1957_v41  ;;  %v4878_v56 = vpop.eup %4877  ;;  %v2072_v41 = vrot.slane %v1970_v53, 4 }
 0x662   :  { %v1963_v55 = vsub.f32 1.0, %v4878_v56  ;;  %v1965_v44 = vmul.f32 %v4878_v56, %v5694_v54 }
 0x663   :  { %v1961_v59 = vadd.f32 %v1959_v45, %v1958_v43 }
 0x665   :  { %4879 = vtanh.f32 %v1961_v59 }
 0x66f   :  { %v4880_v62 = vpop.eup %4879 }
 0x670   :  { %v1964_v61 = vmul.f32 %v4880_v62, %v1963_v55 }
 0x672   :  { %v5736_v63 = vadd.f32 %v1965_v44, %v1964_v61  ;;  %v4757_v44 = vld [vmem:[%s6470_s2] ss:$12 sps:$4 sm:$0xff]  }
 0x674   :  { %1968 = vst [vmem:[#allocation5 + $0xa] sm:$0x3] %v5736_v63  ;;  %v1971_v0 = vpack.c.bf16 %v5736_v63, %v5736_v63 }
 0x676   :  { %2005 = vmatmul.mubr.bf16.vlgmr.msra.gmra.mrb[28].mxu0 %v1971_v0  ;;  %4479 = vmatmul.mubr.bf16.vlgmr.msra.gmra.mrb[28].mxu1 %v1971_v0  ;;  %v4763_v0 = vld [vmem:[%s6470_s2 + $0x1c] ss:$12 sps:$4 sm:$0xff]  }
 0x677   :  { %2086 = vmatpush1.bf16.msra.mxu0 %v5315_v20  ;;  %4483 = vmatpush3.bf16.msra.mxu1 %v4982_v1  ;;  %v4984_v20 = vld [vmem:[%s6471_s3 + $0x18] ss:$12 sps:$4 sm:$0xff]  }
 0x678   :  { %2087 = vmatprep.subr.bf16.mxu0 %v4983_v4  ;;  %4484 = vmatprep.subr.bf16.mxu1 %v5077_v2  ;;  %v4761_v1 = vld [vmem:[%s6470_s2 + $0x18] ss:$12 sps:$4 sm:$0xff]   ;;  %v4764_v4 = vld [vmem:[%s6470_s2 + $0x20] ss:$12 sps:$4 sm:$0xff]  }
 0x679   :  { %2117 = vmatprep.mubr.bf16.mxu0 %v5078_v3  ;;  %4498 = vmatprep.mubr.msk.bf16.mxu1 %vm5079_vm0, %v5077_v2 }
 0x67b   :  { %2088 = vmatpush1.bf16.msra.mxu0 %v4984_v20  ;;  %4485 = vmatpush3.bf16.msra.mxu1 %v4985_v5  ;;  %v4767_v20 = vld [vmem:[%s6470_s2 + $0x34] ss:$12 sps:$4 sm:$0xff]   ;;  %v4765_v5 = vld [vmem:[%s6470_s2 + $0x30] ss:$12 sps:$4 sm:$0xff]  }
 0x67c   :  { %2089 = vmatprep.subr.bf16.mxu0 %v4986_v6  ;;  %4486 = vmatprep.subr.bf16.mxu1 %v5077_v2  ;;  %v4768_v6 = vld [vmem:[%s6470_s2 + $0x38] ss:$12 sps:$4 sm:$0xff]  }
 0x67f   :  { %2090 = vmatpush1.bf16.msra.mxu0 %v4987_v7  ;;  %4487 = vmatpush3.bf16.msra.mxu1 %v4988_v8  ;;  %v4771_v7 = vld [vmem:[%s6470_s2 + $0x4c] ss:$12 sps:$4 sm:$0xff]   ;;  %v4769_v8 = vld [vmem:[%s6470_s2 + $0x48] ss:$12 sps:$4 sm:$0xff]  }
 0x680   :  { %2091 = vmatprep.subr.bf16.mxu0 %v4989_v9  ;;  %4488 = vmatprep.subr.bf16.mxu1 %v5077_v2  ;;  %v4772_v9 = vld [vmem:[%s6470_s2 + $0x50] ss:$12 sps:$4 sm:$0xff]  }
 0x683   :  { %2092 = vmatpush1.bf16.msra.mxu0 %v4990_v10  ;;  %4489 = vmatpush3.bf16.msra.mxu1 %v4991_v11  ;;  %v4773_v10 = vld [vmem:[%s6470_s2 + $0x60] ss:$12 sps:$4 sm:$0xff]   ;;  %v4775_v11 = vld [vmem:[%s6470_s2 + $0x64] ss:$12 sps:$4 sm:$0xff]  }
 0x684   :  { %2093 = vmatprep.subr.bf16.mxu0 %v4992_v12  ;;  %4490 = vmatprep.subr.bf16.mxu1 %v5077_v2  ;;  %v4776_v12 = vld [vmem:[%s6470_s2 + $0x68] ss:$12 sps:$4 sm:$0xff]  }
 0x687   :  { %2094 = vmatpush1.bf16.msra.mxu0 %v4993_v13  ;;  %4491 = vmatpush3.bf16.msra.mxu1 %v4994_v60  ;;  %v4779_v13 = vld [vmem:[%s6470_s2 + $0x7c] ss:$12 sps:$4 sm:$0xff]   ;;  %v4777_v60 = vld [vmem:[%s6470_s2 + $0x78] ss:$12 sps:$4 sm:$0xff]  }
 0x688   :  { %2095 = vmatprep.subr.bf16.mxu0 %v4995_v14  ;;  %4492 = vmatprep.subr.bf16.mxu1 %v5077_v2  ;;  %v4780_v14 = vld [vmem:[%s6470_s2 + $0x80] ss:$12 sps:$4 sm:$0xff]  }
 0x68b   :  { %2096 = vmatpush1.bf16.msra.mxu0 %v4996_v15  ;;  %4493 = vmatpush3.bf16.msra.mxu1 %v4997_v16  ;;  %v4783_v15 = vld [vmem:[%s6470_s2 + $0x94] ss:$12 sps:$4 sm:$0xff]   ;;  %v4781_v16 = vld [vmem:[%s6470_s2 + $0x90] ss:$12 sps:$4 sm:$0xff]  }
 0x68c   :  { %2097 = vmatprep.subr.bf16.mxu0 %v4998_v18  ;;  %4494 = vmatprep.subr.bf16.mxu1 %v5077_v2  ;;  %v4784_v18 = vld [vmem:[%s6470_s2 + $0x98] ss:$12 sps:$4 sm:$0xff]  }
 0x68f   :  { %2098 = vmatpush1.bf16.msra.mxu0 %v4999_v46  ;;  %4495 = vmatpush3.bf16.msra.mxu1 %v5000_v47  ;;  %v4787_v46 = vld [vmem:[%s6470_s2 + $0xac] ss:$12 sps:$4 sm:$0xff]   ;;  %v4785_v47 = vld [vmem:[%s6470_s2 + $0xa8] ss:$12 sps:$4 sm:$0xff]  }
 0x690   :  { %2099 = vmatprep.subr.bf16.mxu0 %v5001_v48  ;;  %4496 = vmatprep.subr.bf16.mxu1 %v5077_v2  ;;  %v4788_v48 = vld [vmem:[%s6470_s2 + $0xb0] ss:$12 sps:$4 sm:$0xff]  }
 0x693   :  { %2100 = vmatpush1.bf16.msra.mxu0 %v5002_v51  ;;  %4497 = vmatpush3.bf16.msra.mxu1 %v5003_v52  ;;  %v5910_v51 = vld [vmem:[%s6471_s3 + $0xc4] ss:$12 sps:$4 sm:$0xff]   ;;  %v2083_v52 = vld [vmem:[#allocation4 + $0x2a] sm:$0x3f] }
 0x694   :  { %4502 = vmatprep.subr.bf16.mxu1 %v5077_v2 }
 0x749   :  { %v2006_v54 = vpop.f32.mrb[28].mxu0  ;;  %v2047_v58 = vpop.f32.mrb[28].mxu1 }
 0x74a   :  { %v2053_v17 = vadd.f32 %v2006_v54, %v1970_v53  ;;  %v2008_v19 = vpop.f32.mrb[29].mxu0  ;;  %v4480_v23 = vpop.f32.mrb[29].mxu1  ;;  %v2070_v38 = vadd.f32 %v5517_v22, %v2047_v58  ;;  %v4759_v22 = vld [vmem:[%s6470_s2 + $0x4] ss:$12 sps:$4 sm:$0xff]  }
 0x74b   :  { %v2010_v25 = vpop.f32.mrb[30].mxu0  ;;  %v2050_v26 = vpop.f32.mrb[30].mxu1  ;;  %v2063_v32 = vadd.f32 %v2061_v24, %v2008_v19  ;;  %2448 = vmatprep.subr.bf16.mxu0 %v4759_v22  ;;  %v2174_v23 = vrot.slane %v2083_v52, 2  ;;  %v2199_v22 = vld [vmem:[#allocation5 + $0x6] sm:$0x3] }
 0x74c   :  { %v4029_v27 = vmul.f32 -1.442695, %v2053_v17  ;;  %v2011_v28 = vpop.f32.mrb[31].mxu0  ;;  %v4481_v31 = vpop.f32.mrb[31].mxu1 }
 0x74d   :  { %v4030_v33 = vmul.f32 -1.442695, %v2063_v32 }
 0x74e   :  { %4881 = vpow2.f32 %v4029_v27 }
 0x74f   :  { %4883 = vpow2.f32 %v4030_v33 }
 0x758   :  { %v4882_v34 = vpop.eup %4881 }
 0x759   :  { %v2057_v35 = vadd.f32 1.0, %v4882_v34  ;;  %v4884_v36 = vpop.eup %4883 }
 0x75a   :  { %v2067_v37 = vadd.f32 1.0, %v4884_v36 }
 0x75b   :  { %4885 = vrcp.f32 %v2057_v35 }
 0x75c   :  { %4887 = vrcp.f32 %v2067_v37  ;;  %v5004_v37 = vld [vmem:[%s6473_s5] ss:$0 sm:$0xff] }
 0x765   :  { %v4886_v39 = vpop.eup %4885 }
 0x766   :  { %v2071_v40 = vmul.f32 %v4886_v39, %v2070_v38  ;;  %v4888_v43 = vpop.eup %4887 }
 0x767   :  { %v2076_v45 = vsub.f32 1.0, %v4888_v43  ;;  %v2078_v55 = vmul.f32 %v4888_v43, %v5736_v63  ;;  %v4760_v63 = vld [vmem:[%s6470_s2 + $0x8] ss:$12 sps:$4 sm:$0xff]  }
 0x768   :  { %v2074_v42 = vadd.f32 %v2072_v41, %v2071_v40  ;;  %v2185_v41 = vrot.slane %v2083_v52, 4 }
 0x76a   :  { %4889 = vtanh.f32 %v2074_v42 }
 0x774   :  { %v4890_v59 = vpop.eup %4889 }
 0x775   :  { %v2077_v56 = vmul.f32 %v4890_v59, %v2076_v45 }
 0x777   :  { %v5821_v62 = vadd.f32 %v2078_v55, %v2077_v56 }
 0x779   :  { %2081 = vst [vmem:[#allocation5 + $0xc] sm:$0x3] %v5821_v62  ;;  %v2084_v61 = vpack.c.bf16 %v5821_v62, %v5821_v62 }
 0x77b   :  { %2118 = vmatmul.mubr.bf16.vlgmr.msra.gmra.mrb[32].mxu0 %v2084_v61  ;;  %4499 = vmatmul.mubr.bf16.vlgmr.msra.gmra.mrb[32].mxu1 %v2084_v61 }
 0x77c   :  { %2480 = vmatprep.mubr.bf16.mxu0 %v5078_v3  ;;  %4518 = vmatprep.mubr.msk.bf16.mxu1 %vm5079_vm0, %v5077_v2 }
 0x77d   :  { %2449 = vmatpush1.bf16.msra.mxu0 %v4757_v44  ;;  %4503 = vmatpush3.bf16.msra.mxu1 %v4760_v63  ;;  %v2197_v44 = vld [vmem:[#allocation5 + $0x2] sm:$0x3]  ;;  %v2198_v63 = vld [vmem:[#allocation5 + $0x4] sm:$0x3] }
 0x77e   :  { %4504 = vmatprep.subr.bf16.mxu1 %v5077_v2  ;;  %2450 = vmatprep.subr.bf16.mxu0 %v4763_v0  ;;  %v4035_v0 = vpack.c.bf16 %v2199_v22, %v2198_v63 }
 0x781   :  { %2451 = vmatpush1.bf16.msra.mxu0 %v4761_v1  ;;  %4505 = vmatpush3.bf16.msra.mxu1 %v4764_v4  ;;  %v2196_v1 = vld [vmem:[#allocation5] sm:$0x3]  ;;  %v2201_v4 = vld [vmem:[#allocation5 + $0xa] sm:$0x3] }
 0x782   :  { %4506 = vmatprep.subr.bf16.mxu1 %v5077_v2  ;;  %2452 = vmatprep.subr.bf16.mxu0 %v4767_v20  ;;  %v4034_v20 = vpack.c.bf16 %v2197_v44, %v2196_v1 }
 0x785   :  { %2453 = vmatpush1.bf16.msra.mxu0 %v4765_v5  ;;  %4507 = vmatpush3.bf16.msra.mxu1 %v4768_v6  ;;  %v2200_v5 = vld [vmem:[#allocation5 + $0x8] sm:$0x3] }
 0x786   :  { %4508 = vmatprep.subr.bf16.mxu1 %v5077_v2  ;;  %2454 = vmatprep.subr.bf16.mxu0 %v4771_v7  ;;  %v4036_v6 = vpack.c.bf16 %v2201_v4, %v2200_v5  ;;  %v2287_v7 = vrot.slane %v4035_v0, %v5199_v29 }
 0x789   :  { %2455 = vmatpush1.bf16.msra.mxu0 %v4769_v8  ;;  %4509 = vmatpush3.bf16.msra.mxu1 %v4772_v9  ;;  %v2202_v8 = vld [vmem:[#allocation5 + $0xc] sm:$0x3] }
 0x78a   :  { %4510 = vmatprep.subr.bf16.mxu1 %v5077_v2  ;;  %2456 = vmatprep.subr.bf16.mxu0 %v4775_v11  ;;  %v2280_v11 = vrot.slane %v4034_v20, %v5199_v29 }
 0x78d   :  { %2457 = vmatpush1.bf16.msra.mxu0 %v4773_v10  ;;  %4511 = vmatpush3.bf16.msra.mxu1 %v4776_v12 }
 0x78e   :  { %2458 = vmatprep.subr.bf16.mxu0 %v4779_v13  ;;  %4512 = vmatprep.subr.bf16.mxu1 %v5077_v2  ;;  %v2302_v13 = vcombine.low %v2280_v11, %v2287_v7 }
 0x791   :  { %2459 = vmatpush1.bf16.msra.mxu0 %v4777_v60  ;;  %4513 = vmatpush3.bf16.msra.mxu1 %v4780_v14  ;;  %v2310_v14 = vrot.slane %v2302_v13, %v5199_v29 }
 0x792   :  { %2460 = vmatprep.subr.bf16.mxu0 %v4783_v15  ;;  %4514 = vmatprep.subr.bf16.mxu1 %v5077_v2 }
 0x795   :  { %2461 = vmatpush1.bf16.msra.mxu0 %v4781_v16  ;;  %4515 = vmatpush3.bf16.msra.mxu1 %v4784_v18  ;;  %v5928_v16 = vld [vmem:[%s6471_s3 + $0xc0] ss:$12 sps:$4 sm:$0xff]   ;;  %v5933_v18 = vld [vmem:[%s6471_s3 + $0xc8] ss:$12 sps:$4 sm:$0xff]  }
 0x796   :  { %2462 = vmatprep.subr.bf16.mxu0 %v4787_v46  ;;  %4516 = vmatprep.subr.bf16.mxu1 %v5077_v2 }
 0x799   :  { %2463 = vmatpush1.bf16.msra.mxu0 %v4785_v47  ;;  %4517 = vmatpush3.bf16.msra.mxu1 %v4788_v48  ;;  %v5938_v47 = vld [vmem:[%s6471_s3 + $0xdc] ss:$12 sps:$4 sm:$0xff]   ;;  %v5950_v48 = vld [vmem:[%s6471_s3 + $0xe0] ss:$12 sps:$4 sm:$0xff]  }
 0x79a   :  { %2791 = vmatprep.subr.bf16.mxu0 %v5910_v51  ;;  %4522 = vmatprep.subr.bf16.mxu1 %v5077_v2 }
 0x84e   :  { %v2119_v53 = vpop.f32.mrb[32].mxu0  ;;  %v2160_v54 = vpop.f32.mrb[32].mxu1 }
 0x84f   :  { %v2166_v58 = vadd.f32 %v2119_v53, %v2083_v52  ;;  %v2121_v17 = vpop.f32.mrb[33].mxu0  ;;  %v4500_v19 = vpop.f32.mrb[33].mxu1  ;;  %v2183_v38 = vadd.f32 %v5004_v37, %v2160_v54  ;;  %v5956_v52 = vld [vmem:[%s6471_s3 + $0xf4] ss:$12 sps:$4 sm:$0xff]   ;;  %v5966_v53 = vld [vmem:[%s6471_s3 + $0xf0] ss:$12 sps:$4 sm:$0xff]  }
 0x850   :  { %v2123_v24 = vpop.f32.mrb[34].mxu0  ;;  %v2163_v25 = vpop.f32.mrb[34].mxu1  ;;  %v2176_v31 = vadd.f32 %v2174_v23, %v2121_v17  ;;  %v5972_v54 = vld [vmem:[%s6471_s3 + $0xf8] ss:$12 sps:$4 sm:$0xff]   ;;  %v5985_v17 = vld [vmem:[%s6471_s3 + $0x108] ss:$12 sps:$4 sm:$0xff]  }
 0x851   :  { %v4031_v26 = vmul.f32 -1.442695, %v2166_v58  ;;  %v2124_v27 = vpop.f32.mrb[35].mxu0  ;;  %v4501_v28 = vpop.f32.mrb[35].mxu1  ;;  %v5978_v58 = vld [vmem:[%s6471_s3 + $0x10c] ss:$12 sps:$4 sm:$0xff]  }
 0x852   :  { %v4032_v32 = vmul.f32 -1.442695, %v2176_v31  ;;  %v5991_v19 = vld [vmem:[%s6471_s3 + $0x110] ss:$12 sps:$4 sm:$0xff]   ;;  %v6004_v24 = vld [vmem:[%s6471_s3 + $0x120] ss:$12 sps:$4 sm:$0xff]  }
 0x853   :  { %4891 = vpow2.f32 %v4031_v26  ;;  %v5997_v23 = vld [vmem:[%s6471_s3 + $0x124] ss:$12 sps:$4 sm:$0xff]   ;;  %v6010_v25 = vld [vmem:[%s6471_s3 + $0x128] ss:$12 sps:$4 sm:$0xff]   ;;  %v6029_v28 = vld [vmem:[%s6471_s3 + $0x140] ss:$12 sps:$4 sm:$0xff]  }
 0x854   :  { %4893 = vpow2.f32 %v4032_v32  ;;  %v6016_v26 = vld [vmem:[%s6471_s3 + $0x13c] ss:$12 sps:$4 sm:$0xff]   ;;  %v6023_v27 = vld [vmem:[%s6471_s3 + $0x138] ss:$12 sps:$4 sm:$0xff]   ;;  %v6035_v31 = vld [vmem:[%s6471_s3 + $0x154] ss:$12 sps:$4 sm:$0xff]  }
 0x855   :  { %v6042_v32 = vld [vmem:[%s6471_s3 + $0x150] ss:$12 sps:$4 sm:$0xff]  }
 0x856   :  { %v6069_v37 = vld [vmem:[%s6471_s3 + $0x170] ss:$12 sps:$4 sm:$0xff]  }
 0x85d   :  { %v4892_v33 = vpop.eup %4891 }
 0x85e   :  { %v2170_v34 = vadd.f32 1.0, %v4892_v33  ;;  %v4894_v35 = vpop.eup %4893  ;;  %v6048_v33 = vld [vmem:[%s6471_s3 + $0x158] ss:$12 sps:$4 sm:$0xff]  }
 0x85f   :  { %v2180_v36 = vadd.f32 1.0, %v4894_v35  ;;  %v6061_v35 = vld [vmem:[%s6471_s3 + $0x168] ss:$12 sps:$4 sm:$0xff]  }
 0x860   :  { %4895 = vrcp.f32 %v2170_v34  ;;  %v6054_v34 = vld [vmem:[%s6471_s3 + $0x16c] ss:$12 sps:$4 sm:$0xff]  }
 0x861   :  { %4897 = vrcp.f32 %v2180_v36  ;;  %v6063_v36 = vld [vmem:[#allocation2 + $0x2] sm:$0x3] }
 0x86a   :  { %v4896_v39 = vpop.eup %4895 }
 0x86b   :  { %v2184_v40 = vmul.f32 %v4896_v39, %v2183_v38  ;;  %v4898_v43 = vpop.eup %4897  ;;  %v2662_v38 = vpack.c.bf16 %v6063_v36, %v6063_v36  ;;  %v4033_v39 = vld [vmem:[%s6472_s4 + $0x3] sm:$0x7] }
 0x86c   :  { %v2189_v45 = vsub.f32 1.0, %v4898_v43  ;;  %v2191_v55 = vmul.f32 %v4898_v43, %v5821_v62  ;;  %v2294_v62 = vrot.slane %v4036_v6, %v5199_v29 }
 0x86d   :  { %v2187_v42 = vadd.f32 %v2185_v41, %v2184_v40  ;;  %v2250_v40 = vrot.slane %v4033_v39, %v750_v49  ;;  %v2258_v41 = vrot.slane %v4033_v39, %v758_v50 }
 0x86f   :  { %4899 = vtanh.f32 %v2187_v42  ;;  %v2254_v42 = vrot.slane %v4033_v39, %v754_v30 }
 0x879   :  { %v4900_v59 = vpop.eup %4899 }
 0x87a   :  { %v2190_v56 = vmul.f32 %v4900_v59, %v2189_v45 }
 0x87c   :  { %v2192_v61 = vadd.f32 %v2191_v55, %v2190_v56 }
 0x87e   :  { %2194 = vst [vmem:[#allocation5 + $0xe] sm:$0x3] %v2192_v61  ;;  %2195 = vst [vmem:[#allocation2] sm:$0x3] %v2192_v61 }
 0x885   :  { %v2203_v9 = vld [vmem:[#allocation5 + $0xe] sm:$0x3] }
 0x886   :  { %v4037_v10 = vpack.c.bf16 %v2203_v9, %v2202_v8 }
 0x888   :  { %v2301_v12 = vrot.slane %v4037_v10, %v5199_v29 }
 0x88a   :  { %v2303_v60 = vcombine.low %v2294_v62, %v2301_v12 }
 0x88c   :  { %v2317_v15 = vrot.slane %v2303_v60, %v5199_v29  ;;  %v5944_v29 = vld [vmem:[%s6471_s3 + $0xd8] ss:$12 sps:$4 sm:$0xff]  }
 0x88e   :  { %v2318_v46 = vcombine.low %v2310_v14, %v2317_v15 }
 0x890   :  { %2481 = vmatmul.mubr.bf16.vlgmr.msra.gmra.mrb[36].mxu0 %v2318_v46  ;;  %4519 = vmatmul.mubr.bf16.vlgmr.msra.gmra.mrb[36].mxu1 %v2318_v46 }
 0x891   :  { %2792 = vmatpush1.bf16.msra.mxu0 %v5928_v16  ;;  %4523 = vmatpush3.bf16.msra.mxu1 %v5933_v18 }
 0x892   :  { %2793 = vmatprep.subr.bf16.mxu0 %v5938_v47  ;;  %4524 = vmatprep.subr.bf16.mxu1 %v5077_v2 }
 0x893   :  { %2823 = vmatprep.mubr.bf16.mxu0 %v5078_v3  ;;  %4538 = vmatprep.mubr.msk.bf16.mxu1 %vm5079_vm0, %v5077_v2 }
 0x895   :  { %2794 = vmatpush1.bf16.msra.mxu0 %v5944_v29  ;;  %4525 = vmatpush3.bf16.msra.mxu1 %v5950_v48 }
 0x896   :  { %2795 = vmatprep.subr.bf16.mxu0 %v5956_v52  ;;  %4526 = vmatprep.subr.bf16.mxu1 %v5077_v2 }
 0x899   :  { %2796 = vmatpush1.bf16.msra.mxu0 %v5966_v53  ;;  %4527 = vmatpush3.bf16.msra.mxu1 %v5972_v54 }
 0x89a   :  { %2797 = vmatprep.subr.bf16.mxu0 %v5978_v58  ;;  %4528 = vmatprep.subr.bf16.mxu1 %v5077_v2 }
 0x89d   :  { %2798 = vmatpush1.bf16.msra.mxu0 %v5985_v17  ;;  %4529 = vmatpush3.bf16.msra.mxu1 %v5991_v19 }
 0x89e   :  { %2799 = vmatprep.subr.bf16.mxu0 %v5997_v23  ;;  %4530 = vmatprep.subr.bf16.mxu1 %v5077_v2 }
 0x8a1   :  { %2800 = vmatpush1.bf16.msra.mxu0 %v6004_v24  ;;  %4531 = vmatpush3.bf16.msra.mxu1 %v6010_v25 }
 0x8a2   :  { %2801 = vmatprep.subr.bf16.mxu0 %v6016_v26  ;;  %4532 = vmatprep.subr.bf16.mxu1 %v5077_v2 }
 0x8a5   :  { %2802 = vmatpush1.bf16.msra.mxu0 %v6023_v27  ;;  %4533 = vmatpush3.bf16.msra.mxu1 %v6029_v28 }
 0x8a6   :  { %2803 = vmatprep.subr.bf16.mxu0 %v6035_v31  ;;  %4534 = vmatprep.subr.bf16.mxu1 %v5077_v2 }
 0x8a9   :  { %2804 = vmatpush1.bf16.msra.mxu0 %v6042_v32  ;;  %4535 = vmatpush3.bf16.msra.mxu1 %v6048_v33 }
 0x8aa   :  { %2805 = vmatprep.subr.bf16.mxu0 %v6054_v34  ;;  %4536 = vmatprep.subr.bf16.mxu1 %v5077_v2 }
 0x8ad   :  { %2806 = vmatpush1.bf16.msra.mxu0 %v6061_v35  ;;  %4537 = vmatpush3.bf16.msra.mxu1 %v6069_v37 }
 0x8ae   :  { %2908 = vmatprep.subr.bf16.mxu0 %v5910_v51  ;;  %4542 = vmatprep.subr.bf16.mxu1 %v5077_v2 }
 0x8b0   :  { %2824 = vmatmul.mubr.bf16.vlgmr.msra.gmra.mrb[40].mxu0 %v2662_v38  ;;  %4539 = vmatmul.mubr.bf16.vlgmr.msra.gmra.mrb[40].mxu1 %v2662_v38 }
 0x8b1   :  { %2909 = vmatpush1.bf16.msra.mxu0 %v5928_v16  ;;  %4543 = vmatpush3.bf16.msra.mxu1 %v5933_v18 }
 0x8b2   :  { %2910 = vmatprep.subr.bf16.mxu0 %v5938_v47  ;;  %4544 = vmatprep.subr.bf16.mxu1 %v5077_v2 }
 0x8b3   :  { %2940 = vmatprep.mubr.bf16.mxu0 %v5078_v3  ;;  %4558 = vmatprep.mubr.msk.bf16.mxu1 %vm5079_vm0, %v5077_v2 }
 0x8b5   :  { %2911 = vmatpush1.bf16.msra.mxu0 %v5944_v29  ;;  %4545 = vmatpush3.bf16.msra.mxu1 %v5950_v48 }
 0x8b6   :  { %2912 = vmatprep.subr.bf16.mxu0 %v5956_v52  ;;  %4546 = vmatprep.subr.bf16.mxu1 %v5077_v2 }
 0x8b9   :  { %2913 = vmatpush1.bf16.msra.mxu0 %v5966_v53  ;;  %4547 = vmatpush3.bf16.msra.mxu1 %v5972_v54 }
 0x8ba   :  { %2914 = vmatprep.subr.bf16.mxu0 %v5978_v58  ;;  %4548 = vmatprep.subr.bf16.mxu1 %v5077_v2 }
 0x8bd   :  { %2915 = vmatpush1.bf16.msra.mxu0 %v5985_v17  ;;  %4549 = vmatpush3.bf16.msra.mxu1 %v5991_v19 }
 0x8be   :  { %2916 = vmatprep.subr.bf16.mxu0 %v5997_v23  ;;  %4550 = vmatprep.subr.bf16.mxu1 %v5077_v2 }
 0x8c1   :  { %2917 = vmatpush1.bf16.msra.mxu0 %v6004_v24  ;;  %4551 = vmatpush3.bf16.msra.mxu1 %v6010_v25 }
 0x8c2   :  { %2918 = vmatprep.subr.bf16.mxu0 %v6016_v26  ;;  %4552 = vmatprep.subr.bf16.mxu1 %v5077_v2 }
 0x8c5   :  { %2919 = vmatpush1.bf16.msra.mxu0 %v6023_v27  ;;  %4553 = vmatpush3.bf16.msra.mxu1 %v6029_v28 }
 0x8c6   :  { %2920 = vmatprep.subr.bf16.mxu0 %v6035_v31  ;;  %4554 = vmatprep.subr.bf16.mxu1 %v5077_v2 }
 0x8c9   :  { %2921 = vmatpush1.bf16.msra.mxu0 %v6042_v32  ;;  %4555 = vmatpush3.bf16.msra.mxu1 %v6048_v33 }
 0x8ca   :  { %2922 = vmatprep.subr.bf16.mxu0 %v6054_v34  ;;  %4556 = vmatprep.subr.bf16.mxu1 %v5077_v2 }
 0x8cd   :  { %2923 = vmatpush1.bf16.msra.mxu0 %v6061_v35  ;;  %4557 = vmatpush3.bf16.msra.mxu1 %v6069_v37 }
 0x8ce   :  { %3019 = vmatprep.subr.bf16.mxu0 %v5910_v51  ;;  %4562 = vmatprep.subr.bf16.mxu1 %v5077_v2 }
 0x963   :  { %v2482_v43 = vpop.f32.mrb[36].mxu0  ;;  %v2525_v45 = vpop.f32.mrb[36].mxu1 }
 0x964   :  { %v2483_v59 = vadd.f32 %v2482_v43, %v2250_v40  ;;  %v2526_v56 = vadd.f32 %v2525_v45, %v2258_v41  ;;  %v2484_v55 = vpop.f32.mrb[37].mxu0  ;;  %v4520_v61 = vpop.f32.mrb[37].mxu1 }
 0x965   :  { %v2485_v22 = vadd.f32 %v2484_v55, %v2254_v42  ;;  %v2486_v44 = vpop.f32.mrb[38].mxu0  ;;  %v2528_v63 = vpop.f32.mrb[38].mxu1 }
 0x966   :  { %v2540_v0 = vcombine.high %v2526_v56, %v2526_v56  ;;  %v2487_v1 = vadd.f32 %v2486_v44, %v2250_v40  ;;  %v2529_v4 = vadd.f32 %v2528_v63, %v2258_v41  ;;  %v2488_v20 = vpop.f32.mrb[39].mxu0  ;;  %v4521_v49 = vpop.f32.mrb[39].mxu1  ;;  %v2561_v21 = vrot.slane %v2526_v56, %v5504_v57 }
 0x967   :  { %v2538_v5 = vcombine.low %v2483_v59, %v2485_v22  ;;  %v2539_v6 = vcombine.high %v2483_v59, %v2485_v22  ;;  %v2489_v50 = vadd.f32 %v2488_v20, %v2254_v42 }
 0x968   :  { %v2568_v30 = vrot.slane %v2540_v0, %v5504_v57  ;;  %v2575_v7 = vcombine.high %v2529_v4, %v2529_v4  ;;  %v2596_v15 = vrot.slane %v2529_v4, %v5504_v57 }
 0x969   :  { %v2547_v8 = vrot.slane %v2538_v5, %v5504_v57  ;;  %v2554_v9 = vrot.slane %v2539_v6, %v5504_v57  ;;  %v2573_v10 = vcombine.low %v2487_v1, %v2489_v50  ;;  %v2574_v11 = vcombine.high %v2487_v1, %v2489_v50  ;;  %v6134_v50 = vld [vmem:[%s6473_s5 + $0x1] ss:$0 sm:$0xff] }
 0x96a   :  { %v2603_v62 = vrot.slane %v2575_v7, %v5504_v57 }
 0x96b   :  { %v2569_v12 = vcombine.low %v2547_v8, %v2561_v21  ;;  %v2570_v13 = vcombine.high %v2547_v8, %v2561_v21  ;;  %v2571_v60 = vcombine.low %v2554_v9, %v2568_v30  ;;  %v2572_v14 = vcombine.high %v2554_v9, %v2568_v30 }
 0x96c   :  { %v2582_v46 = vrot.slane %v2573_v10, %v5504_v57  ;;  %v2589_v38 = vrot.slane %v2574_v11, %v5504_v57 }
 0x96d   :  { %2616 = vst [vmem:[#allocation4] sm:$0x3f] %v2569_v12  ;;  %2617 = vst [vmem:[#allocation4 + $0x6] sm:$0x3f] %v2570_v13 }
 0x96e   :  { %2618 = vst [vmem:[#allocation4 + $0xc] sm:$0x3f] %v2571_v60  ;;  %2619 = vst [vmem:[#allocation4 + $0x12] sm:$0x3f] %v2572_v14  ;;  %v2604_v39 = vcombine.low %v2582_v46, %v2596_v15  ;;  %v2605_v40 = vcombine.high %v2582_v46, %v2596_v15  ;;  %v2606_v41 = vcombine.low %v2589_v38, %v2603_v62 }
 0x96f   :  { %v2607_v42 = vcombine.high %v2589_v38, %v2603_v62 }
 0x970   :  { %2620 = vst [vmem:[#allocation4 + $0x18] sm:$0x3f] %v2604_v39  ;;  %2621 = vst [vmem:[#allocation4 + $0x1e] sm:$0x3f] %v2605_v40 }
 0x971   :  { %2622 = vst [vmem:[#allocation4 + $0x24] sm:$0x3f] %v2606_v41  ;;  %2623 = vst [vmem:[#allocation4 + $0x2a] sm:$0x3f] %v2607_v42 }
 0x974   :  { %v2661_v43 = vld [vmem:[#allocation4] sm:$0x3f]  ;;  %v2906_v38 = vld [vmem:[#allocation4 + $0x6] sm:$0x3f] }
 0x975   :  { %v2880_v22 = vrot.slane %v2661_v43, 2  ;;  %v2897_v8 = vrot.slane %v2661_v43, 4 }
 0x983   :  { %v2825_v45 = vpop.f32.mrb[40].mxu0  ;;  %v2866_v59 = vpop.f32.mrb[40].mxu1 }
 0x984   :  { %v2872_v56 = vadd.f32 %v2825_v45, %v2661_v43  ;;  %v2827_v55 = vpop.f32.mrb[41].mxu0  ;;  %v4540_v61 = vpop.f32.mrb[41].mxu1  ;;  %v2895_v30 = vadd.f32 %v6134_v50, %v2866_v59  ;;  %v2997_v45 = vrot.slane %v2906_v38, 2 }
 0x985   :  { %v2829_v57 = vpop.f32.mrb[42].mxu0  ;;  %v2869_v44 = vpop.f32.mrb[42].mxu1  ;;  %v2882_v4 = vadd.f32 %v2880_v22, %v2827_v55 }
 0x986   :  { %v4119_v63 = vmul.f32 -1.442695, %v2872_v56  ;;  %v2830_v0 = vpop.f32.mrb[43].mxu0  ;;  %v4541_v1 = vpop.f32.mrb[43].mxu1 }
 0x987   :  { %v4120_v20 = vmul.f32 -1.442695, %v2882_v4 }
 0x988   :  { %4901 = vpow2.f32 %v4119_v63 }
 0x989   :  { %4903 = vpow2.f32 %v4120_v20 }
 0x992   :  { %v4902_v49 = vpop.eup %4901 }
 0x993   :  { %v2876_v5 = vadd.f32 1.0, %v4902_v49  ;;  %v4904_v6 = vpop.eup %4903 }
 0x994   :  { %v2886_v21 = vadd.f32 1.0, %v4904_v6 }
 0x995   :  { %4905 = vrcp.f32 %v2876_v5  ;;  %v3008_v5 = vrot.slane %v2906_v38, 4 }
 0x996   :  { %4907 = vrcp.f32 %v2886_v21 }
 0x99f   :  { %v4906_v7 = vpop.eup %4905 }
 0x9a0   :  { %v2896_v9 = vmul.f32 %v4906_v7, %v2895_v30  ;;  %v4908_v11 = vpop.eup %4907 }
 0x9a1   :  { %v2901_v62 = vsub.f32 1.0, %v4908_v11  ;;  %v2903_v60 = vmul.f32 %v4908_v11, %v6063_v36 }
 0x9a2   :  { %v2899_v10 = vadd.f32 %v2897_v8, %v2896_v9 }
 0x9a4   :  { %4909 = vtanh.f32 %v2899_v10 }
 0x9ae   :  { %v4910_v12 = vpop.eup %4909 }
 0x9af   :  { %v2902_v13 = vmul.f32 %v4910_v12, %v2901_v62 }
 0x9b1   :  { %v6138_v14 = vadd.f32 %v2903_v60, %v2902_v13  ;;  %v3017_v60 = vld [vmem:[#allocation4 + $0xc] sm:$0x3f] }
 0x9b3   :  { %2905 = vst [vmem:[#allocation5] sm:$0x3] %v6138_v14  ;;  %v2907_v15 = vpack.c.bf16 %v6138_v14, %v6138_v14 }
 0x9b5   :  { %2941 = vmatmul.mubr.bf16.vlgmr.msra.gmra.mrb[44].mxu0 %v2907_v15  ;;  %4559 = vmatmul.mubr.bf16.vlgmr.msra.gmra.mrb[44].mxu1 %v2907_v15 }
 0x9b6   :  { %3020 = vmatpush1.bf16.msra.mxu0 %v5928_v16  ;;  %4563 = vmatpush3.bf16.msra.mxu1 %v5933_v18 }
 0x9b7   :  { %3021 = vmatprep.subr.bf16.mxu0 %v5938_v47  ;;  %4564 = vmatprep.subr.bf16.mxu1 %v5077_v2 }
 0x9b8   :  { %3051 = vmatprep.mubr.bf16.mxu0 %v5078_v3  ;;  %4578 = vmatprep.mubr.msk.bf16.mxu1 %vm5079_vm0, %v5077_v2 }
 0x9ba   :  { %v4136_v36 = vld.sshfl [vmem:[#allocation5] sm:$0x11 pattern:$0x75316420]  ;;  %3022 = vmatpush1.bf16.msra.mxu0 %v5944_v29  ;;  %4565 = vmatpush3.bf16.msra.mxu1 %v5950_v48 }
 0x9bb   :  { %v3693_v46 = vcombine.high %v4136_v36, %v4136_v36  ;;  %4137 = vst.sshfl [vmem:[#allocation6] sm:$0x1 pattern:$0x73625140] %v4136_v36  ;;  %3023 = vmatprep.subr.bf16.mxu0 %v5956_v52  ;;  %4566 = vmatprep.subr.bf16.mxu1 %v5077_v2 }
 0x9bd   :  { %4138 = vst.sshfl [vmem:[#allocation6 + $0x8] sm:$0x1 pattern:$0x73625140] %v3693_v46 }
 0x9be   :  { %3024 = vmatpush1.bf16.msra.mxu0 %v5966_v53  ;;  %4567 = vmatpush3.bf16.msra.mxu1 %v5972_v54 }
 0x9bf   :  { %3025 = vmatprep.subr.bf16.mxu0 %v5978_v58  ;;  %4568 = vmatprep.subr.bf16.mxu1 %v5077_v2 }
 0x9c2   :  { %3026 = vmatpush1.bf16.msra.mxu0 %v5985_v17  ;;  %4569 = vmatpush3.bf16.msra.mxu1 %v5991_v19 }
 0x9c3   :  { %3027 = vmatprep.subr.bf16.mxu0 %v5997_v23  ;;  %4570 = vmatprep.subr.bf16.mxu1 %v5077_v2 }
 0x9c6   :  { %3028 = vmatpush1.bf16.msra.mxu0 %v6004_v24  ;;  %4571 = vmatpush3.bf16.msra.mxu1 %v6010_v25 }
 0x9c7   :  { %3029 = vmatprep.subr.bf16.mxu0 %v6016_v26  ;;  %4572 = vmatprep.subr.bf16.mxu1 %v5077_v2 }
 0x9ca   :  { %3030 = vmatpush1.bf16.msra.mxu0 %v6023_v27  ;;  %4573 = vmatpush3.bf16.msra.mxu1 %v6029_v28 }
 0x9cb   :  { %3031 = vmatprep.subr.bf16.mxu0 %v6035_v31  ;;  %4574 = vmatprep.subr.bf16.mxu1 %v5077_v2 }
 0x9ce   :  { %3032 = vmatpush1.bf16.msra.mxu0 %v6042_v32  ;;  %4575 = vmatpush3.bf16.msra.mxu1 %v6048_v33 }
 0x9cf   :  { %3033 = vmatprep.subr.bf16.mxu0 %v6054_v34  ;;  %4576 = vmatprep.subr.bf16.mxu1 %v5077_v2 }
 0x9d2   :  { %3034 = vmatpush1.bf16.msra.mxu0 %v6061_v35  ;;  %4577 = vmatpush3.bf16.msra.mxu1 %v6069_v37 }
 0x9d3   :  { %3130 = vmatprep.subr.bf16.mxu0 %v5910_v51  ;;  %4582 = vmatprep.subr.bf16.mxu1 %v5077_v2 }
 0xa88   :  { %v2942_v39 = vpop.f32.mrb[44].mxu0  ;;  %v2983_v40 = vpop.f32.mrb[44].mxu1 }
 0xa89   :  { %v2989_v41 = vadd.f32 %v2942_v39, %v2906_v38  ;;  %v2944_v42 = vpop.f32.mrb[45].mxu0  ;;  %v4560_v43 = vpop.f32.mrb[45].mxu1  ;;  %v3006_v20 = vadd.f32 %v6134_v50, %v2983_v40  ;;  %v3108_v39 = vrot.slane %v3017_v60, 2 }
 0xa8a   :  { %v2946_v59 = vpop.f32.mrb[46].mxu0  ;;  %v2986_v56 = vpop.f32.mrb[46].mxu1  ;;  %v2999_v57 = vadd.f32 %v2997_v45, %v2944_v42 }
 0xa8b   :  { %v4122_v55 = vmul.f32 -1.442695, %v2989_v41  ;;  %v2947_v61 = vpop.f32.mrb[47].mxu0  ;;  %v4561_v22 = vpop.f32.mrb[47].mxu1 }
 0xa8c   :  { %v4123_v44 = vmul.f32 -1.442695, %v2999_v57 }
 0xa8d   :  { %4911 = vpow2.f32 %v4122_v55 }
 0xa8e   :  { %4913 = vpow2.f32 %v4123_v44 }
 0xa97   :  { %v4912_v63 = vpop.eup %4911 }
 0xa98   :  { %v2993_v0 = vadd.f32 1.0, %v4912_v63  ;;  %v4914_v1 = vpop.eup %4913 }
 0xa99   :  { %v3003_v4 = vadd.f32 1.0, %v4914_v1 }
 0xa9a   :  { %4915 = vrcp.f32 %v2993_v0  ;;  %v3119_v0 = vrot.slane %v3017_v60, 4 }
 0xa9b   :  { %4917 = vrcp.f32 %v3003_v4 }
 0xaa4   :  { %v4916_v49 = vpop.eup %4915 }
 0xaa5   :  { %v3007_v6 = vmul.f32 %v4916_v49, %v3006_v20  ;;  %v4918_v30 = vpop.eup %4917 }
 0xaa6   :  { %v3012_v7 = vsub.f32 1.0, %v4918_v30  ;;  %v3014_v10 = vmul.f32 %v4918_v30, %v6138_v14 }
 0xaa7   :  { %v3010_v21 = vadd.f32 %v3008_v5, %v3007_v6 }
 0xaa9   :  { %4919 = vtanh.f32 %v3010_v21 }
 0xab3   :  { %v4920_v8 = vpop.eup %4919 }
 0xab4   :  { %v3013_v9 = vmul.f32 %v4920_v8, %v3012_v7 }
 0xab6   :  { %v6180_v11 = vadd.f32 %v3014_v10, %v3013_v9  ;;  %v3128_v10 = vld [vmem:[#allocation4 + $0x12] sm:$0x3f] }
 0xab8   :  { %3016 = vst [vmem:[#allocation5 + $0x2] sm:$0x3] %v6180_v11  ;;  %v3018_v62 = vpack.c.bf16 %v6180_v11, %v6180_v11 }
 0xaba   :  { %3052 = vmatmul.mubr.bf16.vlgmr.msra.gmra.mrb[48].mxu0 %v3018_v62  ;;  %4579 = vmatmul.mubr.bf16.vlgmr.msra.gmra.mrb[48].mxu1 %v3018_v62 }
 0xabb   :  { %3131 = vmatpush1.bf16.msra.mxu0 %v5928_v16  ;;  %4583 = vmatpush3.bf16.msra.mxu1 %v5933_v18 }
 0xabc   :  { %3132 = vmatprep.subr.bf16.mxu0 %v5938_v47  ;;  %4584 = vmatprep.subr.bf16.mxu1 %v5077_v2 }
 0xabd   :  { %3162 = vmatprep.mubr.bf16.mxu0 %v5078_v3  ;;  %4598 = vmatprep.mubr.msk.bf16.mxu1 %vm5079_vm0, %v5077_v2 }
 0xabf   :  { %v4139_v12 = vld.sshfl [vmem:[#allocation5 + $0x2] sm:$0x11 pattern:$0x75316420]  ;;  %3133 = vmatpush1.bf16.msra.mxu0 %v5944_v29  ;;  %4585 = vmatpush3.bf16.msra.mxu1 %v5950_v48 }
 0xac0   :  { %v3721_v13 = vcombine.high %v4139_v12, %v4139_v12  ;;  %4140 = vst.sshfl [vmem:[#allocation6 + $0x1] sm:$0x1 pattern:$0x73625140] %v4139_v12  ;;  %3134 = vmatprep.subr.bf16.mxu0 %v5956_v52  ;;  %4586 = vmatprep.subr.bf16.mxu1 %v5077_v2 }
 0xac2   :  { %4141 = vst.sshfl [vmem:[#allocation6 + $0x9] sm:$0x1 pattern:$0x73625140] %v3721_v13 }
 0xac3   :  { %3135 = vmatpush1.bf16.msra.mxu0 %v5966_v53  ;;  %4587 = vmatpush3.bf16.msra.mxu1 %v5972_v54 }
 0xac4   :  { %3136 = vmatprep.subr.bf16.mxu0 %v5978_v58  ;;  %4588 = vmatprep.subr.bf16.mxu1 %v5077_v2 }
 0xac7   :  { %3137 = vmatpush1.bf16.msra.mxu0 %v5985_v17  ;;  %4589 = vmatpush3.bf16.msra.mxu1 %v5991_v19 }
 0xac8   :  { %3138 = vmatprep.subr.bf16.mxu0 %v5997_v23  ;;  %4590 = vmatprep.subr.bf16.mxu1 %v5077_v2 }
 0xacb   :  { %3139 = vmatpush1.bf16.msra.mxu0 %v6004_v24  ;;  %4591 = vmatpush3.bf16.msra.mxu1 %v6010_v25 }
 0xacc   :  { %3140 = vmatprep.subr.bf16.mxu0 %v6016_v26  ;;  %4592 = vmatprep.subr.bf16.mxu1 %v5077_v2 }
 0xacf   :  { %3141 = vmatpush1.bf16.msra.mxu0 %v6023_v27  ;;  %4593 = vmatpush3.bf16.msra.mxu1 %v6029_v28 }
 0xad0   :  { %3142 = vmatprep.subr.bf16.mxu0 %v6035_v31  ;;  %4594 = vmatprep.subr.bf16.mxu1 %v5077_v2 }
 0xad3   :  { %3143 = vmatpush1.bf16.msra.mxu0 %v6042_v32  ;;  %4595 = vmatpush3.bf16.msra.mxu1 %v6048_v33 }
 0xad4   :  { %3144 = vmatprep.subr.bf16.mxu0 %v6054_v34  ;;  %4596 = vmatprep.subr.bf16.mxu1 %v5077_v2 }
 0xad7   :  { %3145 = vmatpush1.bf16.msra.mxu0 %v6061_v35  ;;  %4597 = vmatpush3.bf16.msra.mxu1 %v6069_v37 }
 0xad8   :  { %3241 = vmatprep.subr.bf16.mxu0 %v5910_v51  ;;  %4602 = vmatprep.subr.bf16.mxu1 %v5077_v2 }
 0xb8d   :  { %v3053_v14 = vpop.f32.mrb[48].mxu0  ;;  %v3094_v15 = vpop.f32.mrb[48].mxu1 }
 0xb8e   :  { %v3100_v36 = vadd.f32 %v3053_v14, %v3017_v60  ;;  %v3055_v46 = vpop.f32.mrb[49].mxu0  ;;  %v4580_v38 = vpop.f32.mrb[49].mxu1  ;;  %v3117_v44 = vadd.f32 %v6134_v50, %v3094_v15  ;;  %v3219_v14 = vrot.slane %v3128_v10, 2 }
 0xb8f   :  { %v3057_v40 = vpop.f32.mrb[50].mxu0  ;;  %v3097_v41 = vpop.f32.mrb[50].mxu1  ;;  %v3110_v59 = vadd.f32 %v3108_v39, %v3055_v46 }
 0xb90   :  { %v4124_v42 = vmul.f32 -1.442695, %v3100_v36  ;;  %v3058_v43 = vpop.f32.mrb[51].mxu0  ;;  %v4581_v45 = vpop.f32.mrb[51].mxu1 }
 0xb91   :  { %v4125_v56 = vmul.f32 -1.442695, %v3110_v59 }
 0xb92   :  { %4921 = vpow2.f32 %v4124_v42 }
 0xb93   :  { %4923 = vpow2.f32 %v4125_v56 }
 0xb9c   :  { %v4922_v55 = vpop.eup %4921 }
 0xb9d   :  { %v3104_v61 = vadd.f32 1.0, %v4922_v55  ;;  %v4924_v22 = vpop.eup %4923 }
 0xb9e   :  { %v3114_v57 = vadd.f32 1.0, %v4924_v22 }
 0xb9f   :  { %4925 = vrcp.f32 %v3104_v61  ;;  %v3230_v61 = vrot.slane %v3128_v10, 4 }
 0xba0   :  { %4927 = vrcp.f32 %v3114_v57 }
 0xba9   :  { %v4926_v63 = vpop.eup %4925 }
 0xbaa   :  { %v3118_v1 = vmul.f32 %v4926_v63, %v3117_v44  ;;  %v4928_v20 = vpop.eup %4927 }
 0xbab   :  { %v3123_v49 = vsub.f32 1.0, %v4928_v20  ;;  %v3125_v21 = vmul.f32 %v4928_v20, %v6180_v11 }
 0xbac   :  { %v3121_v4 = vadd.f32 %v3119_v0, %v3118_v1 }
 0xbae   :  { %4929 = vtanh.f32 %v3121_v4 }
 0xbb8   :  { %v4930_v5 = vpop.eup %4929 }
 0xbb9   :  { %v3124_v6 = vmul.f32 %v4930_v5, %v3123_v49 }
 0xbbb   :  { %v6222_v30 = vadd.f32 %v3125_v21, %v3124_v6  ;;  %v3239_v21 = vld [vmem:[#allocation4 + $0x18] sm:$0x3f] }
 0xbbd   :  { %3127 = vst [vmem:[#allocation5 + $0x4] sm:$0x3] %v6222_v30  ;;  %v3129_v7 = vpack.c.bf16 %v6222_v30, %v6222_v30 }
 0xbbf   :  { %3163 = vmatmul.mubr.bf16.vlgmr.msra.gmra.mrb[52].mxu0 %v3129_v7  ;;  %4599 = vmatmul.mubr.bf16.vlgmr.msra.gmra.mrb[52].mxu1 %v3129_v7 }
 0xbc0   :  { %3242 = vmatpush1.bf16.msra.mxu0 %v5928_v16  ;;  %4603 = vmatpush3.bf16.msra.mxu1 %v5933_v18 }
 0xbc1   :  { %3243 = vmatprep.subr.bf16.mxu0 %v5938_v47  ;;  %4604 = vmatprep.subr.bf16.mxu1 %v5077_v2 }
 0xbc2   :  { %3273 = vmatprep.mubr.bf16.mxu0 %v5078_v3  ;;  %4618 = vmatprep.mubr.msk.bf16.mxu1 %vm5079_vm0, %v5077_v2 }
 0xbc4   :  { %v4142_v8 = vld.sshfl [vmem:[#allocation5 + $0x4] sm:$0x11 pattern:$0x75316420]  ;;  %3244 = vmatpush1.bf16.msra.mxu0 %v5944_v29  ;;  %4605 = vmatpush3.bf16.msra.mxu1 %v5950_v48 }
 0xbc5   :  { %v3749_v9 = vcombine.high %v4142_v8, %v4142_v8  ;;  %4143 = vst.sshfl [vmem:[#allocation6 + $0x2] sm:$0x1 pattern:$0x73625140] %v4142_v8  ;;  %3245 = vmatprep.subr.bf16.mxu0 %v5956_v52  ;;  %4606 = vmatprep.subr.bf16.mxu1 %v5077_v2 }
 0xbc7   :  { %4144 = vst.sshfl [vmem:[#allocation6 + $0xa] sm:$0x1 pattern:$0x73625140] %v3749_v9 }
 0xbc8   :  { %3246 = vmatpush1.bf16.msra.mxu0 %v5966_v53  ;;  %4607 = vmatpush3.bf16.msra.mxu1 %v5972_v54 }
 0xbc9   :  { %3247 = vmatprep.subr.bf16.mxu0 %v5978_v58  ;;  %4608 = vmatprep.subr.bf16.mxu1 %v5077_v2 }
 0xbcc   :  { %3248 = vmatpush1.bf16.msra.mxu0 %v5985_v17  ;;  %4609 = vmatpush3.bf16.msra.mxu1 %v5991_v19 }
 0xbcd   :  { %3249 = vmatprep.subr.bf16.mxu0 %v5997_v23  ;;  %4610 = vmatprep.subr.bf16.mxu1 %v5077_v2 }
 0xbd0   :  { %3250 = vmatpush1.bf16.msra.mxu0 %v6004_v24  ;;  %4611 = vmatpush3.bf16.msra.mxu1 %v6010_v25 }
 0xbd1   :  { %3251 = vmatprep.subr.bf16.mxu0 %v6016_v26  ;;  %4612 = vmatprep.subr.bf16.mxu1 %v5077_v2 }
 0xbd4   :  { %3252 = vmatpush1.bf16.msra.mxu0 %v6023_v27  ;;  %4613 = vmatpush3.bf16.msra.mxu1 %v6029_v28 }
 0xbd5   :  { %3253 = vmatprep.subr.bf16.mxu0 %v6035_v31  ;;  %4614 = vmatprep.subr.bf16.mxu1 %v5077_v2 }
 0xbd8   :  { %3254 = vmatpush1.bf16.msra.mxu0 %v6042_v32  ;;  %4615 = vmatpush3.bf16.msra.mxu1 %v6048_v33 }
 0xbd9   :  { %3255 = vmatprep.subr.bf16.mxu0 %v6054_v34  ;;  %4616 = vmatprep.subr.bf16.mxu1 %v5077_v2 }
 0xbdc   :  { %3256 = vmatpush1.bf16.msra.mxu0 %v6061_v35  ;;  %4617 = vmatpush3.bf16.msra.mxu1 %v6069_v37 }
 0xbdd   :  { %3352 = vmatprep.subr.bf16.mxu0 %v5910_v51  ;;  %4622 = vmatprep.subr.bf16.mxu1 %v5077_v2 }
 0xc92   :  { %v3164_v11 = vpop.f32.mrb[52].mxu0  ;;  %v3205_v62 = vpop.f32.mrb[52].mxu1 }
 0xc93   :  { %v3211_v12 = vadd.f32 %v3164_v11, %v3128_v10  ;;  %v3166_v13 = vpop.f32.mrb[53].mxu0  ;;  %v4600_v60 = vpop.f32.mrb[53].mxu1  ;;  %v3228_v56 = vadd.f32 %v6134_v50, %v3205_v62  ;;  %v3330_v11 = vrot.slane %v3239_v21, 2 }
 0xc94   :  { %v3168_v15 = vpop.f32.mrb[54].mxu0  ;;  %v3208_v36 = vpop.f32.mrb[54].mxu1  ;;  %v3221_v40 = vadd.f32 %v3219_v14, %v3166_v13 }
 0xc95   :  { %v4126_v46 = vmul.f32 -1.442695, %v3211_v12  ;;  %v3169_v38 = vpop.f32.mrb[55].mxu0  ;;  %v4601_v39 = vpop.f32.mrb[55].mxu1 }
 0xc96   :  { %v4127_v41 = vmul.f32 -1.442695, %v3221_v40 }
 0xc97   :  { %4931 = vpow2.f32 %v4126_v46 }
 0xc98   :  { %4933 = vpow2.f32 %v4127_v41 }
 0xca1   :  { %v4932_v42 = vpop.eup %4931 }
 0xca2   :  { %v3215_v43 = vadd.f32 1.0, %v4932_v42  ;;  %v4934_v45 = vpop.eup %4933  ;;  %v3341_v42 = vrot.slane %v3239_v21, 4 }
 0xca3   :  { %v3225_v59 = vadd.f32 1.0, %v4934_v45 }
 0xca4   :  { %4935 = vrcp.f32 %v3215_v43 }
 0xca5   :  { %4937 = vrcp.f32 %v3225_v59 }
 0xcae   :  { %v4936_v55 = vpop.eup %4935 }
 0xcaf   :  { %v3229_v22 = vmul.f32 %v4936_v55, %v3228_v56  ;;  %v4938_v44 = vpop.eup %4937 }
 0xcb0   :  { %v3234_v63 = vsub.f32 1.0, %v4938_v44  ;;  %v3236_v4 = vmul.f32 %v4938_v44, %v6222_v30 }
 0xcb1   :  { %v3232_v57 = vadd.f32 %v3230_v61, %v3229_v22 }
 0xcb3   :  { %4939 = vtanh.f32 %v3232_v57 }
 0xcbd   :  { %v4940_v0 = vpop.eup %4939 }
 0xcbe   :  { %v3235_v1 = vmul.f32 %v4940_v0, %v3234_v63 }
 0xcc0   :  { %v6264_v20 = vadd.f32 %v3236_v4, %v3235_v1 }
 0xcc2   :  { %3238 = vst [vmem:[#allocation5 + $0x6] sm:$0x3] %v6264_v20  ;;  %v3240_v49 = vpack.c.bf16 %v6264_v20, %v6264_v20 }
 0xcc4   :  { %3274 = vmatmul.mubr.bf16.vlgmr.msra.gmra.mrb[56].mxu0 %v3240_v49  ;;  %4619 = vmatmul.mubr.bf16.vlgmr.msra.gmra.mrb[56].mxu1 %v3240_v49 }
 0xcc5   :  { %3353 = vmatpush1.bf16.msra.mxu0 %v5928_v16  ;;  %4623 = vmatpush3.bf16.msra.mxu1 %v5933_v18 }
 0xcc6   :  { %3354 = vmatprep.subr.bf16.mxu0 %v5938_v47  ;;  %4624 = vmatprep.subr.bf16.mxu1 %v5077_v2 }
 0xcc7   :  { %3384 = vmatprep.mubr.bf16.mxu0 %v5078_v3  ;;  %4638 = vmatprep.mubr.msk.bf16.mxu1 %vm5079_vm0, %v5077_v2 }
 0xcc9   :  { %v4145_v5 = vld.sshfl [vmem:[#allocation5 + $0x6] sm:$0x11 pattern:$0x75316420]  ;;  %3355 = vmatpush1.bf16.msra.mxu0 %v5944_v29  ;;  %4625 = vmatpush3.bf16.msra.mxu1 %v5950_v48 }
 0xcca   :  { %v3777_v6 = vcombine.high %v4145_v5, %v4145_v5  ;;  %4146 = vst.sshfl [vmem:[#allocation6 + $0x3] sm:$0x1 pattern:$0x73625140] %v4145_v5  ;;  %3356 = vmatprep.subr.bf16.mxu0 %v5956_v52  ;;  %4626 = vmatprep.subr.bf16.mxu1 %v5077_v2 }
 0xccc   :  { %4147 = vst.sshfl [vmem:[#allocation6 + $0xb] sm:$0x1 pattern:$0x73625140] %v3777_v6 }
 0xccd   :  { %3357 = vmatpush1.bf16.msra.mxu0 %v5966_v53  ;;  %4627 = vmatpush3.bf16.msra.mxu1 %v5972_v54 }
 0xcce   :  { %3358 = vmatprep.subr.bf16.mxu0 %v5978_v58  ;;  %4628 = vmatprep.subr.bf16.mxu1 %v5077_v2 }
 0xcd1   :  { %3359 = vmatpush1.bf16.msra.mxu0 %v5985_v17  ;;  %4629 = vmatpush3.bf16.msra.mxu1 %v5991_v19 }
 0xcd2   :  { %3360 = vmatprep.subr.bf16.mxu0 %v5997_v23  ;;  %4630 = vmatprep.subr.bf16.mxu1 %v5077_v2 }
 0xcd5   :  { %3361 = vmatpush1.bf16.msra.mxu0 %v6004_v24  ;;  %4631 = vmatpush3.bf16.msra.mxu1 %v6010_v25 }
 0xcd6   :  { %3362 = vmatprep.subr.bf16.mxu0 %v6016_v26  ;;  %4632 = vmatprep.subr.bf16.mxu1 %v5077_v2 }
 0xcd9   :  { %3363 = vmatpush1.bf16.msra.mxu0 %v6023_v27  ;;  %4633 = vmatpush3.bf16.msra.mxu1 %v6029_v28 }
 0xcda   :  { %3364 = vmatprep.subr.bf16.mxu0 %v6035_v31  ;;  %4634 = vmatprep.subr.bf16.mxu1 %v5077_v2 }
 0xcdd   :  { %3365 = vmatpush1.bf16.msra.mxu0 %v6042_v32  ;;  %4635 = vmatpush3.bf16.msra.mxu1 %v6048_v33 }
 0xcde   :  { %3366 = vmatprep.subr.bf16.mxu0 %v6054_v34  ;;  %4636 = vmatprep.subr.bf16.mxu1 %v5077_v2 }
 0xce1   :  { %3367 = vmatpush1.bf16.msra.mxu0 %v6061_v35  ;;  %4637 = vmatpush3.bf16.msra.mxu1 %v6069_v37 }
 0xce2   :  { %3463 = vmatprep.subr.bf16.mxu0 %v5910_v51  ;;  %4642 = vmatprep.subr.bf16.mxu1 %v5077_v2 }
 0xd97   :  { %v3275_v30 = vpop.f32.mrb[56].mxu0  ;;  %v3316_v7 = vpop.f32.mrb[56].mxu1 }
 0xd98   :  { %v3322_v8 = vadd.f32 %v3275_v30, %v3239_v21  ;;  %v3277_v9 = vpop.f32.mrb[57].mxu0  ;;  %v4620_v10 = vpop.f32.mrb[57].mxu1  ;;  %v3339_v40 = vadd.f32 %v6134_v50, %v3316_v7  ;;  %v5006_v7 = vld [vmem:[%s6471_s3 + $0xc0] ss:$12 sps:$4 sm:$0xff]  }
 0xd99   :  { %v3279_v62 = vpop.f32.mrb[58].mxu0  ;;  %v3319_v12 = vpop.f32.mrb[58].mxu1  ;;  %v3332_v15 = vadd.f32 %v3330_v11, %v3277_v9  ;;  %v5008_v9 = vld [vmem:[%s6471_s3 + $0xdc] ss:$12 sps:$4 sm:$0xff]   ;;  %v5009_v11 = vld [vmem:[%s6471_s3 + $0xd8] ss:$12 sps:$4 sm:$0xff]  }
 0xd9a   :  { %v4128_v13 = vmul.f32 -1.442695, %v3322_v8  ;;  %v3280_v60 = vpop.f32.mrb[59].mxu0  ;;  %v4621_v14 = vpop.f32.mrb[59].mxu1  ;;  %v5007_v8 = vld [vmem:[%s6471_s3 + $0xc8] ss:$12 sps:$4 sm:$0xff]  }
 0xd9b   :  { %v4129_v36 = vmul.f32 -1.442695, %v3332_v15  ;;  %v5010_v62 = vld [vmem:[%s6471_s3 + $0xe0] ss:$12 sps:$4 sm:$0xff]   ;;  %v5013_v60 = vld [vmem:[%s6471_s3 + $0xf8] ss:$12 sps:$4 sm:$0xff]  }
 0xd9c   :  { %4941 = vpow2.f32 %v4128_v13  ;;  %v5012_v13 = vld [vmem:[%s6471_s3 + $0xf0] ss:$12 sps:$4 sm:$0xff]   ;;  %v5014_v14 = vld [vmem:[%s6471_s3 + $0x10c] ss:$12 sps:$4 sm:$0xff]   ;;  %v5015_v15 = vld [vmem:[%s6471_s3 + $0x108] ss:$12 sps:$4 sm:$0xff]  }
 0xd9d   :  { %4943 = vpow2.f32 %v4129_v36  ;;  %v5016_v36 = vld [vmem:[%s6471_s3 + $0x110] ss:$12 sps:$4 sm:$0xff]  }
 0xda6   :  { %v4942_v46 = vpop.eup %4941 }
 0xda7   :  { %v3326_v51 = vadd.f32 1.0, %v4942_v46  ;;  %v4944_v38 = vpop.eup %4943  ;;  %v5017_v46 = vld [vmem:[%s6471_s3 + $0x124] ss:$12 sps:$4 sm:$0xff]  }
 0xda8   :  { %v3336_v39 = vadd.f32 1.0, %v4944_v38  ;;  %v5019_v38 = vld [vmem:[%s6471_s3 + $0x128] ss:$12 sps:$4 sm:$0xff]  }
 0xda9   :  { %4945 = vrcp.f32 %v3326_v51  ;;  %v5018_v51 = vld [vmem:[%s6471_s3 + $0x120] ss:$12 sps:$4 sm:$0xff]  }
 0xdaa   :  { %4947 = vrcp.f32 %v3336_v39  ;;  %v5020_v39 = vld [vmem:[%s6471_s3 + $0x13c] ss:$12 sps:$4 sm:$0xff]  }
 0xdb3   :  { %v4946_v41 = vpop.eup %4945 }
 0xdb4   :  { %v3340_v43 = vmul.f32 %v4946_v41, %v3339_v40  ;;  %v4948_v59 = vpop.eup %4947  ;;  %v5021_v40 = vld [vmem:[%s6471_s3 + $0x138] ss:$12 sps:$4 sm:$0xff]   ;;  %v5022_v41 = vld [vmem:[%s6471_s3 + $0x140] ss:$12 sps:$4 sm:$0xff]  }
 0xdb5   :  { %v3345_v56 = vsub.f32 1.0, %v4948_v59  ;;  %v3347_v22 = vmul.f32 %v4948_v59, %v6264_v20  ;;  %v5026_v59 = vld [vmem:[%s6471_s3 + $0x16c] ss:$12 sps:$4 sm:$0xff]  }
 0xdb6   :  { %v3343_v45 = vadd.f32 %v3341_v42, %v3340_v43  ;;  %v5023_v42 = vld [vmem:[%s6471_s3 + $0x154] ss:$12 sps:$4 sm:$0xff]   ;;  %v5024_v43 = vld [vmem:[%s6471_s3 + $0x150] ss:$12 sps:$4 sm:$0xff]  }
 0xdb8   :  { %4949 = vtanh.f32 %v3343_v45  ;;  %v5025_v45 = vld [vmem:[%s6471_s3 + $0x158] ss:$12 sps:$4 sm:$0xff]  }
 0xdc2   :  { %v4950_v55 = vpop.eup %4949 }
 0xdc3   :  { %v3346_v61 = vmul.f32 %v4950_v55, %v3345_v56  ;;  %v5027_v56 = vld [vmem:[%s6471_s3 + $0x168] ss:$12 sps:$4 sm:$0xff]   ;;  %v5028_v55 = vld [vmem:[%s6471_s3 + $0x170] ss:$12 sps:$4 sm:$0xff]  }
 0xdc5   :  { %v6306_v57 = vadd.f32 %v3347_v22, %v3346_v61  ;;  %v3461_v61 = vld [vmem:[#allocation4 + $0x24] sm:$0x3f] }
 0xdc7   :  { %3349 = vst [vmem:[#allocation5 + $0x8] sm:$0x3] %v6306_v57  ;;  %v3351_v44 = vpack.c.bf16 %v6306_v57, %v6306_v57 }
 0xdc9   :  { %3385 = vmatmul.mubr.bf16.vlgmr.msra.gmra.mrb[60].mxu0 %v3351_v44  ;;  %4639 = vmatmul.mubr.bf16.vlgmr.msra.gmra.mrb[60].mxu1 %v3351_v44 }
 0xdca   :  { %3464 = vmatpush1.bf16.msra.mxu0 %v5928_v16  ;;  %4643 = vmatpush3.bf16.msra.mxu1 %v5933_v18  ;;  %v5005_v16 = vld [vmem:[%s6471_s3 + $0xc4] ss:$12 sps:$4 sm:$0xff]   ;;  %v3350_v18 = vld [vmem:[#allocation4 + $0x1e] sm:$0x3f] }
 0xdcb   :  { %3465 = vmatprep.subr.bf16.mxu0 %v5938_v47  ;;  %4644 = vmatprep.subr.bf16.mxu1 %v5077_v2 }
 0xdcc   :  { %3495 = vmatprep.mubr.bf16.mxu0 %v5078_v3  ;;  %4658 = vmatprep.mubr.msk.bf16.mxu1 %vm5079_vm0, %v5077_v2 }
 0xdce   :  { %v4148_v63 = vld.sshfl [vmem:[#allocation5 + $0x8] sm:$0x11 pattern:$0x75316420]  ;;  %3466 = vmatpush1.bf16.msra.mxu0 %v5944_v29  ;;  %4645 = vmatpush3.bf16.msra.mxu1 %v5950_v48 }
 0xdcf   :  { %v3805_v0 = vcombine.high %v4148_v63, %v4148_v63  ;;  %4149 = vst.sshfl [vmem:[#allocation6 + $0x4] sm:$0x1 pattern:$0x73625140] %v4148_v63  ;;  %3467 = vmatprep.subr.bf16.mxu0 %v5956_v52  ;;  %4646 = vmatprep.subr.bf16.mxu1 %v5077_v2 }
 0xdd1   :  { %4150 = vst.sshfl [vmem:[#allocation6 + $0xc] sm:$0x1 pattern:$0x73625140] %v3805_v0 }
 0xdd2   :  { %3468 = vmatpush1.bf16.msra.mxu0 %v5966_v53  ;;  %4647 = vmatpush3.bf16.msra.mxu1 %v5972_v54  ;;  %v3441_v54 = vrot.slane %v3350_v18, 2 }
 0xdd3   :  { %3469 = vmatprep.subr.bf16.mxu0 %v5978_v58  ;;  %4648 = vmatprep.subr.bf16.mxu1 %v5077_v2 }
 0xdd6   :  { %3470 = vmatpush1.bf16.msra.mxu0 %v5985_v17  ;;  %4649 = vmatpush3.bf16.msra.mxu1 %v5991_v19 }
 0xdd7   :  { %3471 = vmatprep.subr.bf16.mxu0 %v5997_v23  ;;  %4650 = vmatprep.subr.bf16.mxu1 %v5077_v2 }
 0xdda   :  { %3472 = vmatpush1.bf16.msra.mxu0 %v6004_v24  ;;  %4651 = vmatpush3.bf16.msra.mxu1 %v6010_v25 }
 0xddb   :  { %3473 = vmatprep.subr.bf16.mxu0 %v6016_v26  ;;  %4652 = vmatprep.subr.bf16.mxu1 %v5077_v2 }
 0xdde   :  { %3474 = vmatpush1.bf16.msra.mxu0 %v6023_v27  ;;  %4653 = vmatpush3.bf16.msra.mxu1 %v6029_v28 }
 0xddf   :  { %3475 = vmatprep.subr.bf16.mxu0 %v6035_v31  ;;  %4654 = vmatprep.subr.bf16.mxu1 %v5077_v2 }
 0xde2   :  { %3476 = vmatpush1.bf16.msra.mxu0 %v6042_v32  ;;  %4655 = vmatpush3.bf16.msra.mxu1 %v6048_v33 }
 0xde3   :  { %3477 = vmatprep.subr.bf16.mxu0 %v6054_v34  ;;  %4656 = vmatprep.subr.bf16.mxu1 %v5077_v2 }
 0xde6   :  { %3478 = vmatpush1.bf16.msra.mxu0 %v6061_v35  ;;  %4657 = vmatpush3.bf16.msra.mxu1 %v6069_v37  ;;  %v3452_v35 = vrot.slane %v3350_v18, 4 }
 0xde7   :  { %3574 = vmatprep.subr.bf16.mxu0 %v5005_v16  ;;  %4662 = vmatprep.subr.bf16.mxu1 %v5077_v2  ;;  %v3552_v16 = vrot.slane %v3461_v61, 2 }
 0xe9c   :  { %v3386_v47 = vpop.f32.mrb[60].mxu0  ;;  %v3427_v29 = vpop.f32.mrb[60].mxu1 }
 0xe9d   :  { %v3433_v48 = vadd.f32 %v3386_v47, %v3350_v18  ;;  %v3388_v52 = vpop.f32.mrb[61].mxu0  ;;  %v4640_v53 = vpop.f32.mrb[61].mxu1  ;;  %v3450_v33 = vadd.f32 %v6134_v50, %v3427_v29 }
 0xe9e   :  { %v3390_v58 = vpop.f32.mrb[62].mxu0  ;;  %v3430_v17 = vpop.f32.mrb[62].mxu1  ;;  %v3443_v25 = vadd.f32 %v3441_v54, %v3388_v52 }
 0xe9f   :  { %v4130_v19 = vmul.f32 -1.442695, %v3433_v48  ;;  %v3391_v23 = vpop.f32.mrb[63].mxu0  ;;  %v4641_v24 = vpop.f32.mrb[63].mxu1 }
 0xea0   :  { %v4131_v26 = vmul.f32 -1.442695, %v3443_v25  ;;  %v3563_v25 = vrot.slane %v3461_v61, 4 }
 0xea1   :  { %4951 = vpow2.f32 %v4130_v19 }
 0xea2   :  { %4953 = vpow2.f32 %v4131_v26 }
 0xeab   :  { %v4952_v27 = vpop.eup %4951 }
 0xeac   :  { %v3437_v28 = vadd.f32 1.0, %v4952_v27  ;;  %v4954_v31 = vpop.eup %4953 }
 0xead   :  { %v3447_v32 = vadd.f32 1.0, %v4954_v31 }
 0xeae   :  { %4955 = vrcp.f32 %v3437_v28 }
 0xeaf   :  { %4957 = vrcp.f32 %v3447_v32 }
 0xeb8   :  { %v4956_v34 = vpop.eup %4955 }
 0xeb9   :  { %v3451_v37 = vmul.f32 %v4956_v34, %v3450_v33  ;;  %v4958_v4 = vpop.eup %4957 }
 0xeba   :  { %v3456_v20 = vsub.f32 1.0, %v4958_v4  ;;  %v3458_v6 = vmul.f32 %v4958_v4, %v6306_v57 }
 0xebb   :  { %v3454_v1 = vadd.f32 %v3452_v35, %v3451_v37 }
 0xebd   :  { %4959 = vtanh.f32 %v3454_v1 }
 0xec7   :  { %v4960_v49 = vpop.eup %4959 }
 0xec8   :  { %v3457_v5 = vmul.f32 %v4960_v49, %v3456_v20  ;;  %v3572_v20 = vld [vmem:[#allocation4 + $0x2a] sm:$0x3f] }
 0xeca   :  { %v6350_v21 = vadd.f32 %v3458_v6, %v3457_v5 }
 0xecc   :  { %3460 = vst [vmem:[#allocation5 + $0xa] sm:$0x3] %v6350_v21  ;;  %v3462_v30 = vpack.c.bf16 %v6350_v21, %v6350_v21 }
 0xece   :  { %3496 = vmatmul.mubr.bf16.vlgmr.msra.gmra.mrb[64].mxu0 %v3462_v30  ;;  %4659 = vmatmul.mubr.bf16.vlgmr.msra.gmra.mrb[64].mxu1 %v3462_v30 }
 0xecf   :  { %3575 = vmatpush1.bf16.msra.mxu0 %v5006_v7  ;;  %4663 = vmatpush3.bf16.msra.mxu1 %v5007_v8  ;;  %v3663_v8 = vrot.slane %v3572_v20, 2 }
 0xed0   :  { %3576 = vmatprep.subr.bf16.mxu0 %v5008_v9  ;;  %4664 = vmatprep.subr.bf16.mxu1 %v5077_v2 }
 0xed1   :  { %3606 = vmatprep.mubr.bf16.mxu0 %v5078_v3  ;;  %4678 = vmatprep.mubr.msk.bf16.mxu1 %vm5079_vm0, %v5077_v2  ;;  %v5011_v3 = vld [vmem:[%s6471_s3 + $0xf4] ss:$12 sps:$4 sm:$0xff]   ;;  %s5083_s3 = smov [#allocation8]  }
 0xed2   :  { %s3929_s11 = sshll.u32 %s5083_s3, 4  ;;  %s3930_s11 = int_to_ptr.vmem [resolvable:$true] %s3929_s11 }
 0xed3   :  { %v4151_v10 = vld.sshfl [vmem:[#allocation5 + $0xa] sm:$0x11 pattern:$0x75316420]  ;;  %3577 = vmatpush1.bf16.msra.mxu0 %v5009_v11  ;;  %4665 = vmatpush3.bf16.msra.mxu1 %v5010_v62  ;;  %s5029_s14 = scalar_lea.vmem %s3930_s11, 64  ;;  %p5034_p1 = scmp.lt.s32.totalorder %s3930_s11, %s3930_s11 }
 0xed4   :  { %v3833_v12 = vcombine.high %v4151_v10, %v4151_v10  ;;  %4152 = vst.sshfl [vmem:[#allocation6 + $0x5] sm:$0x1 pattern:$0x73625140] %v4151_v10  ;;  %3578 = vmatprep.subr.bf16.mxu0 %v5011_v3  ;;  %4666 = vmatprep.subr.bf16.mxu1 %v5077_v2  ;;  %p5030_p0 = scmp.ne.s32.totalorder %s3930_s11, %s5029_s14  ;;  %p5035_p2 = scmp.lt.s32.totalorder %s5029_s14, %s5029_s14 }
 0xed6   :  { %4153 = vst.sshfl [vmem:[#allocation6 + $0xd] sm:$0x1 pattern:$0x73625140] %v3833_v12  ;;  %p5036_p3 = por %p5035_p2, %p5034_p1 }
 0xed7   :  { %3579 = vmatpush1.bf16.msra.mxu0 %v5012_v13  ;;  %4667 = vmatpush3.bf16.msra.mxu1 %v5013_v60 }
 0xed8   :  { %3580 = vmatprep.subr.bf16.mxu0 %v5014_v14  ;;  %4668 = vmatprep.subr.bf16.mxu1 %v5077_v2  ;;  %p5037_p4 = pnand %p5036_p3, %p5030_p0 }
 0xedb   :  { %3581 = vmatpush1.bf16.msra.mxu0 %v5015_v15  ;;  %4669 = vmatpush3.bf16.msra.mxu1 %v5016_v36 }
 0xedc   :  { %3582 = vmatprep.subr.bf16.mxu0 %v5017_v46  ;;  %4670 = vmatprep.subr.bf16.mxu1 %v5077_v2 }
 0xedf   :  { %3583 = vmatpush1.bf16.msra.mxu0 %v5018_v51  ;;  %4671 = vmatpush3.bf16.msra.mxu1 %v5019_v38  ;;  %v3674_v51 = vrot.slane %v3572_v20, 4 }
 0xee0   :  { %3584 = vmatprep.subr.bf16.mxu0 %v5020_v39  ;;  %4672 = vmatprep.subr.bf16.mxu1 %v5077_v2 }
 0xee3   :  { %3585 = vmatpush1.bf16.msra.mxu0 %v5021_v40  ;;  %4673 = vmatpush3.bf16.msra.mxu1 %v5022_v41 }
 0xee4   :  { %3586 = vmatprep.subr.bf16.mxu0 %v5023_v42  ;;  %4674 = vmatprep.subr.bf16.mxu1 %v5077_v2 }
 0xee7   :  { %3587 = vmatpush1.bf16.msra.mxu0 %v5024_v43  ;;  %4675 = vmatpush3.bf16.msra.mxu1 %v5025_v45 }
 0xee8   :  { %3588 = vmatprep.subr.bf16.mxu0 %v5026_v59  ;;  %4676 = vmatprep.subr.bf16.mxu1 %v5077_v2 }
 0xeeb   :  { %3589 = vmatpush1.bf16.msra.mxu0 %v5027_v56  ;;  %4677 = vmatpush3.bf16.msra.mxu1 %v5028_v55 }
 0xfa1   :  { %v3497_v22 = vpop.f32.mrb[64].mxu0  ;;  %v3538_v57 = vpop.f32.mrb[64].mxu1 }
 0xfa2   :  { %v3544_v44 = vadd.f32 %v3497_v22, %v3461_v61  ;;  %v3499_v63 = vpop.f32.mrb[65].mxu0  ;;  %v4660_v0 = vpop.f32.mrb[65].mxu1  ;;  %v3561_v23 = vadd.f32 %v6134_v50, %v3538_v57 }
 0xfa3   :  { %v3501_v18 = vpop.f32.mrb[66].mxu0  ;;  %v3541_v47 = vpop.f32.mrb[66].mxu1  ;;  %v3554_v52 = vadd.f32 %v3552_v16, %v3499_v63 }
 0xfa4   :  { %v4132_v2 = vmul.f32 -1.442695, %v3544_v44  ;;  %v3502_v29 = vpop.f32.mrb[67].mxu0  ;;  %v4661_v48 = vpop.f32.mrb[67].mxu1 }
 0xfa5   :  { %v4133_v53 = vmul.f32 -1.442695, %v3554_v52 }
 0xfa6   :  { %4961 = vpow2.f32 %v4132_v2 }
 0xfa7   :  { %4963 = vpow2.f32 %v4133_v53 }
 0xfb0   :  { %v4962_v54 = vpop.eup %4961 }
 0xfb1   :  { %v3548_v58 = vadd.f32 1.0, %v4962_v54  ;;  %v4964_v17 = vpop.eup %4963 }
 0xfb2   :  { %v3558_v19 = vadd.f32 1.0, %v4964_v17 }
 0xfb3   :  { %4965 = vrcp.f32 %v3548_v58 }
 0xfb4   :  { %4967 = vrcp.f32 %v3558_v19 }
 0xfbd   :  { %v4966_v24 = vpop.eup %4965 }
 0xfbe   :  { %v3562_v26 = vmul.f32 %v4966_v24, %v3561_v23  ;;  %v4968_v28 = vpop.eup %4967 }
 0xfbf   :  { %v3567_v31 = vsub.f32 1.0, %v4968_v28  ;;  %v3569_v34 = vmul.f32 %v4968_v28, %v6350_v21 }
 0xfc0   :  { %v3565_v27 = vadd.f32 %v3563_v25, %v3562_v26 }
 0xfc2   :  { %4969 = vtanh.f32 %v3565_v27 }
 0xfcc   :  { %v4970_v32 = vpop.eup %4969 }
 0xfcd   :  { %v3568_v33 = vmul.f32 %v4970_v32, %v3567_v31 }
 0xfcf   :  { %v3570_v35 = vadd.f32 %v3569_v34, %v3568_v33 }
 0xfd1   :  { %3571 = vst [vmem:[#allocation5 + $0xc] sm:$0x3] %v3570_v35  ;;  %v3573_v37 = vpack.c.bf16 %v3570_v35, %v3570_v35 }
 0xfd3   :  { %3607 = vmatmul.mubr.bf16.vlgmr.msra.gmra.mrb[68].mxu0 %v3573_v37  ;;  %4679 = vmatmul.mubr.bf16.vlgmr.msra.gmra.mrb[68].mxu1 %v3573_v37 }
 0xfd8   :  { %v4154_v1 = vld.sshfl [vmem:[#allocation5 + $0xc] sm:$0x11 pattern:$0x75316420] }
 0xfd9   :  { %v3861_v4 = vcombine.high %v4154_v1, %v4154_v1  ;;  %4155 = vst.sshfl [vmem:[#allocation6 + $0x6] sm:$0x1 pattern:$0x73625140] %v4154_v1 }
 0xfdb   :  { %4156 = vst.sshfl [vmem:[#allocation6 + $0xe] sm:$0x1 pattern:$0x73625140] %v3861_v4 }
0x10a6   :  { %v3608_v49 = vpop.f32.mrb[68].mxu0  ;;  %v3649_v5 = vpop.f32.mrb[68].mxu1 }
0x10a7   :  { %v3655_v6 = vadd.f32 %v3608_v49, %v3572_v20  ;;  %v3610_v30 = vpop.f32.mrb[69].mxu0  ;;  %v4680_v7 = vpop.f32.mrb[69].mxu1  ;;  %v3672_v36 = vadd.f32 %v6134_v50, %v3649_v5 }
0x10a8   :  { %v3612_v9 = vpop.f32.mrb[70].mxu0  ;;  %v3652_v10 = vpop.f32.mrb[70].mxu1  ;;  %v3665_v12 = vadd.f32 %v3663_v8, %v3610_v30 }
0x10a9   :  { %v4134_v11 = vmul.f32 -1.442695, %v3655_v6  ;;  %v3613_v21 = vpop.f32.mrb[71].mxu0  ;;  %v4681_v62 = vpop.f32.mrb[71].mxu1 }
0x10aa   :  { %v4135_v3 = vmul.f32 -1.442695, %v3665_v12 }
0x10ab   :  { %4971 = vpow2.f32 %v4134_v11 }
0x10ac   :  { %4973 = vpow2.f32 %v4135_v3 }
0x10b5   :  { %v4972_v13 = vpop.eup %4971 }
0x10b6   :  { %v3659_v60 = vadd.f32 1.0, %v4972_v13  ;;  %v4974_v14 = vpop.eup %4973 }
0x10b7   :  { %v3669_v15 = vadd.f32 1.0, %v4974_v14 }
0x10b8   :  { %4975 = vrcp.f32 %v3659_v60 }
0x10b9   :  { %4977 = vrcp.f32 %v3669_v15 }
0x10c2   :  { %v4976_v46 = vpop.eup %4975 }
0x10c3   :  { %v3673_v38 = vmul.f32 %v4976_v46, %v3672_v36  ;;  %v4978_v40 = vpop.eup %4977 }
0x10c4   :  { %v3678_v41 = vsub.f32 1.0, %v4978_v40  ;;  %v3680_v45 = vmul.f32 %v4978_v40, %v3570_v35 }
0x10c5   :  { %v3676_v39 = vadd.f32 %v3674_v51, %v3673_v38 }
0x10c7   :  { %4979 = vtanh.f32 %v3676_v39 }
0x10d1   :  { %v4980_v42 = vpop.eup %4979 }
0x10d2   :  { %v3679_v43 = vmul.f32 %v4980_v42, %v3678_v41 }
0x10d4   :  { %v3681_v59 = vadd.f32 %v3680_v45, %v3679_v43 }
0x10d6   :  { %3682 = vst [vmem:[#allocation5 + $0xe] sm:$0x3] %v3681_v59  ;;  %3683 = vst [vmem:[#allocation2 + $0x2] sm:$0x3] %v3681_v59 }
0x10dd   :  { %v4157_v50 = vld.sshfl [vmem:[#allocation5 + $0xe] sm:$0x11 pattern:$0x75316420]  ;;  %v3908_v56 = vld [vmem:[#allocation2] sm:$0xf]  }
0x10de   :  { %v3889_v55 = vcombine.high %v4157_v50, %v4157_v50  ;;  %4158 = vst.sshfl [vmem:[#allocation6 + $0x7] sm:$0x1 pattern:$0x73625140] %v4157_v50  ;;  %3910 = vst [vmem:[#allocation8] sm:$0xf] %v3908_v56  }
0x10df   :  { %5040 = shalt.err (!%p5037_p4)
}
0x10e0   :  { %s5041_s4 = scalar_lea.hbm %s6475_s7, 64 }
0x10e1   :  { %p5042_p5 = scmp.ne.s32.totalorder %s6475_s7, %s5041_s4  ;;  %p5045_p6 = scmp.lt.u32.totalorder %s5041_s4, %s6475_s7 }
0x10e3   :  { %p5047_p7 = pnand %p5045_p6, %p5042_p5 }
0x10e5   :  { %5050 = shalt.err (!%p5047_p7)
}
0x10e6   :  { %s5085_s19 = smov 32   ;;  %s5086_s20 = smov 2   ;;  %4159 = vst.sshfl [vmem:[#allocation6 + $0xf] sm:$0x1 pattern:$0x73625140] %v3889_v55 }
0x10e7   :  { %3935 = dma.vmem_to_hbm [thread:$0]  %s3930_s11, 64, %s6475_s7, [#allocation9], %s5085_s19, %s5085_s19, %s5086_s20  }
0x10e8   :  { %s5051_s21 = scalar_lea.vmem %s6437_s13, 256  ;;  %p5056_p9 = scmp.lt.s32.totalorder %s6437_s13, %s6437_s13 }
0x10e9   :  { %p5052_p8 = scmp.ne.s32.totalorder %s6437_s13, %s5051_s21  ;;  %p5057_p10 = scmp.lt.s32.totalorder %s5051_s21, %s5051_s21 }
0x10eb   :  { %p5058_p11 = por %p5057_p10, %p5056_p9 }
0x10ed   :  { %p5059_p12 = pnand %p5058_p11, %p5052_p8 }
0x10ef   :  { %5062 = shalt.err (!%p5059_p12)
}
0x10f0   :  { %s5063_s24 = scalar_lea.hbm %s6474_s6, 256 }
0x10f1   :  { %p5064_p13 = scmp.ne.s32.totalorder %s6474_s6, %s5063_s24  ;;  %p5067_p0 = scmp.lt.u32.totalorder %s5063_s24, %s6474_s6 }
0x10f3   :  { %p5069_p1 = pnand %p5067_p0, %p5064_p13 }
0x10f5   :  { %5072 = shalt.err (!%p5069_p1)
}
0x10f6   :  { %s5087_s7 = smov 128   ;;  %s5088_s29 = smov 8  }
0x10f7   :  { %3923 = dma.vmem_to_hbm [thread:$0]  %s6437_s13, 256, %s6474_s6, [#allocation7], %s5087_s7, %s5087_s7, %s5088_s29  }
0x10f8   :  { %5073 = dma.done.wait [#allocation7], 256  }
0x10f9   :  { %5074 = vsyncadd [#allocation7], 4294967040 }
0x10fa   :  { %5075 = dma.done.wait [#allocation9], 64  }
0x10fb   :  { %5076 = vsyncadd [#allocation9], 4294967232 }
0x10fc   :  { %3942 = vsyncpa [#allocation7], 1 }
0x10fd   :  { %3943 = vsyncpa [#allocation9], 1 }

</bundles_post_ra>
